<compile_context>
chip_gen: v7x
topology: tpu7x:2x2x1
jax: 0.10.0
libtpu: 0.0.40
codegen_flags: <defaults>
</compile_context>

<pallas_src>
import functools

import jax
import jax.numpy as jnp
from jax.experimental import pallas as pl
from jax.experimental.pallas import tpu as pltpu

NUM_HEADS = 8        # fixed in the PyTorch module
ENC_HIDDEN = 1024    # fixed encoder width in the PyTorch module
NK_W2 = 4            # number of K-chunks used to pipeline the enc_w2 fetch


def _stable_softplus(x):
    return jnp.maximum(x, 0.0) + jnp.log1p(jnp.exp(-jnp.abs(x)))


def _round_up(n, m):
    return ((n + m - 1) // m) * m


# ----------------------------------------------------------------------------
# Fused kernel: MHA -> Encoder MLP -> reparameterized sample -> Decoder.
# Grid axis pipelines the 1024x1024 enc_w2 weight in 256-row chunks.
# ----------------------------------------------------------------------------
def _ib_fused_kernel(bias_off, out_width,
                     x_ref, wq_ref, wk_ref, wv_ref, wo_ref,
                     w1_ref, w2_ref, w3m_ref, w3s_ref, wd_ref,
                     b_ref, eps_ref,
                     out_ref,
                     h1_scr, h2_scr):
    k = pl.program_id(0)
    nk = pl.num_programs(0)
    B, F = x_ref.shape
    H = w3m_ref.shape[1]
    hd = F // NUM_HEADS
    scale = 1.0 / (hd ** 0.5)

    def bias(name, width):
        off = bias_off[name]
        return b_ref[:, off:off + width]          # static, 128-lane-aligned start

    # ---- step 0: MHA + first encoder layer (w2 chunks 1..3 stream in) -------
    @pl.when(k == 0)
    def _():
        # TODO(synk): nn.Dropout(0.5) layers are identity here (eval-mode semantics).
        x = x_ref[...]                            # (B, F) fp32
        xb = x.astype(jnp.bfloat16)

        q = jnp.dot(xb, wq_ref[...], preferred_element_type=jnp.float32) + bias("bq", F)
        kk = jnp.dot(xb, wk_ref[...], preferred_element_type=jnp.float32) + bias("bk", F)
        v = jnp.dot(xb, wv_ref[...], preferred_element_type=jnp.float32) + bias("bv", F)

        # Head-major (H, B, hd); both contractions are leading-batch batched
        # matmuls (known-clean Mosaic lowering).  At hd=4, B=8 the MXU is
        # inherently underfed, so this is layout plumbing, not throughput.
        qh = pltpu.einshape("bhd->hbd", q.reshape(B, NUM_HEADS, hd)).astype(jnp.bfloat16)
        kh = pltpu.einshape("bhd->hbd", kk.reshape(B, NUM_HEADS, hd)).astype(jnp.bfloat16)
        vh = pltpu.einshape("bhd->hbd", v.reshape(B, NUM_HEADS, hd)).astype(jnp.bfloat16)

        s = jnp.einsum("hqd,hkd->hqk", qh, kh,
                       preferred_element_type=jnp.float32) * scale       # (H, B, B)
        s = s - jnp.max(s, axis=-1, keepdims=True)
        p = jnp.exp(s)
        p = p * pl.reciprocal(jnp.sum(p, axis=-1, keepdims=True), approx=True)
        attn_h = jnp.einsum("hqk,hkd->hqd", p.astype(jnp.bfloat16), vh,
                            preferred_element_type=jnp.float32)          # (H, B, hd)
        attn = pltpu.einshape("hbd->bhd", attn_h).reshape(B, F)          # (B, F)

        y = jnp.dot(attn.astype(jnp.bfloat16), wo_ref[...],
                    preferred_element_type=jnp.float32) + bias("bo", F)

        h1 = jnp.maximum(
            jnp.dot(y.astype(jnp.bfloat16), w1_ref[...],
                    preferred_element_type=jnp.float32) + bias("b1", ENC_HIDDEN), 0.0)
        h1_scr[...] = h1
        h2_scr[...] = jnp.zeros_like(h2_scr)

    # ---- every step: accumulate one K-chunk of the 1024x1024 second layer ---
    ck = w2_ref.shape[0]
    start = pl.multiple_of(k * ck, ck)
    chunk = h1_scr[:, pl.ds(start, ck)].astype(jnp.bfloat16)
    h2_scr[...] += jnp.dot(chunk, w2_ref[...], preferred_element_type=jnp.float32)

    # ---- last step: finish encoder, rsample, decoder, pack lane-dense slab --
    @pl.when(k == nk - 1)
    def _():
        h2 = jnp.maximum(h2_scr[...] + bias("b2", ENC_HIDDEN), 0.0)
        h2b = h2.astype(jnp.bfloat16)
        mu = jnp.dot(h2b, w3m_ref[...], preferred_element_type=jnp.float32) + bias("b3m", H)
        sig_raw = jnp.dot(h2b, w3s_ref[...], preferred_element_type=jnp.float32) + bias("b3s", H)
        sigma = _stable_softplus(sig_raw) + 1e-7

        z = mu + sigma * eps_ref[...]
        out = jnp.dot(z.astype(jnp.bfloat16), wd_ref[...],
                      preferred_element_type=jnp.float32) + bias("bd", 1)

        pad = out_width - (3 * H + 1)
        pieces = [mu, sigma, z, out]
        if pad > 0:
            pieces.append(jnp.zeros((B, pad), jnp.float32))
        out_ref[...] = jnp.concatenate(pieces, axis=1).astype(out_ref.dtype)


# ----------------------------------------------------------------------------
# Parameter init (deterministic, PyTorch-Linear-style uniform fan-in bounds).
# Weights stored transposed as (in_features, out_features); biases as (1, out).
# ----------------------------------------------------------------------------
def init_params(key, feature_dim, hidden_dim):
    def linear(k, fan_in, fan_out):
        bound = 1.0 / (fan_in ** 0.5)
        kw, kb = jax.random.split(k)
        w = jax.random.uniform(kw, (fan_in, fan_out), jnp.float32, -bound, bound)
        b = jax.random.uniform(kb, (1, fan_out), jnp.float32, -bound, bound)
        return w, b

    keys = jax.random.split(key, 6)
    p = {}
    p["attn_w_in"], p["attn_b_in"] = linear(keys[0], feature_dim, 3 * feature_dim)
    p["attn_w_out"], p["attn_b_out"] = linear(keys[1], feature_dim, feature_dim)
    p["enc_w1"], p["enc_b1"] = linear(keys[2], feature_dim, ENC_HIDDEN)
    p["enc_w2"], p["enc_b2"] = linear(keys[3], ENC_HIDDEN, ENC_HIDDEN)
    p["enc_w3"], p["enc_b3"] = linear(keys[4], ENC_HIDDEN, 2 * hidden_dim)
    p["dec_w"], p["dec_b"] = linear(keys[5], hidden_dim, 1)
    return p


# ----------------------------------------------------------------------------
# One-time parameter prep: bf16 casts, packed-weight splits, bias packing.
# Per-forward path never re-casts or re-slices weights (review item 1).
# ----------------------------------------------------------------------------
def prepare_params(params, feature_dim, hidden_dim):
    bf16 = jnp.bfloat16
    F, H = feature_dim, hidden_dim
    w_in, b_in = params["attn_w_in"], params["attn_b_in"]
    w3, b3 = params["enc_w3"], params["enc_b3"]

    prepped = {
        "wq": w_in[:, :F].astype(bf16),
        "wk": w_in[:, F:2 * F].astype(bf16),
        "wv": w_in[:, 2 * F:].astype(bf16),
        "wo": params["attn_w_out"].astype(bf16),
        "w1": params["enc_w1"].astype(bf16),
        "w2": params["enc_w2"].astype(bf16),
        "w3m": w3[:, :H].astype(bf16),
        "w3s": w3[:, H:].astype(bf16),
        "wd": params["dec_w"].astype(bf16),
    }

    # Pack the nine bias rows into one fp32 slab; each segment starts on a
    # 128-lane boundary so the kernel uses static, lane-aligned slices.
    segments = [
        ("bq", b_in[:, :F]), ("bk", b_in[:, F:2 * F]), ("bv", b_in[:, 2 * F:]),
        ("bo", params["attn_b_out"]),
        ("b1", params["enc_b1"]), ("b2", params["enc_b2"]),
        ("b3m", b3[:, :H]), ("b3s", b3[:, H:]),
        ("bd", params["dec_b"]),
    ]
    offsets, pieces, off = {}, [], 0
    for name, seg in segments:
        seg = seg.astype(jnp.float32)
        width = _round_up(seg.shape[1], 128)
        offsets[name] = off
        pieces.append(jnp.pad(seg, ((0, 0), (0, width - seg.shape[1]))))
        off += width
    prepped["bias_slab"] = jnp.concatenate(pieces, axis=1)
    jax.block_until_ready(prepped)
    return prepped, offsets


# ----------------------------------------------------------------------------
# Forward builder: returns a jitted forward(prepped, mp_vec, mt_vec, eps).
# Wrapper only squeezes/concatenates activations; all weight prep is offline.
# ----------------------------------------------------------------------------
def build_ib_regressor_forward(bias_offsets):
    @jax.jit
    def forward(prepped, mean_pooling_vec, merge_text_vec, eps):
        mp = jnp.squeeze(mean_pooling_vec, axis=1)         # (B, F/2)
        mt = jnp.squeeze(merge_text_vec, axis=1)           # (B, F/2)
        packed_x = jnp.concatenate([mp, mt], axis=1).astype(jnp.float32)   # (B, F)
        B, F = packed_x.shape
        assert F % NUM_HEADS == 0, "feature_dim must be divisible by num_heads"
        H = prepped["w3m"].shape[1]
        eps_f = eps.astype(jnp.float32)

        out_width = max(128, _round_up(3 * H + 1, 128))    # lane-dense output slab
        ck = ENC_HIDDEN // NK_W2

        def full_spec(shape):
            nd = len(shape)
            return pl.BlockSpec(shape, lambda k: (0,) * nd)  # DMA'd once (const index)

        grid_spec = pltpu.PrefetchScalarGridSpec(
            num_scalar_prefetch=0,
            grid=(NK_W2,),
            in_specs=[
                full_spec((B, F)),                           # x
                full_spec(prepped["wq"].shape),              # wq
                full_spec(prepped["wk"].shape),              # wk
                full_spec(prepped["wv"].shape),              # wv
                full_spec(prepped["wo"].shape),              # wo
                full_spec(prepped["w1"].shape),              # w1
                pl.BlockSpec((ck, ENC_HIDDEN), lambda k: (k, 0)),   # w2 (pipelined)
                full_spec(prepped["w3m"].shape),             # w3m
                full_spec(prepped["w3s"].shape),             # w3s
                full_spec(prepped["wd"].shape),              # wd
                full_spec(prepped["bias_slab"].shape),       # packed biases
                full_spec((B, H)),                           # eps
            ],
            out_specs=pl.BlockSpec((B, out_width), lambda k: (0, 0)),
            scratch_shapes=[pltpu.VMEM((B, ENC_HIDDEN), jnp.float32),   # h1
                            pltpu.VMEM((B, ENC_HIDDEN), jnp.float32)],  # h2 accumulator
        )

        # TODO(synk): at very large B the (H, B, B) fp32 score tensor should be
        # q-row tiled (online softmax); at these shapes whole-array VMEM
        # residency (~3 MiB) fits every TPU generation with large margin.
        slab = pl.pallas_call(
            functools.partial(_ib_fused_kernel, bias_offsets, out_width),
            out_shape=jax.ShapeDtypeStruct((B, out_width), jnp.float32),
            grid_spec=grid_spec,
            compiler_params=pltpu.CompilerParams(
                dimension_semantics=("arbitrary",),
                vmem_limit_bytes=32 * 1024 * 1024),
        )(packed_x,
          prepped["wq"], prepped["wk"], prepped["wv"], prepped["wo"],
          prepped["w1"], prepped["w2"], prepped["w3m"], prepped["w3s"],
          prepped["wd"], prepped["bias_slab"], eps_f)

        mu = slab[:, :H]
        sigma = slab[:, H:2 * H]
        z = slab[:, 2 * H:3 * H]
        output = slab[:, 3 * H:3 * H + 1]
        # z_dist is returned as its sufficient statistics (mu, sigma).
        return z, output, (mu, sigma)

    return forward


if __name__ == "__main__":
    B = 8
    feature_dim = 32      # embed_dim of the MultiheadAttention / encoder input
    hidden_dim = 16       # z_dim
    half = feature_dim // 2

    key = jax.random.PRNGKey(0)
    k_params, k_mp, k_mt, k_eps = jax.random.split(key, 4)

    params = init_params(k_params, feature_dim, hidden_dim)
    prepped, bias_offsets = prepare_params(params, feature_dim, hidden_dim)   # one-time
    forward = build_ib_regressor_forward(bias_offsets)

    mean_pooling_vec = jax.random.normal(k_mp, (B, 1, half), jnp.float32)
    merge_text_vec = jax.random.normal(k_mt, (B, 1, half), jnp.float32)
    eps = jax.random.normal(k_eps, (B, hidden_dim), jnp.float32)   # rsample noise

    z, output, (mu, sigma) = forward(prepped, mean_pooling_vec, merge_text_vec, eps)
    jax.block_until_ready((z, output, mu, sigma))

    assert z.shape == (B, hidden_dim)
    assert output.shape == (B, 1)
    assert mu.shape == (B, hidden_dim)
    assert sigma.shape == (B, hidden_dim)
    assert bool(jnp.all(sigma > 0))
    assert bool(jnp.all(jnp.isfinite(z)))
    assert bool(jnp.all(jnp.isfinite(output)))

    print("KERNEL_OK")
</pallas_src>

<mosaic_0001>
module attributes {stable_mosaic.version = 11 : i64} {
  func.func @_ib_fused_kernel(%arg0: i32, %arg1: memref<8x32xf32, #tpu.memory_space<vmem>>, %arg2: memref<32x32xbf16, #tpu.memory_space<vmem>>, %arg3: memref<32x32xbf16, #tpu.memory_space<vmem>>, %arg4: memref<32x32xbf16, #tpu.memory_space<vmem>>, %arg5: memref<32x32xbf16, #tpu.memory_space<vmem>>, %arg6: memref<32x1024xbf16, #tpu.memory_space<vmem>>, %arg7: memref<256x1024xbf16, #tpu.memory_space<vmem>>, %arg8: memref<1024x16xbf16, #tpu.memory_space<vmem>>, %arg9: memref<1024x16xbf16, #tpu.memory_space<vmem>>, %arg10: memref<16x1xbf16, #tpu.memory_space<vmem>>, %arg11: memref<1x2944xf32, #tpu.memory_space<vmem>>, %arg12: memref<8x16xf32, #tpu.memory_space<vmem>>, %arg13: memref<8x128xf32, #tpu.memory_space<vmem>>, %arg14: memref<8x1024xf32, #tpu.memory_space<vmem>>, %arg15: memref<8x1024xf32, #tpu.memory_space<vmem>>) attributes {dimension_semantics = [#tpu.dimension_semantics<arbitrary>], iteration_bounds = array<i64: 4>, scalar_prefetch = 0 : i64, scratch_operands = 2 : i64, tpu.core_type = #tpu.core_type<tc>, window_params = [{pipeline_mode = #tpu.pipeline_mode<synchronous>, transform_indices = @transform_0, window_bounds = array<i64: 8, 32>}, {pipeline_mode = #tpu.pipeline_mode<synchronous>, transform_indices = @transform_1, window_bounds = array<i64: 32, 32>}, {pipeline_mode = #tpu.pipeline_mode<synchronous>, transform_indices = @transform_2, window_bounds = array<i64: 32, 32>}, {pipeline_mode = #tpu.pipeline_mode<synchronous>, transform_indices = @transform_3, window_bounds = array<i64: 32, 32>}, {pipeline_mode = #tpu.pipeline_mode<synchronous>, transform_indices = @transform_4, window_bounds = array<i64: 32, 32>}, {pipeline_mode = #tpu.pipeline_mode<synchronous>, transform_indices = @transform_5, window_bounds = array<i64: 32, 1024>}, {transform_indices = @transform_6, window_bounds = array<i64: 256, 1024>}, {pipeline_mode = #tpu.pipeline_mode<synchronous>, transform_indices = @transform_7, window_bounds = array<i64: 1024, 16>}, {pipeline_mode = #tpu.pipeline_mode<synchronous>, transform_indices = @transform_8, window_bounds = array<i64: 1024, 16>}, {pipeline_mode = #tpu.pipeline_mode<synchronous>, transform_indices = @transform_9, window_bounds = array<i64: 16, 1>}, {pipeline_mode = #tpu.pipeline_mode<synchronous>, transform_indices = @transform_10, window_bounds = array<i64: 1, 2944>}, {pipeline_mode = #tpu.pipeline_mode<synchronous>, transform_indices = @transform_11, window_bounds = array<i64: 8, 16>}, {pipeline_mode = #tpu.pipeline_mode<synchronous>, transform_indices = @transform_12, window_bounds = array<i64: 8, 128>}]} {
    %c0_i32 = arith.constant 0 : i32
    %0 = arith.cmpi eq, %arg0, %c0_i32 : i32
    %1 = arith.extui %0 : i1 to i32
    %c0_i32_0 = arith.constant 0 : i32
    %2 = arith.cmpi ne, %1, %c0_i32_0 : i32
    scf.if %2 {
      %c0_8 = arith.constant 0 : index
      %c0_9 = arith.constant 0 : index
      %16 = vector.load %arg1[%c0_8, %c0_9] : memref<8x32xf32, #tpu.memory_space<vmem>>, vector<8x32xf32>
      %17 = arith.truncf %16 : vector<8x32xf32> to vector<8x32xbf16>
      %c0_10 = arith.constant 0 : index
      %c0_11 = arith.constant 0 : index
      %18 = vector.load %arg2[%c0_10, %c0_11] : memref<32x32xbf16, #tpu.memory_space<vmem>>, vector<32x32xbf16>
      %cst_12 = arith.constant dense<0.000000e+00> : vector<8x32xf32>
      %19 = tpu.matmul %17, %18, %cst_12 {dimension_numbers = #tpu.dot_dimension_numbers<[1], [0], [0], [1], [0, 0, 1, 1], [], []>} : vector<8x32xbf16>, vector<32x32xbf16>, vector<8x32xf32> -> vector<8x32xf32>
      %c0_13 = arith.constant 0 : index
      %c0_14 = arith.constant 0 : index
      %20 = vector.load %arg11[%c0_13, %c0_14] : memref<1x2944xf32, #tpu.memory_space<vmem>>, vector<1x32xf32>
      %21 = vector.broadcast %20 : vector<1x32xf32> to vector<8x32xf32>
      %22 = arith.addf %19, %21 : vector<8x32xf32>
      %c0_15 = arith.constant 0 : index
      %c0_16 = arith.constant 0 : index
      %23 = vector.load %arg3[%c0_15, %c0_16] : memref<32x32xbf16, #tpu.memory_space<vmem>>, vector<32x32xbf16>
      %cst_17 = arith.constant dense<0.000000e+00> : vector<8x32xf32>
      %24 = tpu.matmul %17, %23, %cst_17 {dimension_numbers = #tpu.dot_dimension_numbers<[1], [0], [0], [1], [0, 0, 1, 1], [], []>} : vector<8x32xbf16>, vector<32x32xbf16>, vector<8x32xf32> -> vector<8x32xf32>
      %c0_18 = arith.constant 0 : index
      %c128 = arith.constant 128 : index
      %25 = vector.load %arg11[%c0_18, %c128] : memref<1x2944xf32, #tpu.memory_space<vmem>>, vector<1x32xf32>
      %26 = vector.broadcast %25 : vector<1x32xf32> to vector<8x32xf32>
      %27 = arith.addf %24, %26 : vector<8x32xf32>
      %c0_19 = arith.constant 0 : index
      %c0_20 = arith.constant 0 : index
      %28 = vector.load %arg4[%c0_19, %c0_20] : memref<32x32xbf16, #tpu.memory_space<vmem>>, vector<32x32xbf16>
      %cst_21 = arith.constant dense<0.000000e+00> : vector<8x32xf32>
      %29 = tpu.matmul %17, %28, %cst_21 {dimension_numbers = #tpu.dot_dimension_numbers<[1], [0], [0], [1], [0, 0, 1, 1], [], []>} : vector<8x32xbf16>, vector<32x32xbf16>, vector<8x32xf32> -> vector<8x32xf32>
      %c0_22 = arith.constant 0 : index
      %c256 = arith.constant 256 : index
      %30 = vector.load %arg11[%c0_22, %c256] : memref<1x2944xf32, #tpu.memory_space<vmem>>, vector<1x32xf32>
      %31 = vector.broadcast %30 : vector<1x32xf32> to vector<8x32xf32>
      %32 = arith.addf %29, %31 : vector<8x32xf32>
      %33 = vector.shape_cast %22 : vector<8x32xf32> to vector<8x8x4xf32>
      %34 = tpu.transpose %33, [1, 0, 2] : vector<8x8x4xf32> -> vector<8x8x4xf32>
      %35 = arith.truncf %34 : vector<8x8x4xf32> to vector<8x8x4xbf16>
      %36 = vector.shape_cast %27 : vector<8x32xf32> to vector<8x8x4xf32>
      %37 = tpu.transpose %36, [1, 0, 2] : vector<8x8x4xf32> -> vector<8x8x4xf32>
      %38 = arith.truncf %37 : vector<8x8x4xf32> to vector<8x8x4xbf16>
      %39 = vector.shape_cast %32 : vector<8x32xf32> to vector<8x8x4xf32>
      %40 = tpu.transpose %39, [1, 0, 2] : vector<8x8x4xf32> -> vector<8x8x4xf32>
      %41 = arith.truncf %40 : vector<8x8x4xf32> to vector<8x8x4xbf16>
      "tpu.trace_start"() <{level = 10 : i32, message = "hqd,hkd->hqk"}> : () -> ()
      %cst_23 = arith.constant dense<0.000000e+00> : vector<8x8x8xf32>
      %42 = tpu.matmul %35, %38, %cst_23 {dimension_numbers = #tpu.dot_dimension_numbers<[2], [2], [1], [1], [0, 0, 0, 1, 1, 1], [0], [0]>} : vector<8x8x4xbf16>, vector<8x8x4xbf16>, vector<8x8x8xf32> -> vector<8x8x8xf32>
      "tpu.trace_stop"() : () -> ()
      %cst_24 = arith.constant 5.000000e-01 : f32
      %43 = vector.broadcast %cst_24 : f32 to vector<8x8x8xf32>
      %44 = arith.mulf %42, %43 : vector<8x8x8xf32>
      %cst_25 = arith.constant dense<0xFF800000> : vector<8x8xf32>
      %45 = vector.multi_reduction <maximumf>, %44, %cst_25 [2] : vector<8x8x8xf32> to vector<8x8xf32>
      %46 = vector.shape_cast %45 : vector<8x8xf32> to vector<8x8x1xf32>
      %47 = vector.broadcast %46 : vector<8x8x1xf32> to vector<8x8x8xf32>
      %48 = arith.subf %44, %47 : vector<8x8x8xf32>
      %49 = math.exp %48 : vector<8x8x8xf32>
      %cst_26 = arith.constant dense<0.000000e+00> : vector<8x8xf32>
      %50 = vector.multi_reduction <add>, %49, %cst_26 [2] : vector<8x8x8xf32> to vector<8x8xf32>
      %51 = vector.shape_cast %50 : vector<8x8xf32> to vector<8x8x1xf32>
      %52 = tpu.reciprocal %51 {approx = true} : vector<8x8x1xf32> -> vector<8x8x1xf32>
      %53 = vector.broadcast %52 : vector<8x8x1xf32> to vector<8x8x8xf32>
      %54 = arith.mulf %49, %53 : vector<8x8x8xf32>
      %55 = arith.truncf %54 : vector<8x8x8xf32> to vector<8x8x8xbf16>
      "tpu.trace_start"() <{level = 10 : i32, message = "hqk,hkd->hqd"}> : () -> ()
      %cst_27 = arith.constant dense<0.000000e+00> : vector<8x8x4xf32>
      %56 = tpu.matmul %55, %41, %cst_27 {dimension_numbers = #tpu.dot_dimension_numbers<[2], [1], [1], [2], [0, 0, 0, 1, 1, 2], [0], [0]>} : vector<8x8x8xbf16>, vector<8x8x4xbf16>, vector<8x8x4xf32> -> vector<8x8x4xf32>
      "tpu.trace_stop"() : () -> ()
      %57 = tpu.transpose %56, [1, 0, 2] : vector<8x8x4xf32> -> vector<8x8x4xf32>
      %58 = vector.shape_cast %57 : vector<8x8x4xf32> to vector<8x32xf32>
      %59 = arith.truncf %58 : vector<8x32xf32> to vector<8x32xbf16>
      %c0_28 = arith.constant 0 : index
      %c0_29 = arith.constant 0 : index
      %60 = vector.load %arg5[%c0_28, %c0_29] : memref<32x32xbf16, #tpu.memory_space<vmem>>, vector<32x32xbf16>
      %cst_30 = arith.constant dense<0.000000e+00> : vector<8x32xf32>
      %61 = tpu.matmul %59, %60, %cst_30 {dimension_numbers = #tpu.dot_dimension_numbers<[1], [0], [0], [1], [0, 0, 1, 1], [], []>} : vector<8x32xbf16>, vector<32x32xbf16>, vector<8x32xf32> -> vector<8x32xf32>
      %c0_31 = arith.constant 0 : index
      %c384 = arith.constant 384 : index
      %62 = vector.load %arg11[%c0_31, %c384] : memref<1x2944xf32, #tpu.memory_space<vmem>>, vector<1x32xf32>
      %63 = vector.broadcast %62 : vector<1x32xf32> to vector<8x32xf32>
      %64 = arith.addf %61, %63 : vector<8x32xf32>
      %65 = arith.truncf %64 : vector<8x32xf32> to vector<8x32xbf16>
      %c0_32 = arith.constant 0 : index
      %c0_33 = arith.constant 0 : index
      %66 = vector.load %arg6[%c0_32, %c0_33] : memref<32x1024xbf16, #tpu.memory_space<vmem>>, vector<32x1024xbf16>
      %cst_34 = arith.constant dense<0.000000e+00> : vector<8x1024xf32>
      %67 = tpu.matmul %65, %66, %cst_34 {dimension_numbers = #tpu.dot_dimension_numbers<[1], [0], [0], [1], [0, 0, 1, 1], [], []>} : vector<8x32xbf16>, vector<32x1024xbf16>, vector<8x1024xf32> -> vector<8x1024xf32>
      %c0_35 = arith.constant 0 : index
      %c512 = arith.constant 512 : index
      %68 = vector.load %arg11[%c0_35, %c512] : memref<1x2944xf32, #tpu.memory_space<vmem>>, vector<1x1024xf32>
      %69 = vector.broadcast %68 : vector<1x1024xf32> to vector<8x1024xf32>
      %70 = arith.addf %67, %69 : vector<8x1024xf32>
      %cst_36 = arith.constant 0.000000e+00 : f32
      %71 = vector.broadcast %cst_36 : f32 to vector<8x1024xf32>
      %72 = arith.maximumf %70, %71 : vector<8x1024xf32>
      %c0_37 = arith.constant 0 : index
      %c0_38 = arith.constant 0 : index
      %73 = vector.load %arg14[%c0_37, %c0_38] : memref<8x1024xf32, #tpu.memory_space<vmem>>, vector<8x1024xf32>
      tpu.vector_store %arg14[%c0_37, %c0_38], %72 {strides = array<i32>} : memref<8x1024xf32, #tpu.memory_space<vmem>>, vector<8x1024xf32>,
      %cst_39 = arith.constant 0.000000e+00 : f32
      %74 = vector.broadcast %cst_39 : f32 to vector<8x1024xf32>
      %c0_40 = arith.constant 0 : index
      %c0_41 = arith.constant 0 : index
      %75 = vector.load %arg15[%c0_40, %c0_41] : memref<8x1024xf32, #tpu.memory_space<vmem>>, vector<8x1024xf32>
      tpu.vector_store %arg15[%c0_40, %c0_41], %74 {strides = array<i32>} : memref<8x1024xf32, #tpu.memory_space<vmem>>, vector<8x1024xf32>,
    } else {
    }
    %c256_i32 = arith.constant 256 : i32
    %3 = arith.muli %arg0, %c256_i32 : i32
    %4 = tpu.assume_multiple %3, 256 : i32
    %c0 = arith.constant 0 : index
    %5 = arith.index_cast %4 : i32 to index
    %6 = vector.load %arg14[%c0, %5] : memref<8x1024xf32, #tpu.memory_space<vmem>>, vector<8x256xf32>
    %7 = arith.truncf %6 : vector<8x256xf32> to vector<8x256xbf16>
    %c0_1 = arith.constant 0 : index
    %c0_2 = arith.constant 0 : index
    %8 = vector.load %arg15[%c0_1, %c0_2] : memref<8x1024xf32, #tpu.memory_space<vmem>>, vector<8x1024xf32>
    %c0_3 = arith.constant 0 : index
    %c0_4 = arith.constant 0 : index
    %9 = vector.load %arg7[%c0_3, %c0_4] : memref<256x1024xbf16, #tpu.memory_space<vmem>>, vector<256x1024xbf16>
    %cst = arith.constant dense<0.000000e+00> : vector<8x1024xf32>
    %10 = tpu.matmul %7, %9, %cst {dimension_numbers = #tpu.dot_dimension_numbers<[1], [0], [0], [1], [0, 0, 1, 1], [], []>} : vector<8x256xbf16>, vector<256x1024xbf16>, vector<8x1024xf32> -> vector<8x1024xf32>
    %11 = arith.addf %8, %10 : vector<8x1024xf32>
    %c0_5 = arith.constant 0 : index
    %c0_6 = arith.constant 0 : index
    %12 = vector.load %arg15[%c0_5, %c0_6] : memref<8x1024xf32, #tpu.memory_space<vmem>>, vector<8x1024xf32>
    tpu.vector_store %arg15[%c0_5, %c0_6], %11 {strides = array<i32>} : memref<8x1024xf32, #tpu.memory_space<vmem>>, vector<8x1024xf32>,
    %c3_i32 = arith.constant 3 : i32
    %13 = arith.cmpi eq, %arg0, %c3_i32 : i32
    %14 = arith.extui %13 : i1 to i32
    %c0_i32_7 = arith.constant 0 : i32
    %15 = arith.cmpi ne, %14, %c0_i32_7 : i32
    scf.if %15 {
      %c0_8 = arith.constant 0 : index
      %c0_9 = arith.constant 0 : index
      %16 = vector.load %arg15[%c0_8, %c0_9] : memref<8x1024xf32, #tpu.memory_space<vmem>>, vector<8x1024xf32>
      %c0_10 = arith.constant 0 : index
      %c1536 = arith.constant 1536 : index
      %17 = vector.load %arg11[%c0_10, %c1536] : memref<1x2944xf32, #tpu.memory_space<vmem>>, vector<1x1024xf32>
      %18 = vector.broadcast %17 : vector<1x1024xf32> to vector<8x1024xf32>
      %19 = arith.addf %16, %18 : vector<8x1024xf32>
      %cst_11 = arith.constant 0.000000e+00 : f32
      %20 = vector.broadcast %cst_11 : f32 to vector<8x1024xf32>
      %21 = arith.maximumf %19, %20 : vector<8x1024xf32>
      %22 = arith.truncf %21 : vector<8x1024xf32> to vector<8x1024xbf16>
      %c0_12 = arith.constant 0 : index
      %c0_13 = arith.constant 0 : index
      %23 = vector.load %arg8[%c0_12, %c0_13] : memref<1024x16xbf16, #tpu.memory_space<vmem>>, vector<1024x16xbf16>
      %cst_14 = arith.constant dense<0.000000e+00> : vector<8x16xf32>
      %24 = tpu.matmul %22, %23, %cst_14 {dimension_numbers = #tpu.dot_dimension_numbers<[1], [0], [0], [1], [0, 0, 1, 1], [], []>} : vector<8x1024xbf16>, vector<1024x16xbf16>, vector<8x16xf32> -> vector<8x16xf32>
      %c0_15 = arith.constant 0 : index
      %c2560 = arith.constant 2560 : index
      %25 = vector.load %arg11[%c0_15, %c2560] : memref<1x2944xf32, #tpu.memory_space<vmem>>, vector<1x16xf32>
      %26 = vector.broadcast %25 : vector<1x16xf32> to vector<8x16xf32>
      %27 = arith.addf %24, %26 : vector<8x16xf32>
      %c0_16 = arith.constant 0 : index
      %c0_17 = arith.constant 0 : index
      %28 = vector.load %arg9[%c0_16, %c0_17] : memref<1024x16xbf16, #tpu.memory_space<vmem>>, vector<1024x16xbf16>
      %cst_18 = arith.constant dense<0.000000e+00> : vector<8x16xf32>
      %29 = tpu.matmul %22, %28, %cst_18 {dimension_numbers = #tpu.dot_dimension_numbers<[1], [0], [0], [1], [0, 0, 1, 1], [], []>} : vector<8x1024xbf16>, vector<1024x16xbf16>, vector<8x16xf32> -> vector<8x16xf32>
      %c0_19 = arith.constant 0 : index
      %c2688 = arith.constant 2688 : index
      %30 = vector.load %arg11[%c0_19, %c2688] : memref<1x2944xf32, #tpu.memory_space<vmem>>, vector<1x16xf32>
      %31 = vector.broadcast %30 : vector<1x16xf32> to vector<8x16xf32>
      %32 = arith.addf %29, %31 : vector<8x16xf32>
      %cst_20 = arith.constant 0.000000e+00 : f32
      %33 = vector.broadcast %cst_20 : f32 to vector<8x16xf32>
      %34 = arith.maximumf %32, %33 : vector<8x16xf32>
      %35 = math.absf %32 : vector<8x16xf32>
      %cst_21 = arith.constant 0.000000e+00 : f32
      %36 = vector.broadcast %cst_21 : f32 to vector<8x16xf32>
      %37 = arith.subf %36, %35 : vector<8x16xf32>
      %38 = math.exp %37 : vector<8x16xf32>
      %39 = math.log1p %38 : vector<8x16xf32>
      %40 = arith.addf %34, %39 : vector<8x16xf32>
      %cst_22 = arith.constant 1.000000e-07 : f32
      %41 = vector.broadcast %cst_22 : f32 to vector<8x16xf32>
      %42 = arith.addf %40, %41 : vector<8x16xf32>
      %c0_23 = arith.constant 0 : index
      %c0_24 = arith.constant 0 : index
      %43 = vector.load %arg12[%c0_23, %c0_24] : memref<8x16xf32, #tpu.memory_space<vmem>>, vector<8x16xf32>
      %44 = arith.mulf %42, %43 : vector<8x16xf32>
      %45 = arith.addf %27, %44 : vector<8x16xf32>
      %46 = arith.truncf %45 : vector<8x16xf32> to vector<8x16xbf16>
      %c0_25 = arith.constant 0 : index
      %c0_26 = arith.constant 0 : index
      %47 = vector.load %arg10[%c0_25, %c0_26] : memref<16x1xbf16, #tpu.memory_space<vmem>>, vector<16x1xbf16>
      %cst_27 = arith.constant dense<0.000000e+00> : vector<8x1xf32>
      %48 = tpu.matmul %46, %47, %cst_27 {dimension_numbers = #tpu.dot_dimension_numbers<[1], [0], [0], [1], [0, 0, 1, 1], [], []>} : vector<8x16xbf16>, vector<16x1xbf16>, vector<8x1xf32> -> vector<8x1xf32>
      %c0_28 = arith.constant 0 : index
      %c2816 = arith.constant 2816 : index
      %49 = vector.load %arg11[%c0_28, %c2816] : memref<1x2944xf32, #tpu.memory_space<vmem>>, vector<1x1xf32>
      %50 = vector.broadcast %49 : vector<1x1xf32> to vector<8x1xf32>
      %51 = arith.addf %48, %50 : vector<8x1xf32>
      %cst_29 = arith.constant 0.000000e+00 : f32
      %52 = vector.broadcast %cst_29 : f32 to vector<8x79xf32>
      %53 = tpu.concatenate %27, %42, %45, %51, %52 in 1 : vector<8x16xf32>, vector<8x16xf32>, vector<8x16xf32>, vector<8x1xf32>, vector<8x79xf32> -> vector<8x128xf32>
      %c0_30 = arith.constant 0 : index
      %c0_31 = arith.constant 0 : index
      %54 = vector.load %arg13[%c0_30, %c0_31] : memref<8x128xf32, #tpu.memory_space<vmem>>, vector<8x128xf32>
      tpu.vector_store %arg13[%c0_30, %c0_31], %53 {strides = array<i32>} : memref<8x128xf32, #tpu.memory_space<vmem>>, vector<8x128xf32>,
    } else {
    }
    return
  }
  func.func @transform_0(%arg0: i32) -> (i32, i32) {
    %c0_i32 = arith.constant 0 : i32
    %c0_i32_0 = arith.constant 0 : i32
    %c0_i32_1 = arith.constant 0 : i32
    return %c0_i32, %c0_i32_0 : i32, i32
  }
  func.func @transform_1(%arg0: i32) -> (i32, i32) {
    %c0_i32 = arith.constant 0 : i32
    %c0_i32_0 = arith.constant 0 : i32
    %c0_i32_1 = arith.constant 0 : i32
    return %c0_i32, %c0_i32_0 : i32, i32
  }
  func.func @transform_2(%arg0: i32) -> (i32, i32) {
    %c0_i32 = arith.constant 0 : i32
    %c0_i32_0 = arith.constant 0 : i32
    %c0_i32_1 = arith.constant 0 : i32
    return %c0_i32, %c0_i32_0 : i32, i32
  }
  func.func @transform_3(%arg0: i32) -> (i32, i32) {
    %c0_i32 = arith.constant 0 : i32
    %c0_i32_0 = arith.constant 0 : i32
    %c0_i32_1 = arith.constant 0 : i32
    return %c0_i32, %c0_i32_0 : i32, i32
  }
  func.func @transform_4(%arg0: i32) -> (i32, i32) {
    %c0_i32 = arith.constant 0 : i32
    %c0_i32_0 = arith.constant 0 : i32
    %c0_i32_1 = arith.constant 0 : i32
    return %c0_i32, %c0_i32_0 : i32, i32
  }
  func.func @transform_5(%arg0: i32) -> (i32, i32) {
    %c0_i32 = arith.constant 0 : i32
    %c0_i32_0 = arith.constant 0 : i32
    %c0_i32_1 = arith.constant 0 : i32
    return %c0_i32, %c0_i32_0 : i32, i32
  }
  func.func @transform_6(%arg0: i32) -> (i32, i32) {
    %c0_i32 = arith.constant 0 : i32
    %c0_i32_0 = arith.constant 0 : i32
    return %arg0, %c0_i32 : i32, i32
  }
  func.func @transform_7(%arg0: i32) -> (i32, i32) {
    %c0_i32 = arith.constant 0 : i32
    %c0_i32_0 = arith.constant 0 : i32
    %c0_i32_1 = arith.constant 0 : i32
    return %c0_i32, %c0_i32_0 : i32, i32
  }
  func.func @transform_8(%arg0: i32) -> (i32, i32) {
    %c0_i32 = arith.constant 0 : i32
    %c0_i32_0 = arith.constant 0 : i32
    %c0_i32_1 = arith.constant 0 : i32
    return %c0_i32, %c0_i32_0 : i32, i32
  }
  func.func @transform_9(%arg0: i32) -> (i32, i32) {
    %c0_i32 = arith.constant 0 : i32
    %c0_i32_0 = arith.constant 0 : i32
    %c0_i32_1 = arith.constant 0 : i32
    return %c0_i32, %c0_i32_0 : i32, i32
  }
  func.func @transform_10(%arg0: i32) -> (i32, i32) {
    %c0_i32 = arith.constant 0 : i32
    %c0_i32_0 = arith.constant 0 : i32
    %c0_i32_1 = arith.constant 0 : i32
    return %c0_i32, %c0_i32_0 : i32, i32
  }
  func.func @transform_11(%arg0: i32) -> (i32, i32) {
    %c0_i32 = arith.constant 0 : i32
    %c0_i32_0 = arith.constant 0 : i32
    %c0_i32_1 = arith.constant 0 : i32
    return %c0_i32, %c0_i32_0 : i32, i32
  }
  func.func @transform_12(%arg0: i32) -> (i32, i32) {
    %c0_i32 = arith.constant 0 : i32
    %c0_i32_0 = arith.constant 0 : i32
    %c0_i32_1 = arith.constant 0 : i32
    return %c0_i32, %c0_i32_0 : i32, i32
  }
}

</mosaic_0001>

<bundles_post_ra>
// kernel: forward.1
= control target key start
LH: loop header
LB: loop body
LE: loop exit
PB: predicated region body
PF: predicated region fallthrough
CT: control target
= control target key end

     0   :  { %s8521_s0 = inlined_call_operand.vmem [shape: f32[8,32], index: 0, kind: input, shape index: {}]   ;;  %s8522_s1 = inlined_call_operand.hbm [shape: bf16[32,32], index: 1, kind: input, shape index: {}]   ;;  %s8523_s2 = inlined_call_operand.hbm [shape: bf16[32,32], index: 2, kind: input, shape index: {}]   ;;  %s8524_s3 = inlined_call_operand.hbm [shape: bf16[32,32], index: 3, kind: input, shape index: {}]   ;;  %s8525_s4 = inlined_call_operand.hbm [shape: bf16[32,32], index: 4, kind: input, shape index: {}]   ;;  %s8526_s5 = inlined_call_operand.hbm [shape: bf16[32,1024], index: 5, kind: input, shape index: {}]   ;;  %s8527_s6 = inlined_call_operand.hbm [shape: bf16[1024,1024], index: 6, kind: input, shape index: {}]   ;;  %s8528_s7 = inlined_call_operand.vmem [shape: bf16[1024,16], index: 7, kind: input, shape index: {}]   ;;  %s8529_s8 = inlined_call_operand.vmem [shape: bf16[1024,16], index: 8, kind: input, shape index: {}]   ;;  %s8530_s9 = inlined_call_operand.vmem [shape: bf16[16,1], index: 9, kind: input, shape index: {}]   ;;  %s8531_s10 = inlined_call_operand.hbm [shape: f32[1,2944], index: 10, kind: input, shape index: {}]   ;;  %s8532_s11 = inlined_call_operand.hbm [shape: f32[8,16], index: 11, kind: input, shape index: {}]   ;;  %s8533_s12 = inlined_call_operand.vmem [shape: f32[8,128], index: 12, kind: output, shape index: {}]  }
   0x1   :  { %8540 = sst [smem:[#allocation23_spill]] %s8528_s7 }
   0x2   :  { %8541 = sst [smem:[#allocation24_spill]] %s8529_s8 }
   0x3   :  { %8542 = sst [smem:[#allocation25_spill]] %s8530_s9 }
   0x4   :  { %8543 = sst [smem:[#allocation26_spill]] %s8533_s12 }
   0x5   :  { %17 = vsyncpa [#allocation5], 0 }
   0x6   :  { %18 = vsyncpa [#allocation7], 0 }
   0x7   :  { %19 = vsyncpa [#allocation10], 0 }
   0x8   :  { %20 = vsyncpa [#allocation13], 0 }
   0x9   :  { %22 = vsyncpa [#allocation13 + $0x1], 0 }
   0xa   :  { %23 = vsyncpa [#allocation16], 0  ;;  %s7214_s21 = smov 0   ;;  %s7216_s22 = smov 0  }
   0xb   :  { %s7218_s23 = smov 0   ;;  %s7220_s24 = smov 0  }
   0xc LB: > { %s7235_s25 = sadd.s32 4294967295, %s7111_s24   ;;  %p5788_p0 = scmp.ge.s32.totalorder %s7111_s24, 1  ;;  %s7111_s24 = sphi %s7220_s24, %s8570_s24   ;;  %s7107_s23 = sphi %s7218_s23, %s8569_s23   ;;  %s7103_s22 = sphi %s7216_s22, %s8568_s22   ;;  %s7099_s21 = sphi %s7214_s21, %s8567_s21  }
   0xd   : > { %p8538_p1 = scmp.eq.s32.totalorder %s7235_s25, 0  ;;  %p312_p2 = scmp.lt.s32.totalorder %s7111_s24, 5 }
   0xe   : > { %s7113_s27 = smov [#allocation6]   ;;  %s7114_s29 = smov [#allocation9]  }
   0xf   : > { %p7241_p4 = pnand %p5788_p0, %p312_p2  ;;  %s340_s28 = sshll.u32 %s7113_s27, 4  ;;  %s7245_s28 = int_to_ptr.vmem [resolvable:$true] %s340_s28 }
  0x10   : > { %s366_s30 = sshll.u32 %s7114_s29, 4  ;;  %s7115_s14 = smov [#allocation14]   ;;  %s7255_s30 = int_to_ptr.vmem [resolvable:$true] %s366_s30 }
  0x11   : > { %s8544_s26 = scalar_select %p7241_p4, 1, 0 }
  0x12   : > { %p6549_p5 = pneg %p7241_p4  ;;  %s402_s15 = sshll.u32 %s7115_s14, 4  ;;  %s7257_s15 = int_to_ptr.vmem [resolvable:$true] %s402_s15 }
  0x13   : > { %s6831_s18 = scalar_lea.hbm %s8523_s2, 256 }
  0x14   : > { %p7251_p6 = pnand %p6549_p5, %p8538_p1  ;;  %p6832_p7 = scmp.ne.s32.totalorder %s8523_s2, %s6831_s18 }
  0x15   : > { %p6838_p11 = scmp.lt.u32.totalorder %s6831_s18, %s8523_s2 }
  0x16   : > { %p7267_p8 = pneg %p7251_p6 }
  0x18   : > { %p6834_p9 = pnand %p7267_p8, %p6832_p7 }
  0x1a   : > { %p6835_p10 = pneg %p6834_p9 }
  0x1c   : > { %p6840_p12 = pnand %p6838_p11, %p6835_p10 }
  0x1e   : > { %6843 = shalt.err (!%p6840_p12)
}
  0x1f   : > { %s6844_s16 = scalar_lea.vmem %s7245_s28, 256  ;;  %p6852_p5 = scmp.lt.s32.totalorder %s7245_s28, %s7245_s28 }
  0x20   : > { %p6845_p13 = scmp.ne.s32.totalorder %s7245_s28, %s6844_s16  ;;  %p6853_p3 = scmp.lt.s32.totalorder %s6844_s16, %s6844_s16 }
  0x22   : > { %p6847_p0 = pnand %p6845_p13, %p7267_p8  ;;  %p6854_p7 = por %p6853_p3, %p6852_p5 }
  0x24   : > { %p6848_p2 = pneg %p6847_p0 }
  0x26   : > { %p6855_p9 = pnand %p6854_p7, %p6848_p2 }
  0x28   : > { %6858 = shalt.err (!%p6855_p9)
}
  0x29   : > { %s8536_s17 = smov 64   ;;  %s7117_s18 = smov 4  }
  0x2a   : > { %6555 = dma.hbm_to_vmem [thread:$0]  (!%p7251_p6), %s8523_s2, 256, %s7245_s28, [#allocation7], %s8536_s17, %s8536_s17, %s7117_s18  }
  0x2b   : > { %s6859_s16 = scalar_lea.hbm %s8525_s4, 256 }
  0x2c   : > { %p6860_p3 = scmp.ne.s32.totalorder %s8525_s4, %s6859_s16  ;;  %p6866_p12 = scmp.lt.u32.totalorder %s6859_s16, %s8525_s4 }
  0x2e   : > { %p6862_p10 = pnand %p6860_p3, %p7267_p8 }
  0x30   : > { %p6863_p11 = pneg %p6862_p10 }
  0x32   : > { %p6868_p13 = pnand %p6866_p12, %p6863_p11 }
  0x34   : > { %6871 = shalt.err (!%p6868_p13)
}
  0x35   : > { %s6872_s28 = scalar_lea.vmem %s7255_s30, 256  ;;  %p6880_p7 = scmp.lt.s32.totalorder %s7255_s30, %s7255_s30 }
  0x36   : > { %p6873_p0 = scmp.ne.s32.totalorder %s7255_s30, %s6872_s28  ;;  %p6881_p9 = scmp.lt.s32.totalorder %s6872_s28, %s6872_s28 }
  0x38   : > { %p6875_p2 = pnand %p6873_p0, %p7267_p8  ;;  %p6882_p3 = por %p6881_p9, %p6880_p7 }
  0x3a   : > { %p6876_p5 = pneg %p6875_p2 }
  0x3c   : > { %p6883_p10 = pnand %p6882_p3, %p6876_p5 }
  0x3e   : > { %6886 = shalt.err (!%p6883_p10)
}
  0x3f   : > { %6561 = dma.hbm_to_vmem [thread:$0]  (!%p7251_p6), %s8525_s4, 256, %s7255_s30, [#allocation10], %s8536_s17, %s8536_s17, %s7117_s18  }
  0x40   : > { %s6887_s19 = scalar_lea.hbm %s8531_s10, 368 }
  0x41   : > { %p6888_p11 = scmp.ne.s32.totalorder %s8531_s10, %s6887_s19  ;;  %p6894_p0 = scmp.lt.u32.totalorder %s6887_s19, %s8531_s10 }
  0x43   : > { %p6890_p12 = pnand %p6888_p11, %p7267_p8 }
  0x45   : > { %p6891_p13 = pneg %p6890_p12 }
  0x47   : > { %p6896_p2 = pnand %p6894_p0, %p6891_p13 }
  0x49   : > { %6899 = shalt.err (!%p6896_p2)
}
  0x4a   : > { %s6900_s30 = scalar_lea.vmem %s7257_s15, 368  ;;  %s6907_s28 = scalar_lea.vmem %s7257_s15, 384 }
  0x4b   : > { %p6901_p5 = scmp.ne.s32.totalorder %s7257_s15, %s6900_s30  ;;  %p6908_p3 = scmp.lt.s32.totalorder %s7257_s15, %s7257_s15 }
  0x4c   : > { %p6909_p10 = scmp.lt.s32.totalorder %s6907_s28, %s6900_s30 }
  0x4d   : > { %p6903_p7 = pnand %p6901_p5, %p7267_p8 }
  0x4e   : > { %p6910_p11 = por %p6909_p10, %p6908_p3 }
  0x4f   : > { %p6904_p9 = pneg %p6903_p7 }
  0x51   : > { %p6911_p12 = pnand %p6910_p11, %p6904_p9 }
  0x53   : > { %6914 = shalt.err (!%p6911_p12)
}
  0x54   : > { %6567 = dma.hbm_to_vmem [thread:$0]  (!%p7251_p6), %s8531_s10, 368, %s7257_s15, [#allocation13]  }
  0x55   : > { %s7118_s9 = smov [#allocation4]   ;;  %s7119_s19 = smov [#allocation8]  }
  0x56   : > { %s327_s12 = sshll.u32 %s7118_s9, 4  ;;  %s353_s20 = sshll.u32 %s7119_s19, 4  ;;  %s328_s12 = int_to_ptr.vmem [resolvable:$true] %s327_s12  ;;  %s354_s20 = int_to_ptr.vmem [resolvable:$true] %s353_s20 }
  0x57   : > { %s6915_s16 = scalar_lea.hbm %s8522_s1, 256 }
  0x58   : > { %p6916_p13 = scmp.ne.s32.totalorder %s8522_s1, %s6915_s16  ;;  %p6922_p5 = scmp.lt.u32.totalorder %s6915_s16, %s8522_s1 }
  0x5a   : > { %p6918_p0 = pnand %p6916_p13, %p7267_p8 }
  0x5c   : > { %p6919_p2 = pneg %p6918_p0 }
  0x5e   : > { %p6924_p7 = pnand %p6922_p5, %p6919_p2 }
  0x60   : > { %6927 = shalt.err (!%p6924_p7)
}
  0x61   : > { %s6928_s15 = scalar_lea.vmem %s328_s12, 256  ;;  %p6936_p11 = scmp.lt.s32.totalorder %s328_s12, %s328_s12 }
  0x62   : > { %p6929_p9 = scmp.ne.s32.totalorder %s328_s12, %s6928_s15  ;;  %p6937_p12 = scmp.lt.s32.totalorder %s6928_s15, %s6928_s15 }
  0x64   : > { %p6931_p3 = pnand %p6929_p9, %p7267_p8  ;;  %p6938_p1 = por %p6937_p12, %p6936_p11 }
  0x66   : > { %p6932_p10 = pneg %p6931_p3 }
  0x68   : > { %p6939_p4 = pnand %p6938_p1, %p6932_p10 }
  0x6a   : > { %6942 = shalt.err (!%p6939_p4)
}
  0x6b   : > { %s8547_s8 = smov 64   ;;  %s6943_s14 = scalar_lea.hbm %s8524_s3, 256 }
  0x6c   : > { %6552 = dma.hbm_to_vmem [thread:$0]  (!%p7251_p6), %s8522_s1, 256, %s328_s12, [#allocation5], %s8547_s8, %s8547_s8, %s7117_s18  }
  0x6d   : > { %p6944_p1 = scmp.ne.s32.totalorder %s8524_s3, %s6943_s14  ;;  %p6950_p0 = scmp.lt.u32.totalorder %s6943_s14, %s8524_s3 }
  0x6f   : > { %p6946_p4 = pnand %p6944_p1, %p7267_p8 }
  0x71   : > { %p6947_p13 = pneg %p6946_p4 }
  0x73   : > { %p6952_p2 = pnand %p6950_p0, %p6947_p13 }
  0x75   : > { %6955 = shalt.err (!%p6952_p2)
}
  0x76   : > { %s6956_s15 = scalar_lea.vmem %s354_s20, 256  ;;  %p6964_p3 = scmp.lt.s32.totalorder %s354_s20, %s354_s20 }
  0x77   : > { %p6957_p5 = scmp.ne.s32.totalorder %s354_s20, %s6956_s15  ;;  %p6965_p10 = scmp.lt.s32.totalorder %s6956_s15, %s6956_s15 }
  0x79   : > { %p6959_p7 = pnand %p6957_p5, %p7267_p8  ;;  %p6966_p11 = por %p6965_p10, %p6964_p3 }
  0x7b   : > { %p6960_p9 = pneg %p6959_p7 }
  0x7d   : > { %p6967_p12 = pnand %p6966_p11, %p6960_p9 }
  0x7f   : > { %6970 = shalt.err (!%p6967_p12)
}
  0x80   : > { %6558 = dma.hbm_to_vmem [thread:$0]  (!%p7251_p6), %s8524_s3, 256, %s354_s20, [#allocation7], %s8547_s8, %s8547_s8, %s7117_s18  }
  0x81   : > { %s7120_s9 = smov [#allocation11]   ;;  %s6971_s16 = scalar_lea.hbm %s8526_s5, 2048 }
  0x82   : > { %s379_s19 = sshll.u32 %s7120_s9, 4  ;;  %p6972_p1 = scmp.ne.s32.totalorder %s8526_s5, %s6971_s16  ;;  %s380_s19 = int_to_ptr.vmem [resolvable:$true] %s379_s19 }
  0x83   : > { %p6978_p0 = scmp.lt.u32.totalorder %s6971_s16, %s8526_s5 }
  0x84   : > { %p6974_p4 = pnand %p6972_p1, %p7267_p8 }
  0x86   : > { %p6975_p13 = pneg %p6974_p4 }
  0x88   : > { %p6980_p2 = pnand %p6978_p0, %p6975_p13 }
  0x8a   : > { %6983 = shalt.err (!%p6980_p2)
}
  0x8b   : > { %s6984_s18 = scalar_lea.vmem %s380_s19, 2048  ;;  %p6992_p3 = scmp.lt.s32.totalorder %s380_s19, %s380_s19 }
  0x8c   : > { %p6985_p5 = scmp.ne.s32.totalorder %s380_s19, %s6984_s18  ;;  %p6993_p10 = scmp.lt.s32.totalorder %s6984_s18, %s6984_s18 }
  0x8e   : > { %p6987_p7 = pnand %p6985_p5, %p7267_p8  ;;  %p6994_p11 = por %p6993_p10, %p6992_p3 }
  0x90   : > { %p6988_p9 = pneg %p6987_p7 }
  0x92   : > { %p6995_p12 = pnand %p6994_p11, %p6988_p9 }
  0x94   : > { %6998 = shalt.err (!%p6995_p12)
}
  0x95   : > { %s7121_s20 = smov 512   ;;  %s7122_s8 = smov 32  }
  0x96   : > { %6564 = dma.hbm_to_vmem [thread:$0]  (!%p7251_p6), %s8526_s5, 2048, %s380_s19, [#allocation10], %s7121_s20, %s7121_s20, %s7122_s8  }
  0x97   : > { %s7123_s9 = smov [#allocation15]   ;;  %s6999_s30 = scalar_lea.hbm %s8532_s11, 128 }
  0x98   : > { %s413_s29 = sshll.u32 %s7123_s9, 4  ;;  %p7000_p1 = scmp.ne.s32.totalorder %s8532_s11, %s6999_s30  ;;  %s414_s29 = int_to_ptr.vmem [resolvable:$true] %s413_s29 }
  0x99   : > { %p7006_p0 = scmp.lt.u32.totalorder %s6999_s30, %s8532_s11 }
  0x9a   : > { %p7002_p4 = pnand %p7000_p1, %p7267_p8 }
  0x9c   : > { %p7003_p13 = pneg %p7002_p4 }
  0x9e   : > { %p7008_p2 = pnand %p7006_p0, %p7003_p13 }
  0xa0   : > { %7011 = shalt.err (!%p7008_p2)
}
  0xa1   : > { %s7012_s19 = scalar_lea.vmem %s414_s29, 128  ;;  %p7020_p3 = scmp.lt.s32.totalorder %s414_s29, %s414_s29 }
  0xa2   : > { %p7013_p5 = scmp.ne.s32.totalorder %s414_s29, %s7012_s19  ;;  %p7021_p10 = scmp.lt.s32.totalorder %s7012_s19, %s7012_s19 }
  0xa4   : > { %p7015_p7 = pnand %p7013_p5, %p7267_p8  ;;  %p7022_p11 = por %p7021_p10, %p7020_p3 }
  0xa6   : > { %p7016_p9 = pneg %p7015_p7 }
  0xa8   : > { %p7023_p12 = pnand %p7022_p11, %p7016_p9 }
  0xaa   : > { %7026 = shalt.err (!%p7023_p12)
}
  0xab   : > { %6570 = dma.hbm_to_vmem [thread:$0]  (!%p7251_p6), %s8532_s11, 128, %s414_s29, [#allocation16]  }
  0xac   : > { %s7423_s27 = sadd.s32 1, %s7111_s24   ;;  %s162_s9 = sadd.s32 1, %s7107_s23 }
  0xad   : > { %s159_s13 = ssub.s32 %s7111_s24, %s7423_s27  ;;  %p169_p1 = scmp.ne.s32.totalorder %s7107_s23, %s7103_s22 }
  0xae   : > { %p160_p8 = scmp.eq.s32.totalorder %s159_s13, 0  ;;  %p170_p4 = scmp.eq.s32.totalorder %s7111_s24, 0 }
  0xaf   : > { %p175_p13 = scmp.ne.s32.totalorder %s7103_s22, %s7099_s21  ;;  %p8548_p2 = scmp.eq.s32.totalorder %s7235_s25, 0 }
  0xb0   : > { %s7434_s14 = scalar_select %p160_p8, %s7107_s23, %s162_s9  }
  0xb1   : > { %p171_p0 = por %p170_p4, %p169_p1  ;;  %p7438_p5 = por %p8548_p2, %p175_p13 }
  0xb2   : > { %p6582_p7 = scmp.lt.s32.totalorder %s7111_s24, 4  ;;  %s424_s30 = sand.u32 1, %s7111_s24  }
  0xb3   : > { %s426_s29 = sand.u32 1, %s7107_s23   ;;  %s6162_s7 = sshll.u32 %s7111_s24, 14 }
  0xb4   : > { %s5797_s28 = sshll.u32 %s426_s29, 10  ;;  %s7449_s19 = scalar_lea.hbm %s8527_s6, %s6162_s7 }
  0xb5   : > { %s428_s21 = scalar_lea.vmem [#allocation12], %s5797_s28  ;;  %p7451_p6 = pnand %p6582_p7, %p171_p0 }
  0xb6   : > { %s436_s12 = sshll.u32 %s428_s21, 4  ;;  %s7457_s24 = scalar_lea.sflag [#allocation13], %s424_s30  ;;  %s7455_s12 = int_to_ptr.vmem [resolvable:$true] %s436_s12 }
  0xb7   : > { %s7027_s13 = scalar_lea.hbm %s7449_s19, 16384  ;;  %p7029_p3 = pneg %p7451_p6 }
  0xb8   : > { %p7028_p9 = scmp.ne.s32.totalorder %s7449_s19, %s7027_s13  ;;  %s7032_s28 = scalar_lea.hbm %s8527_s6, 65536 }
  0xb9   : > { %p7033_p12 = scmp.lt.u32.totalorder %s7449_s19, %s8527_s6  ;;  %p7034_p8 = scmp.lt.u32.totalorder %s7032_s28, %s7027_s13 }
  0xba   : > { %p7030_p10 = pnand %p7029_p3, %p7028_p9  ;;  %p7036_p4 = scmp.lt.u32.totalorder %s7027_s13, %s7449_s19 }
  0xbb   : > { %p7035_p1 = por %p7034_p8, %p7033_p12 }
  0xbc   : > { %p7031_p11 = pneg %p7030_p10 }
  0xbd   : > { %p7037_p13 = por %p7036_p4, %p7035_p1 }
  0xbf   : > { %p7038_p0 = pnand %p7037_p13, %p7031_p11 }
  0xc1   : > { %7041 = shalt.err (!%p7038_p0)
}
  0xc2   : > { %s7042_s30 = scalar_lea.vmem %s7455_s12, 16384  ;;  %s7124_s18 = smov [#allocation12]  }
  0xc3   : > { %p7043_p2 = scmp.ne.s32.totalorder %s7455_s12, %s7042_s30  ;;  %s7047_s21 = sshll.u32 %s7124_s18, 4  ;;  %s7048_s21 = int_to_ptr.vmem [resolvable:$false] %s7047_s21 }
  0xc4   : > { %s7049_s9 = scalar_lea.vmem %s7048_s21, 32768  ;;  %p7050_p10 = scmp.lt.s32.totalorder %s7455_s12, %s7048_s21 }
  0xc5   : > { %p7045_p7 = pnand %p7043_p2, %p7029_p3  ;;  %p7051_p12 = scmp.lt.s32.totalorder %s7049_s9, %s7042_s30 }
  0xc7   : > { %p7046_p9 = pneg %p7045_p7  ;;  %p7052_p8 = por %p7051_p12, %p7050_p10 }
  0xc9   : > { %p7053_p1 = pnand %p7052_p8, %p7046_p9 }
  0xcb   : > { %7056 = shalt.err (!%p7053_p1)
}
  0xcc   : > { %6574 = dma.hbm_to_vmem [thread:$0]  (!%p7451_p6), %s7449_s19, 16384, %s7455_s12, %s7457_s24, %s7121_s20, %s7121_s20, %s7122_s8  }
  0xcd   : > { %p8551_p3 = scmp.ne.s32.totalorder %s8544_s26, 0 }
  0xce   : > { %p8552_p11 = scmp.eq.s32.totalorder (!%p8551_p3), %s7235_s25, 0 }
  0xcf   : > { %448 = sbr.rel (%p8551_p3) target bundleno = 3047 (0xbe7), region = 68 }
  0xd6   : > { %7074 = dma.done.wait (%p8552_p11), [#allocation5], 256   ;;  %p8553_p4 = pmov %p8552_p11 }
  0xd8   : > { %7076 = vsyncadd (%p8553_p4), [#allocation5], 4294967040  ;;  %p8554_p13 = pmov %p8553_p4 }
  0xd9   : > { %p8555_p0 = pmov %p8553_p4 }
  0xda   : > { %7078 = dma.done.wait (%p8554_p13), [#allocation7], 512  }
  0xdb   : > { %7080 = vsyncadd (%p8555_p0), [#allocation7], 4294966784  ;;  %p8556_p2 = pmov %p8555_p0 }
  0xdc   : > { %p8557_p6 = pmov %p8555_p0 }
  0xdd   : > { %7082 = dma.done.wait (%p8556_p2), [#allocation10], 2304  }
  0xde   : > { %7084 = vsyncadd (%p8557_p6), [#allocation10], 4294964992  ;;  %s470_s26 = sand.u32 1, %s7235_s25   ;;  %s472_s20 = sand.u32 1, %s7103_s22  }
  0xdf   : > { %s5807_s8 = sshll.u32 %s472_s20, 10  ;;  %s471_s19 = scalar_lea.sflag [#allocation13], %s470_s26 }
  0xe0   : > { %s7504_s12 = scalar_lea.vmem [#allocation12], %s5807_s8 }
  0xe1   : > { %7086 = dma.done.wait (%p7438_p5), %s471_s19, 16384  }
  0xe2   : > { %7088 = vsyncadd (%p7438_p5), %s471_s19, 4294950912  ;;  %p8558_p7 = pmov %p8555_p0 }
  0xe3   : > { %p8559_p9 = pmov %p8555_p0 }
  0xe4   : > { %7090 = dma.done.wait (%p8558_p7), [#allocation13], 368  }
  0xe5   : > { %7092 = vsyncadd (%p8559_p9), [#allocation13], 4294966928  ;;  %p8560_p10 = pmov %p8555_p0 }
  0xe6   : > { %p8561_p12 = pmov %p8555_p0 }
  0xe7   : > { %7094 = dma.done.wait (%p8560_p10), [#allocation16], 128  }
  0xe8   : > { %7096 = vsyncadd (%p8561_p12), [#allocation16], 4294967168  ;;  %p8562_p8 = scmp.ne.s32.totalorder %s7235_s25, 0 }
  0xe9   : > { %v6657_v0 = vld [vmem:[#allocation6] sm:$0xff] (!%p8562_p8)   ;;  %v7125_v1 = vmov (!%p8562_p8), 0.0   ;;  %v6658_v2 = vld [vmem:[#allocation4] sm:$0xff] (!%p8562_p8)   ;;  %v6659_v3 = vld [vmem:[#allocation6 + $0x8] sm:$0xff] (!%p8562_p8)   ;;  %vm7126_vm0 = vmmov (!%p8562_p8), 0   ;;  %vm549_vm1 = vcmask (!%p8562_p8), 261120   ;;  %v746_v29 = vlaneseq (!%p8562_p8) }
  0xea   : > { %523 = sbr.rel (%p8562_p8) target bundleno = 2006 (0x7d6), region = 104  ;;  %6393 = vmatprep.subr.bf16.mxu1 (!%p8562_p8), %v7125_v1  ;;  %3169 = vst [vmem:[#allocation3] sm:$0xff] (!%p8562_p8), %v7125_v1  ;;  %3170 = vst [vmem:[#allocation3 + $0x8] sm:$0xff] (!%p8562_p8), %v7125_v1  ;;  %6385 = vmatprep.subr.bf16.mxu0 (!%p8562_p8), %v7125_v1  ;;  %v524_v4 = vld [vmem:[%s8521_s0] sm:$0xff] (!%p8562_p8)  ;;  %v6660_v5 = vld [vmem:[#allocation4 + $0x8] sm:$0xff] (!%p8562_p8)   ;;  %s7127_s24 = smov (!%p8562_p8), 116  }
  0xeb   : > { %3171 = vst [vmem:[#allocation3 + $0x10] sm:$0xff] (!%p8562_p8), %v7125_v1  ;;  %3172 = vst [vmem:[#allocation3 + $0x18] sm:$0xff] (!%p8562_p8), %v7125_v1  ;;  %6394 = vmatpush3.bf16.msra.mxu1 (!%p8562_p8), %v6657_v0  ;;  %6397 = vmatprep.mubr.msk.bf16.mxu1 (!%p8562_p8), %vm7126_vm0, %v7125_v1  ;;  %v525_v6 = vpack.c.bf16 (!%p8562_p8), %v524_v4, %v524_v4  ;;  %v6661_v7 = vld [vmem:[#allocation8] sm:$0xff] (!%p8562_p8)   ;;  %v6662_v8 = vld [vmem:[#allocation8 + $0x8] sm:$0xff] (!%p8562_p8)   ;;  %s7128_s13 = smov (!%p8562_p8), 124   ;;  %s7129_s29 = smov (!%p8562_p8), 120  }
  0xec   : > { %3173 = vst [vmem:[#allocation3 + $0x20] sm:$0xff] (!%p8562_p8), %v7125_v1  ;;  %3174 = vst [vmem:[#allocation3 + $0x28] sm:$0xff] (!%p8562_p8), %v7125_v1  ;;  %6395 = vmatprep.subr.bf16.mxu1 (!%p8562_p8), %v7125_v1  ;;  %6386 = vmatpush3.bf16.msra.mxu0 (!%p8562_p8), %v6658_v2  ;;  %v5815_v9 = vld [vmem:[#allocation14 + $0x1] ss:$0 sm:$0xff] (!%p8562_p8)  ;;  %v5811_v11 = vld [vmem:[#allocation14] ss:$0 sm:$0xff] (!%p8562_p8) }
  0xed   : > { %3175 = vst [vmem:[#allocation3 + $0x30] sm:$0xff] (!%p8562_p8), %v7125_v1  ;;  %3176 = vst [vmem:[#allocation3 + $0x38] sm:$0xff] (!%p8562_p8), %v7125_v1  ;;  %6387 = vmatprep.subr.bf16.mxu0 (!%p8562_p8), %v7125_v1  ;;  %6389 = vmatprep.mubr.msk.bf16.mxu0 (!%p8562_p8), %vm7126_vm0, %v7125_v1  ;;  %s7130_s28 = smov (!%p8562_p8), 112   ;;  %s7131_s7 = smov (!%p8562_p8), 108   ;;  %v5819_v21 = vld [vmem:[#allocation14 + $0x2] ss:$0 sm:$0xff] (!%p8562_p8) }
  0xee   : > { %s7132_s15 = smov (!%p8562_p8), 104   ;;  %s7133_s30 = smov (!%p8562_p8), 100   ;;  %v7134_v27 = vmov (!%p8562_p8), 1983009808   ;;  %v7135_v30 = vmov (!%p8562_p8), 1934713408  }
  0xef   : > { %6396 = vmatpush3.bf16.msra.mxu1 (!%p8562_p8), %v6659_v3  ;;  %v744_v28 = vunpack.c.l.s4 (!%p8562_p8), %v7134_v27  ;;  %v808_v31 = vunpack.c.l.s4 (!%p8562_p8), %v7135_v30  ;;  %v7577_v33 = vshrl.u32 (!%p8562_p8), %v746_v29, 7  ;;  %vm1625_vm2 = vcmask (!%p8562_p8), 31744   ;;  %s7136_s18 = smov (!%p8562_p8), 8   ;;  %s7137_s21 = smov (!%p8562_p8), 4  }
  0xf0   : > { %6388 = vmatpush3.bf16.msra.mxu0 (!%p8562_p8), %v6660_v5  ;;  %6409 = vmatprep.subr.bf16.mxu1 (!%p8562_p8), %v7125_v1  ;;  %vm2102_vm3 = vcmask (!%p8562_p8), 1043456   ;;  %vm2002_vm4 = vcmask (!%p8562_p8), 64512   ;;  %s7138_s9 = smov (!%p8562_p8), 12   ;;  %s7139_s26 = smov (!%p8562_p8), 20   ;;  %vm2770_vm5 = vcmask (!%p8562_p8), 97280   ;;  %vm2772_vm6 = vcmask (!%p8562_p8), 130048  }
  0xf1   : > { %6401 = vmatprep.subr.bf16.mxu0 %v7125_v1  ;;  %v745_v32 = vunpack.c.0.s8 %v744_v28  ;;  %v809_v36 = vunpack.c.0.s8 %v808_v31  ;;  %s7140_s20 = smov 16   ;;  %s7141_s8 = smov 28   ;;  %vm2774_vm7 = vcmask 162816   ;;  %vm2776_vm8 = vcmask 195584  }
  0xf2   : > { %6398 = vmatmul.mubr.msk.bf16.vlgmr.msra.gmra.mrb[0].mxu1 %vm549_vm1, %v525_v6  ;;  %s7142_s19 = smov 24   ;;  %vm2778_vm9 = vcmask 228352  }
  0xf3   : > { %6390 = vmatmul.mubr.msk.bf16.vlgmr.msra.gmra.mrb[0].mxu0 %vm549_vm1, %v525_v6  ;;  %6411 = vmatprep.mubr.msk.bf16.mxu1 %vm7126_vm0, %v7125_v1  ;;  %v7580_v37 = vsub.s32 %v745_v32, %v7577_v33  ;;  %v7583_v44 = vsub.s32 %v809_v36, %v7577_v33 }
  0xf4   : > { %6402 = vmatpush3.bf16.msra.mxu0 %v6661_v7  ;;  %6405 = vmatprep.mubr.msk.bf16.mxu0 %vm7126_vm0, %v7125_v1 }
  0xf5   : > { %6403 = vmatprep.subr.bf16.mxu0 %v7125_v1 }
  0xf8   : > { %6404 = vmatpush3.bf16.msra.mxu0 %v6662_v8 }
  0xf9   : > { %6415 = vmatprep.subr.bf16.mxu0 %v7125_v1 }
  0xfb   : > { %6406 = vmatmul.mubr.msk.bf16.vlgmr.msra.gmra.mrb[4].mxu0 %vm549_vm1, %v525_v6 }
  0xfc   : > { %6417 = vmatprep.mubr.msk.bf16.mxu0 %vm7126_vm0, %v7125_v1 }
 0x1c5   : > { %v650_v10 = vpop.f32.mrb[0].mxu1 }
 0x1c6   : > { %v651_v12 = vadd.f32 %v5815_v9, %v650_v10  ;;  %v6399_v13 = vpop.f32.mrb[1].mxu1  ;;  %v587_v14 = vpop.f32.mrb[0].mxu0 }
 0x1c7   : > { %v653_v15 = vpop.f32.mrb[2].mxu1  ;;  %v6391_v16 = vpop.f32.mrb[1].mxu0  ;;  %v7553_v18 = vadd.f32 %v5811_v11, %v587_v14 }
 0x1c8   : > { %1028 = vrot.lane.b32.xlu1 %v651_v12, %s7127_s24  ;;  %1022 = vrot.lane.b32.xlu0 %v651_v12, %s7128_s13  ;;  %v6400_v17 = vpop.f32.mrb[3].mxu1  ;;  %v590_v19 = vpop.f32.mrb[2].mxu0 }
 0x1c9   : > { %v6392_v20 = vpop.f32.mrb[3].mxu0 }
 0x1cc   : > { %1025 = vrot.lane.b32.xlu0 %v651_v12, %s7129_s29  ;;  %720 = vrot.lane.b32.xlu1 %v7553_v18, %s7128_s13 }
 0x1ce   : > { %v713_v22 = vpop.f32.mrb[4].mxu0 }
 0x1cf   : > { %v7571_v23 = vadd.f32 %v5819_v21, %v713_v22  ;;  %v6407_v24 = vpop.f32.mrb[5].mxu0 }
 0x1d0   : > { %723 = vrot.lane.b32.xlu0 %v7553_v18, %s7129_s29  ;;  %726 = vrot.lane.b32.xlu1 %v7553_v18, %s7127_s24  ;;  %v716_v25 = vpop.f32.mrb[6].mxu0 }
 0x1d1   : > { %v6408_v26 = vpop.f32.mrb[7].mxu0 }
 0x1d4   : > { %1031 = vrot.lane.b32.xlu0 %v651_v12, %s7130_s28  ;;  %1034 = vrot.lane.b32.xlu1 %v651_v12, %s7131_s7 }
 0x1d8   : > { %1037 = vrot.lane.b32.xlu0 %v651_v12, %s7132_s15  ;;  %1040 = vrot.lane.b32.xlu1 %v651_v12, %s7133_s30 }
 0x1dc   : > { %729 = vrot.lane.b32.xlu0 %v7553_v18, %s7130_s28  ;;  %732 = vrot.lane.b32.xlu1 %v7553_v18, %s7131_s7 }
 0x1e0   : > { %735 = vrot.lane.b32.xlu0 %v7553_v18, %s7132_s15  ;;  %738 = vrot.lane.b32.xlu1 %v7553_v18, %s7133_s30 }
 0x1e4   : > { %1324 = vrot.lane.b32.xlu1 %v7571_v23, %s7128_s13  ;;  %1327 = vrot.lane.b32.xlu0 %v7571_v23, %s7129_s29 }
 0x1e8   : > { %1330 = vrot.lane.b32.xlu1 %v7571_v23, %s7127_s24 }
 0x23a   : > { %v1029_v34 = vpop.permute.xlu1 %1028  ;;  %v1023_v35 = vpop.permute.xlu0 %1022 }
 0x23b   : > { %v1059_v38 = vcombine.low %v1023_v35, %v1029_v34  ;;  %v1060_v39 = vcombine.high %v1023_v35, %v1029_v34 }
 0x23d   : > { %v1067_v45 = vrot.slane %v1059_v38, %v7580_v37  ;;  %v1074_v46 = vrot.slane %v1060_v39, %v7580_v37 }
 0x23e   : > { %v1026_v40 = vpop.permute.xlu0 %1025  ;;  %v721_v41 = vpop.permute.xlu1 %720 }
 0x23f   : > { %v1043_v42 = vcombine.low %v651_v12, %v1026_v40  ;;  %v1044_v43 = vcombine.high %v651_v12, %v1026_v40 }
 0x241   : > { %v1051_v47 = vrot.slane %v1043_v42, %v7580_v37  ;;  %v1058_v48 = vrot.slane %v1044_v43, %v7580_v37 }
 0x242   : > { %v724_v49 = vpop.permute.xlu0 %723  ;;  %v727_v50 = vpop.permute.xlu1 %726 }
 0x243   : > { %v1107_v51 = vcombine.low %v1051_v47, %v1067_v45  ;;  %v1108_v52 = vcombine.high %v1051_v47, %v1067_v45  ;;  %v1123_v53 = vcombine.low %v1058_v48, %v1074_v46  ;;  %v1124_v54 = vcombine.high %v1058_v48, %v1074_v46 }
 0x244   : > { %v741_v55 = vcombine.low %v7553_v18, %v724_v49  ;;  %v742_v56 = vcombine.high %v7553_v18, %v724_v49  ;;  %v757_v57 = vcombine.low %v721_v41, %v727_v50  ;;  %v758_v58 = vcombine.high %v721_v41, %v727_v50 }
 0x245   : > { %v1115_v59 = vrot.slane %v1107_v51, %v7583_v44  ;;  %v1122_v60 = vrot.slane %v1108_v52, %v7583_v44  ;;  %v1131_v61 = vrot.slane %v1123_v53, %v7583_v44  ;;  %v1138_v62 = vrot.slane %v1124_v54, %v7583_v44 }
 0x246   : > { %v749_v63 = vrot.slane %v741_v55, %v7580_v37  ;;  %v756_v0 = vrot.slane %v742_v56, %v7580_v37  ;;  %v765_v2 = vrot.slane %v757_v57, %v7580_v37  ;;  %v772_v3 = vrot.slane %v758_v58, %v7580_v37  ;;  %v1032_v4 = vpop.permute.xlu0 %1031  ;;  %v1035_v5 = vpop.permute.xlu1 %1034 }
 0x247   : > { %v5831_v6 = vcombine.low %v1115_v59, %v1122_v60  ;;  %v5833_v7 = vcombine.high %v1115_v59, %v1122_v60  ;;  %v5835_v8 = vcombine.low %v1131_v61, %v1138_v62  ;;  %v5837_v9 = vcombine.high %v1131_v61, %v1138_v62 }
 0x248   : > { %v805_v10 = vcombine.low %v749_v63, %v765_v2  ;;  %v806_v11 = vcombine.high %v749_v63, %v765_v2  ;;  %v821_v12 = vcombine.low %v756_v0, %v772_v3  ;;  %v822_v13 = vcombine.high %v756_v0, %v772_v3 }
 0x249   : > { %v7600_v14 = vrot.slane %v5831_v6, %v7580_v37  ;;  %v7603_v15 = vrot.slane %v5833_v7, %v7580_v37  ;;  %v7606_v16 = vrot.slane %v5835_v8, %v7580_v37  ;;  %v7609_v17 = vrot.slane %v5837_v9, %v7580_v37 }
 0x24a   : > { %v813_v18 = vrot.slane %v805_v10, %v7583_v44  ;;  %v820_v19 = vrot.slane %v806_v11, %v7583_v44  ;;  %v829_v20 = vrot.slane %v821_v12, %v7583_v44  ;;  %v836_v21 = vrot.slane %v822_v13, %v7583_v44  ;;  %v1038_v22 = vpop.permute.xlu0 %1037  ;;  %v1041_v24 = vpop.permute.xlu1 %1040 }
 0x24b   : > { %v1075_v25 = vcombine.low %v1032_v4, %v1038_v22  ;;  %v1076_v26 = vcombine.high %v1032_v4, %v1038_v22  ;;  %v1091_v27 = vcombine.low %v1035_v5, %v1041_v24  ;;  %v1092_v28 = vcombine.high %v1035_v5, %v1041_v24 }
 0x24c   : > { %v5823_v29 = vcombine.low %v813_v18, %v820_v19  ;;  %v5825_v30 = vcombine.high %v813_v18, %v820_v19  ;;  %v5827_v31 = vcombine.low %v829_v20, %v836_v21  ;;  %v5829_v32 = vcombine.high %v829_v20, %v836_v21 }
 0x24d   : > { %v1083_v34 = vrot.slane %v1075_v25, %v7580_v37  ;;  %v1090_v35 = vrot.slane %v1076_v26, %v7580_v37  ;;  %v1099_v36 = vrot.slane %v1091_v27, %v7580_v37  ;;  %v1106_v38 = vrot.slane %v1092_v28, %v7580_v37 }
 0x24e   : > { %v7620_v39 = vrot.slane %v5823_v29, %v7580_v37  ;;  %v7623_v40 = vrot.slane %v5825_v30, %v7580_v37  ;;  %v7626_v41 = vrot.slane %v5827_v31, %v7580_v37  ;;  %v7629_v42 = vrot.slane %v5829_v32, %v7580_v37  ;;  %v730_v43 = vpop.permute.xlu0 %729  ;;  %v733_v45 = vpop.permute.xlu1 %732 }
 0x24f   : > { %v1139_v46 = vcombine.low %v1083_v34, %v1099_v36  ;;  %v1140_v47 = vcombine.high %v1083_v34, %v1099_v36  ;;  %v1155_v48 = vcombine.low %v1090_v35, %v1106_v38  ;;  %v1156_v49 = vcombine.high %v1090_v35, %v1106_v38 }
 0x250   : > { %v941_v50 = vcombine.low %v7620_v39, %v7623_v40  ;;  %v973_v51 = vcombine.low %v7626_v41, %v7629_v42  ;;  %v1243_v58 = vcombine.low %v7600_v14, %v7603_v15  ;;  %v1275_v59 = vcombine.low %v7606_v16, %v7609_v17 }
 0x251   : > { %v1147_v52 = vrot.slane %v1139_v46, %v7583_v44  ;;  %v1154_v53 = vrot.slane %v1140_v47, %v7583_v44  ;;  %v1163_v56 = vrot.slane %v1155_v48, %v7583_v44  ;;  %v1170_v57 = vrot.slane %v1156_v49, %v7583_v44 }
 0x252   : > { %v736_v54 = vpop.permute.xlu0 %735  ;;  %v739_v55 = vpop.permute.xlu1 %738  ;;  %v942_v0 = vcombine.high %v7620_v39, %v7623_v40  ;;  %v949_v3 = vrot.slane %v941_v50, %v7583_v44  ;;  %v981_v4 = vrot.slane %v973_v51, %v7583_v44  ;;  %v1251_v11 = vrot.slane %v1243_v58, %v7583_v44 }
 0x253   : > { %v773_v60 = vcombine.low %v730_v43, %v736_v54  ;;  %v774_v61 = vcombine.high %v730_v43, %v736_v54  ;;  %v789_v62 = vcombine.low %v733_v45, %v739_v55  ;;  %v790_v63 = vcombine.high %v733_v45, %v739_v55 }
 0x254   : > { %v5832_v2 = vcombine.low %v1147_v52, %v1154_v53  ;;  %v5834_v9 = vcombine.high %v1147_v52, %v1154_v53  ;;  %v5836_v10 = vcombine.low %v1163_v56, %v1170_v57  ;;  %v1283_v12 = vrot.slane %v1275_v59, %v7583_v44 }
 0x255   : > { %v781_v5 = vrot.slane %v773_v60, %v7580_v37  ;;  %v788_v6 = vrot.slane %v774_v61, %v7580_v37  ;;  %v797_v7 = vrot.slane %v789_v62, %v7580_v37  ;;  %v804_v8 = vrot.slane %v790_v63, %v7580_v37 }
 0x256   : > { %v974_v21 = vcombine.high %v7626_v41, %v7629_v42  ;;  %v5838_v22 = vcombine.high %v1163_v56, %v1170_v57  ;;  %v1307_v24 = vcombine.low %v1251_v11, %v1283_v12  ;;  %v1308_v25 = vcombine.high %v1251_v11, %v1283_v12 }
 0x257   : > { %v837_v13 = vcombine.low %v781_v5, %v797_v7  ;;  %v838_v18 = vcombine.high %v781_v5, %v797_v7  ;;  %v853_v19 = vcombine.low %v788_v6, %v804_v8  ;;  %v854_v20 = vcombine.high %v788_v6, %v804_v8 }
 0x258   : > { %v1315_v30 = vpack.c.bf16 %v1307_v24, %v1307_v24  ;;  %v1316_v31 = vpack.c.bf16 %v1308_v25, %v1308_v25  ;;  %v1244_v32 = vcombine.high %v7600_v14, %v7603_v15  ;;  %v1276_v34 = vcombine.high %v7606_v16, %v7609_v17 }
 0x259   : > { %v845_v26 = vrot.slane %v837_v13, %v7583_v44  ;;  %v852_v27 = vrot.slane %v838_v18, %v7583_v44  ;;  %v861_v28 = vrot.slane %v853_v19, %v7583_v44  ;;  %v868_v29 = vrot.slane %v854_v20, %v7583_v44 }
 0x25a   : > { %v1194_v35 = vrot.slane %v5832_v2, %v7580_v37  ;;  %v1210_v36 = vrot.slane %v5834_v9, %v7580_v37  ;;  %v1226_v38 = vrot.slane %v5836_v10, %v7580_v37  ;;  %v1005_v39 = vcombine.low %v949_v3, %v981_v4 }
 0x25b   : > { %v1630_v40 = vsel %vm1625_vm2, %v1315_v30, 0  ;;  %v1676_v41 = vsel %vm1625_vm2, %v1316_v31, 0  ;;  %v1258_v42 = vrot.slane %v1244_v32, %v7583_v44  ;;  %v1290_v43 = vrot.slane %v1276_v34, %v7583_v44 }
 0x25c   : > { %v1242_v14 = vrot.slane %v5838_v22, %v7580_v37  ;;  %v5824_v15 = vcombine.low %v845_v26, %v852_v27  ;;  %v5826_v45 = vcombine.high %v845_v26, %v852_v27  ;;  %v5828_v16 = vcombine.low %v861_v28, %v868_v29  ;;  %6410 = vmatpush3.bf16.xpose.msra.mxu1 %v1630_v40 }
 0x25d   : > { %v5830_v17 = vcombine.high %v861_v28, %v868_v29  ;;  %6416 = vmatpush3.bf16.xpose.msra.mxu0 %v1676_v41  ;;  %6421 = vmatprep.subr.bf16.mxu1 %v7125_v1  ;;  %v1309_v46 = vcombine.low %v1258_v42, %v1290_v43  ;;  %v1310_v47 = vcombine.high %v1258_v42, %v1290_v43 }
 0x25e   : > { %v1006_v48 = vcombine.high %v949_v3, %v981_v4  ;;  %6427 = vmatprep.subr.bf16.mxu0 %v7125_v1  ;;  %v1013_v49 = vpack.c.bf16 %v1005_v39, %v1005_v39  ;;  %v1259_v51 = vcombine.low %v1194_v35, %v1210_v36  ;;  %v892_v52 = vrot.slane %v5824_v15, %v7580_v37  ;;  %v1328_v39 = vpop.permute.xlu0 %1327 }
 0x25f   : > { %v1317_v50 = vpack.c.bf16 %v1309_v46, %v1309_v46  ;;  %v908_v53 = vrot.slane %v5826_v45, %v7580_v37  ;;  %v1318_v54 = vpack.c.bf16 %v1310_v47, %v1310_v47  ;;  %v1291_v55 = vcombine.low %v1226_v38, %v1242_v14 }
 0x260   : > { %v924_v56 = vrot.slane %v5828_v16, %v7580_v37  ;;  %v940_v57 = vrot.slane %v5830_v17, %v7580_v37  ;;  %v956_v58 = vrot.slane %v942_v0, %v7583_v44  ;;  %v988_v59 = vrot.slane %v974_v21, %v7583_v44 }
 0x261   : > { %v1014_v60 = vpack.c.bf16 %v1006_v48, %v1006_v48  ;;  %v1267_v61 = vrot.slane %v1259_v51, %v7583_v44  ;;  %v1299_v62 = vrot.slane %v1291_v55, %v7583_v44  ;;  %v1722_v63 = vsel %vm1625_vm2, %v1317_v50, 0 }
 0x262   : > { %v1260_v2 = vcombine.high %v1194_v35, %v1210_v36  ;;  %v1292_v3 = vcombine.high %v1226_v38, %v1242_v14  ;;  %v1768_v4 = vsel %vm1625_vm2, %v1318_v54, 0  ;;  %v957_v6 = vcombine.low %v892_v52, %v908_v53  ;;  %v1325_v38 = vpop.permute.xlu1 %1324 }
 0x263   : > { %6412 = vmatmul.mubr.msk.bf16.vlgmr.msra.gmra.mrb[4].mxu1 %vm1625_vm2, %v1013_v49  ;;  %v1311_v5 = vcombine.low %v1267_v61, %v1299_v62  ;;  %v1312_v0 = vcombine.high %v1267_v61, %v1299_v62  ;;  %v989_v7 = vcombine.low %v924_v56, %v940_v57  ;;  %v1007_v8 = vcombine.low %v956_v58, %v988_v59 }
 0x264   : > { %6418 = vmatmul.mubr.msk.bf16.vlgmr.msra.gmra.mrb[8].mxu0 %vm1625_vm2, %v1014_v60  ;;  %6422 = vmatpush3.bf16.xpose.msra.mxu1 %v1722_v63  ;;  %v1008_v9 = vcombine.high %v956_v58, %v988_v59  ;;  %v1274_v11 = vrot.slane %v1260_v2, %v7583_v44  ;;  %v1306_v12 = vrot.slane %v1292_v3, %v7583_v44 }
 0x265   : > { %6428 = vmatpush3.bf16.xpose.msra.mxu0 %v1768_v4  ;;  %6423 = vmatprep.mubr.msk.bf16.mxu1 %vm7126_vm0, %v7125_v1  ;;  %v1319_v10 = vpack.c.bf16 %v1311_v5, %v1311_v5  ;;  %v1320_v13 = vpack.c.bf16 %v1312_v0, %v1312_v0  ;;  %v1015_v18 = vpack.c.bf16 %v1007_v8, %v1007_v8 }
 0x266   : > { %6429 = vmatprep.mubr.msk.bf16.mxu0 %vm7126_vm0, %v7125_v1  ;;  %6433 = vmatprep.subr.bf16.mxu1 %v7125_v1  ;;  %v965_v19 = vrot.slane %v957_v6, %v7583_v44  ;;  %v997_v20 = vrot.slane %v989_v7, %v7583_v44  ;;  %v1016_v21 = vpack.c.bf16 %v1008_v9, %v1008_v9  ;;  %v1331_v17 = vpop.permute.xlu1 %1330 }
 0x267   : > { %6439 = vmatprep.subr.bf16.mxu0 %v7125_v1  ;;  %v1814_v22 = vsel %vm1625_vm2, %v1319_v10, 0  ;;  %v1313_v24 = vcombine.low %v1274_v11, %v1306_v12  ;;  %v1860_v25 = vsel %vm1625_vm2, %v1320_v13, 0  ;;  %v1314_v26 = vcombine.high %v1274_v11, %v1306_v12 }
 0x268   : > { %v958_v27 = vcombine.high %v892_v52, %v908_v53  ;;  %v990_v28 = vcombine.high %v924_v56, %v940_v57  ;;  %v1009_v29 = vcombine.low %v965_v19, %v997_v20  ;;  %v1010_v30 = vcombine.high %v965_v19, %v997_v20 }
 0x269   : > { %v1321_v31 = vpack.c.bf16 %v1313_v24, %v1313_v24  ;;  %v1322_v32 = vpack.c.bf16 %v1314_v26, %v1314_v26  ;;  %v1345_v41 = vcombine.low %v7571_v23, %v1328_v39  ;;  %v1346_v42 = vcombine.high %v7571_v23, %v1328_v39 }
 0x26a   : > { %v1017_v34 = vpack.c.bf16 %v1009_v29, %v1009_v29  ;;  %v972_v35 = vrot.slane %v958_v27, %v7583_v44  ;;  %v1004_v36 = vrot.slane %v990_v28, %v7583_v44  ;;  %v1018_v40 = vpack.c.bf16 %v1010_v30, %v1010_v30 }
 0x26b   : > { %6424 = vmatmul.mubr.msk.bf16.vlgmr.msra.gmra.mrb[8].mxu1 %vm1625_vm2, %v1015_v18  ;;  %v1906_v43 = vsel %vm1625_vm2, %v1321_v31, 0  ;;  %v1952_v14 = vsel %vm1625_vm2, %v1322_v32, 0  ;;  %v1353_v16 = vrot.slane %v1345_v41, %v7580_v37  ;;  %v1360_v46 = vrot.slane %v1346_v42, %v7580_v37 }
 0x26c   : > { %6430 = vmatmul.mubr.msk.bf16.vlgmr.msra.gmra.mrb[12].mxu0 %vm1625_vm2, %v1016_v21  ;;  %6434 = vmatpush3.bf16.xpose.msra.mxu1 %v1814_v22  ;;  %v1011_v15 = vcombine.low %v972_v35, %v1004_v36  ;;  %v1012_v45 = vcombine.high %v972_v35, %v1004_v36  ;;  %v1361_v47 = vcombine.low %v1325_v38, %v1331_v17 }
 0x26d   : > { %6440 = vmatpush3.bf16.xpose.msra.mxu0 %v1860_v25  ;;  %6435 = vmatprep.mubr.msk.bf16.mxu1 %vm7126_vm0, %v7125_v1  ;;  %v1362_v48 = vcombine.high %v1325_v38, %v1331_v17 }
 0x26e   : > { %6441 = vmatprep.mubr.msk.bf16.mxu0 %vm7126_vm0, %v7125_v1  ;;  %6445 = vmatprep.subr.bf16.mxu1 %v7125_v1  ;;  %v1369_v49 = vrot.slane %v1361_v47, %v7580_v37  ;;  %v1019_v51 = vpack.c.bf16 %v1011_v15, %v1011_v15  ;;  %v1020_v52 = vpack.c.bf16 %v1012_v45, %v1012_v45 }
 0x26f   : > { %6451 = vmatprep.subr.bf16.mxu0 %v7125_v1  ;;  %v1376_v50 = vrot.slane %v1362_v48, %v7580_v37 }
 0x270   : > { %v1409_v53 = vcombine.low %v1353_v16, %v1369_v49  ;;  %v1410_v54 = vcombine.high %v1353_v16, %v1369_v49 }
 0x271   : > { %v1425_v55 = vcombine.low %v1360_v46, %v1376_v50  ;;  %v1426_v56 = vcombine.high %v1360_v46, %v1376_v50 }
 0x272   : > { %v1417_v57 = vrot.slane %v1409_v53, %v7583_v44  ;;  %v1424_v58 = vrot.slane %v1410_v54, %v7583_v44 }
 0x273   : > { %6436 = vmatmul.mubr.msk.bf16.vlgmr.msra.gmra.mrb[12].mxu1 %vm1625_vm2, %v1017_v34  ;;  %v1433_v59 = vrot.slane %v1425_v55, %v7583_v44  ;;  %v1440_v60 = vrot.slane %v1426_v56, %v7583_v44 }
 0x274   : > { %6442 = vmatmul.mubr.msk.bf16.vlgmr.msra.gmra.mrb[16].mxu0 %vm1625_vm2, %v1018_v40  ;;  %6446 = vmatpush3.bf16.xpose.msra.mxu1 %v1906_v43  ;;  %v5839_v61 = vcombine.low %v1417_v57, %v1424_v58  ;;  %v5841_v62 = vcombine.high %v1417_v57, %v1424_v58 }
 0x275   : > { %6452 = vmatpush3.bf16.xpose.msra.mxu0 %v1952_v14  ;;  %6447 = vmatprep.mubr.msk.bf16.mxu1 %vm7126_vm0, %v7125_v1  ;;  %v5843_v63 = vcombine.low %v1433_v59, %v1440_v60  ;;  %v5845_v2 = vcombine.high %v1433_v59, %v1440_v60 }
 0x276   : > { %6453 = vmatprep.mubr.msk.bf16.mxu0 %vm7126_vm0, %v7125_v1  ;;  %6457 = vmatprep.subr.bf16.mxu1 %v7125_v1  ;;  %v1489_v3 = vrot.slane %v5839_v61, %v7580_v37  ;;  %v1505_v4 = vrot.slane %v5841_v62, %v7580_v37 }
 0x277   : > { %6463 = vmatprep.subr.bf16.mxu0 %v7125_v1  ;;  %v1521_v5 = vrot.slane %v5843_v63, %v7580_v37  ;;  %v1537_v0 = vrot.slane %v5845_v2, %v7580_v37 }
 0x278   : > { %v1545_v6 = vcombine.low %v1489_v3, %v1505_v4  ;;  %v1546_v20 = vcombine.high %v1489_v3, %v1505_v4 }
 0x279   : > { %v1577_v7 = vcombine.low %v1521_v5, %v1537_v0  ;;  %v1578_v21 = vcombine.high %v1521_v5, %v1537_v0 }
 0x27a   : > { %v1553_v8 = vrot.slane %v1545_v6, %v7583_v44  ;;  %v1560_v22 = vrot.slane %v1546_v20, %v7583_v44 }
 0x27b   : > { %6448 = vmatmul.mubr.msk.bf16.vlgmr.msra.gmra.mrb[16].mxu1 %vm1625_vm2, %v1019_v51  ;;  %v1585_v9 = vrot.slane %v1577_v7, %v7583_v44  ;;  %v1592_v24 = vrot.slane %v1578_v21, %v7583_v44 }
 0x27c   : > { %6454 = vmatmul.mubr.msk.bf16.vlgmr.msra.gmra.mrb[20].mxu0 %vm1625_vm2, %v1020_v52  ;;  %6459 = vmatprep.mubr.msk.bf16.mxu1 %vm7126_vm0, %v7125_v1 }
 0x27d   : > { %6465 = vmatprep.mubr.msk.bf16.mxu0 %vm7126_vm0, %v7125_v1  ;;  %v1609_v10 = vcombine.low %v1553_v8, %v1585_v9  ;;  %v1610_v11 = vcombine.high %v1553_v8, %v1585_v9  ;;  %v7745_v25 = vcombine.low %v1560_v22, %v1592_v24  ;;  %v7747_v26 = vcombine.high %v1560_v22, %v1592_v24 }
 0x27f   : > { %v1617_v12 = vpack.c.bf16 %v1609_v10, %v1609_v10  ;;  %v1618_v13 = vpack.c.bf16 %v1610_v11, %v1610_v11 }
 0x281   : > { %v2104_v18 = vsel %vm2102_vm3, %v1617_v12, 0  ;;  %v2150_v19 = vsel %vm2102_vm3, %v1618_v13, 0 }
 0x282   : > { %6458 = vmatpush3.bf16.msra.mxu1 %v2104_v18  ;;  %6464 = vmatpush3.bf16.msra.mxu0 %v2150_v19 }
 0x283   : > { %6469 = vmatprep.subr.bf16.mxu1 %v7125_v1  ;;  %6475 = vmatprep.subr.bf16.mxu0 %v7125_v1 }
 0x336   : > { %v1666_v27 = vpop.f32.mrb[4].mxu1 }
 0x337   : > { %v1994_v28 = vmul.f32 0.5, %v1666_v27  ;;  %v1712_v29 = vpop.f32.mrb[8].mxu0  ;;  %v6413_v30 = vpop.f32.mrb[5].mxu1 }
 0x338   : > { %v1995_v31 = vmul.f32 0.5, %v1712_v29  ;;  %v6419_v32 = vpop.f32.mrb[9].mxu0  ;;  %v1669_v34 = vpop.f32.mrb[6].mxu1 }
 0x339   : > { %v1715_v35 = vpop.f32.mrb[10].mxu0  ;;  %v6414_v36 = vpop.f32.mrb[7].mxu1  ;;  %v2003_v38 = vsel %vm2002_vm4, %v1994_v28, -inf }
 0x33a   : > { %v6420_v39 = vpop.f32.mrb[11].mxu0  ;;  %2004 = vmax.xlane.f32.xlu0 %v2003_v38  ;;  %v2006_v40 = vsel %vm2002_vm4, %v1995_v31, -inf }
 0x33b   : > { %2007 = vmax.xlane.f32.xlu1 %v2006_v40 }
 0x33e   : > { %v1758_v41 = vpop.f32.mrb[8].mxu1 }
 0x33f   : > { %v1996_v42 = vmul.f32 0.5, %v1758_v41  ;;  %v1804_v43 = vpop.f32.mrb[12].mxu0  ;;  %v6425_v14 = vpop.f32.mrb[9].mxu1 }
 0x340   : > { %v6431_v15 = vpop.f32.mrb[13].mxu0  ;;  %v1761_v45 = vpop.f32.mrb[10].mxu1  ;;  %v1997_v16 = vmul.f32 0.5, %v1804_v43 }
 0x341   : > { %v1807_v17 = vpop.f32.mrb[14].mxu0  ;;  %v6426_v46 = vpop.f32.mrb[11].mxu1  ;;  %v2009_v47 = vsel %vm2002_vm4, %v1996_v42, -inf }
 0x342   : > { %v6432_v48 = vpop.f32.mrb[15].mxu0  ;;  %2010 = vmax.xlane.f32.xlu0 %v2009_v47  ;;  %v2012_v49 = vsel %vm2002_vm4, %v1997_v16, -inf }
 0x346   : > { %v1850_v50 = vpop.f32.mrb[12].mxu1  ;;  %2013 = vmax.xlane.f32.xlu0 %v2012_v49 }
 0x347   : > { %v1998_v51 = vmul.f32 0.5, %v1850_v50  ;;  %v1896_v52 = vpop.f32.mrb[16].mxu0  ;;  %v6437_v53 = vpop.f32.mrb[13].mxu1 }
 0x348   : > { %v1999_v54 = vmul.f32 0.5, %v1896_v52  ;;  %v6443_v55 = vpop.f32.mrb[17].mxu0  ;;  %v1853_v56 = vpop.f32.mrb[14].mxu1 }
 0x349   : > { %v1899_v57 = vpop.f32.mrb[18].mxu0  ;;  %v6438_v58 = vpop.f32.mrb[15].mxu1  ;;  %v2015_v59 = vsel %vm2002_vm4, %v1998_v51, -inf }
 0x34a   : > { %v6444_v60 = vpop.f32.mrb[19].mxu0  ;;  %2016 = vmax.xlane.f32.xlu1 %v2015_v59  ;;  %v2018_v61 = vsel %vm2002_vm4, %v1999_v54, -inf }
 0x34b   : > { %2019 = vmax.xlane.f32.xlu0 %v2018_v61 }
 0x34e   : > { %v1942_v62 = vpop.f32.mrb[16].mxu1 }
 0x34f   : > { %v7755_v63 = vmul.f32 0.5, %v1942_v62  ;;  %v1988_v2 = vpop.f32.mrb[20].mxu0  ;;  %v6449_v3 = vpop.f32.mrb[17].mxu1 }
 0x350   : > { %v2001_v4 = vmul.f32 0.5, %v1988_v2  ;;  %v6455_v5 = vpop.f32.mrb[21].mxu0  ;;  %v1945_v0 = vpop.f32.mrb[18].mxu1  ;;  %v1619_v3 = vpack.c.bf16 %v7745_v25, %v7745_v25 }
 0x351   : > { %v1991_v6 = vpop.f32.mrb[22].mxu0  ;;  %v6450_v7 = vpop.f32.mrb[19].mxu1  ;;  %v2021_v8 = vsel %vm2002_vm4, %v7755_v63, -inf  ;;  %v1620_v5 = vpack.c.bf16 %v7747_v26, %v7747_v26 }
 0x352   : > { %v6456_v9 = vpop.f32.mrb[23].mxu0  ;;  %2022 = vmax.xlane.f32.xlu1 %v2021_v8  ;;  %v2024_v10 = vsel %vm2002_vm4, %v2001_v4, -inf  ;;  %v2196_v7 = vsel %vm2102_vm3, %v1619_v3, 0 }
 0x353   : > { %2025 = vmax.xlane.f32.xlu0 %v2024_v10  ;;  %v2242_v10 = vsel %vm2102_vm3, %v1620_v5, 0 }
 0x363   : > { %1336 = vrot.lane.b32.xlu1 %v7571_v23, %s7131_s7 }
 0x369   : > { %1333 = vrot.lane.b32.xlu0 %v7571_v23, %s7130_s28 }
 0x3c7   : > { %v2005_v11 = vpop.xlane.xlu0 %2004 }
 0x3c8   : > { %v2027_v12 = vsub.f32 %v1994_v28, %v2005_v11  ;;  %v2008_v13 = vpop.xlane.xlu1 %2007  ;;  %v7802_v11 = vld [vmem:[#allocation3] sm:$0xff] }
 0x3c9   : > { %v2028_v18 = vsub.f32 %v1995_v31, %v2008_v13 }
 0x3ca   : > { %v2035_v19 = vmul.f32 1.442695, %v2027_v12 }
 0x3cb   : > { %v2037_v20 = vmul.f32 1.442695, %v2028_v18 }
 0x3cc   : > { %6665 = vpow2.f32 %v2035_v19 }
 0x3cd   : > { %6667 = vpow2.f32 %v2037_v20 }
 0x3cf   : > { %v2011_v21 = vpop.xlane.xlu0 %2010 }
 0x3d0   : > { %v2029_v22 = vsub.f32 %v1996_v42, %v2011_v21 }
 0x3d2   : > { %v2039_v24 = vmul.f32 1.442695, %v2029_v22 }
 0x3d3   : > { %v2014_v27 = vpop.xlane.xlu0 %2013 }
 0x3d4   : > { %6669 = vpow2.f32 %v2039_v24  ;;  %v2030_v29 = vsub.f32 %v1997_v16, %v2014_v27 }
 0x3d6   : > { %v6666_v30 = vpop.eup %6665  ;;  %v2041_v32 = vmul.f32 1.442695, %v2030_v29 }
 0x3d7   : > { %v6668_v34 = vpop.eup %6667  ;;  %v2017_v35 = vpop.xlane.xlu1 %2016  ;;  %v2051_v36 = vsel %vm2002_vm4, %v6666_v30, 0.0 }
 0x3d8   : > { %6671 = vpow2.f32 %v2041_v32  ;;  %v2031_v28 = vsub.f32 %v1998_v51, %v2017_v35  ;;  %v2020_v38 = vpop.xlane.xlu0 %2019  ;;  %2052 = vadd.xlane.f32.xlu1 %v2051_v36  ;;  %v2054_v31 = vsel %vm2002_vm4, %v6668_v34, 0.0 }
 0x3d9   : > { %v2032_v39 = vsub.f32 %v1999_v54, %v2020_v38  ;;  %2055 = vadd.xlane.f32.xlu0 %v2054_v31 }
 0x3da   : > { %v2043_v40 = vmul.f32 1.442695, %v2031_v28 }
 0x3db   : > { %v2045_v41 = vmul.f32 1.442695, %v2032_v39 }
 0x3dc   : > { %6673 = vpow2.f32 %v2043_v40 }
 0x3dd   : > { %6675 = vpow2.f32 %v2045_v41 }
 0x3de   : > { %v6670_v42 = vpop.eup %6669 }
 0x3df   : > { %v2057_v43 = vsel %vm2002_vm4, %v6670_v42, 0.0  ;;  %v2023_v48 = vpop.xlane.xlu1 %2022 }
 0x3e0   : > { %2058 = vadd.xlane.f32.xlu1 %v2057_v43  ;;  %v2026_v47 = vpop.xlane.xlu0 %2025  ;;  %v2033_v50 = vsub.f32 %v7755_v63, %v2023_v48 }
 0x3e1   : > { %v2034_v49 = vsub.f32 %v2001_v4, %v2026_v47 }
 0x3e2   : > { %v7767_v14 = vpop.eup %6671  ;;  %v2047_v52 = vmul.f32 1.442695, %v2033_v50 }
 0x3e3   : > { %v2060_v15 = vsel %vm2002_vm4, %v7767_v14, 0.0  ;;  %v2049_v51 = vmul.f32 1.442695, %v2034_v49 }
 0x3e4   : > { %2061 = vadd.xlane.f32.xlu0 %v2060_v15  ;;  %v1334_v57 = vpop.permute.xlu0 %1333 }
 0x3e5   : > { %6677 = vpow2.f32 %v2049_v51 }
 0x3e6   : > { %v7771_v45 = vpop.eup %6673  ;;  %6679 = vpow2.f32 %v2047_v52 }
 0x3e7   : > { %v7773_v16 = vpop.eup %6675  ;;  %v2063_v17 = vsel %vm2002_vm4, %v7771_v45, 0.0 }
 0x3e8   : > { %v2066_v46 = vsel %vm2002_vm4, %v7773_v16, 0.0  ;;  %2064 = vadd.xlane.f32.xlu0 %v2063_v17 }
 0x3e9   : > { %2067 = vadd.xlane.f32.xlu1 %v2066_v46 }
 0x3ef   : > { %v7784_v53 = vpop.eup %6677 }
 0x3f0   : > { %v7786_v54 = vpop.eup %6679  ;;  %v2072_v55 = vsel %vm2002_vm4, %v7784_v53, 0.0 }
 0x3f1   : > { %v2069_v56 = vsel %vm2002_vm4, %v7786_v54, 0.0 }
 0x3fa   : > { %1339 = vrot.lane.b32.xlu1 %v7571_v23, %s7132_s15 }
 0x3fe   : > { %1342 = vrot.lane.b32.xlu0 %v7571_v23, %s7133_s30  ;;  %v1337_v23 = vpop.permute.xlu1 %1336 }
 0x41d   : > { %2073 = vadd.xlane.f32.xlu0 %v2072_v55 }
 0x41e   : > { %2070 = vadd.xlane.f32.xlu1 %v2069_v56 }
 0x465   : > { %v2053_v58 = vpop.xlane.xlu1 %2052 }
 0x466   : > { %6681 = vrcp.f32 %v2053_v58  ;;  %v2056_v59 = vpop.xlane.xlu0 %2055 }
 0x467   : > { %6683 = vrcp.f32 %v2056_v59 }
 0x46d   : > { %v2059_v60 = vpop.xlane.xlu1 %2058 }
 0x46e   : > { %6685 = vrcp.f32 %v2059_v60 }
 0x470   : > { %v6682_v61 = vpop.eup %6681 }
 0x471   : > { %v6684_v62 = vpop.eup %6683  ;;  %v2083_v63 = vmul.f32 %v6682_v61, %v6666_v30  ;;  %v2062_v2 = vpop.xlane.xlu0 %2061 }
 0x472   : > { %v2084_v4 = vmul.f32 %v6684_v62, %v6668_v34  ;;  %6687 = vrcp.f32 %v2062_v2 }
 0x473   : > { %v2091_v0 = vpack.c.bf16 %v2083_v63, %v2083_v63 }
 0x474   : > { %v2092_v6 = vpack.c.bf16 %v2084_v4, %v2084_v4 }
 0x475   : > { %6460 = vmatmul.mubr.msk.bf16.vlgmr.msra.gmra.mrb[20].mxu1 %vm2002_vm4, %v2091_v0  ;;  %v2065_v8 = vpop.xlane.xlu0 %2064 }
 0x476   : > { %6470 = vmatpush3.bf16.msra.mxu1 %v2196_v7  ;;  %v2068_v9 = vpop.xlane.xlu1 %2067  ;;  %6466 = vmatmul.mubr.msk.bf16.vlgmr.msra.gmra.mrb[24].mxu0 %vm2002_vm4, %v2092_v6  ;;  %6689 = vrcp.f32 %v2065_v8 }
 0x477   : > { %6476 = vmatpush3.bf16.msra.mxu0 %v2242_v10  ;;  %6471 = vmatprep.mubr.msk.bf16.mxu1 %vm7126_vm0, %v7125_v1  ;;  %6691 = vrcp.f32 %v2068_v9 }
 0x478   : > { %v6686_v25 = vpop.eup %6685  ;;  %6477 = vmatprep.mubr.msk.bf16.mxu0 %vm7126_vm0, %v7802_v11  ;;  %6481 = vmatprep.subr.bf16.mxu1 %v7802_v11 }
 0x479   : > { %v2085_v26 = vmul.f32 %v6686_v25, %v6670_v42  ;;  %v1343_v12 = vpop.permute.xlu0 %1342  ;;  %6487 = vmatprep.subr.bf16.mxu0 %v7802_v11 }
 0x47a   : > { %v1340_v13 = vpop.permute.xlu1 %1339  ;;  %v1393_v18 = vcombine.low %v1337_v23, %v1343_v12  ;;  %v1394_v19 = vcombine.high %v1337_v23, %v1343_v12 }
 0x47b   : > { %v1377_v20 = vcombine.low %v1334_v57, %v1340_v13  ;;  %v1378_v21 = vcombine.high %v1334_v57, %v1340_v13  ;;  %v2093_v22 = vpack.c.bf16 %v2085_v26, %v2085_v26 }
 0x47c   : > { %v6688_v24 = vpop.eup %6687  ;;  %v1401_v1 = vrot.slane %v1393_v18, %v7580_v37  ;;  %v1408_v27 = vrot.slane %v1394_v19, %v7580_v37 }
 0x47d   : > { %v2086_v29 = vmul.f32 %v6688_v24, %v7767_v14  ;;  %v1385_v30 = vrot.slane %v1377_v20, %v7580_v37  ;;  %v1392_v32 = vrot.slane %v1378_v21, %v7580_v37  ;;  %6472 = vmatmul.mubr.msk.bf16.vlgmr.msra.gmra.mrb[24].mxu1 %vm2002_vm4, %v2093_v22 }
 0x47e   : > { %6483 = vmatprep.mubr.msk.bf16.mxu1 %vm7126_vm0, %v7802_v11 }
 0x47f   : > { %v1441_v34 = vcombine.low %v1385_v30, %v1401_v1  ;;  %v1442_v35 = vcombine.high %v1385_v30, %v1401_v1  ;;  %v1457_v36 = vcombine.low %v1392_v32, %v1408_v27  ;;  %v1458_v28 = vcombine.high %v1392_v32, %v1408_v27 }
 0x480   : > { %v2094_v38 = vpack.c.bf16 %v2086_v29, %v2086_v29  ;;  %v6690_v23 = vpop.eup %6689 }
 0x481   : > { %v1449_v31 = vrot.slane %v1441_v34, %v7583_v44  ;;  %v1456_v39 = vrot.slane %v1442_v35, %v7583_v44  ;;  %v1465_v40 = vrot.slane %v1457_v36, %v7583_v44  ;;  %v1472_v41 = vrot.slane %v1458_v28, %v7583_v44  ;;  %v6692_v59 = vpop.eup %6691 }
 0x482   : > { %6478 = vmatmul.mubr.msk.bf16.vlgmr.msra.gmra.mrb[28].mxu0 %vm2002_vm4, %v2094_v38  ;;  %v2088_v2 = vmul.f32 %v6692_v59, %v7773_v16  ;;  %v2087_v3 = vmul.f32 %v6690_v23, %v7771_v45 }
 0x483   : > { %v5840_v42 = vcombine.low %v1449_v31, %v1456_v39  ;;  %v5842_v43 = vcombine.high %v1449_v31, %v1456_v39  ;;  %6489 = vmatprep.mubr.msk.bf16.mxu0 %vm7126_vm0, %v7802_v11  ;;  %v5844_v14 = vcombine.low %v1465_v40, %v1472_v41  ;;  %v5846_v15 = vcombine.high %v1465_v40, %v1472_v41 }
 0x484   : > { %v2095_v9 = vpack.c.bf16 %v2087_v3, %v2087_v3  ;;  %v2096_v10 = vpack.c.bf16 %v2088_v2, %v2088_v2 }
 0x485   : > { %v1496_v17 = vrot.slane %v5840_v42, %v7580_v37  ;;  %v1512_v46 = vrot.slane %v5842_v43, %v7580_v37  ;;  %v1528_v47 = vrot.slane %v5844_v14, %v7580_v37  ;;  %v1544_v48 = vrot.slane %v5846_v15, %v7580_v37 }
 0x487   : > { %v1561_v49 = vcombine.low %v1496_v17, %v1512_v46  ;;  %v1562_v50 = vcombine.high %v1496_v17, %v1512_v46  ;;  %v1593_v51 = vcombine.low %v1528_v47, %v1544_v48  ;;  %v1594_v52 = vcombine.high %v1528_v47, %v1544_v48 }
 0x489   : > { %v1569_v55 = vrot.slane %v1561_v49, %v7583_v44  ;;  %v1576_v56 = vrot.slane %v1562_v50, %v7583_v44  ;;  %v1601_v57 = vrot.slane %v1593_v51, %v7583_v44  ;;  %v1608_v58 = vrot.slane %v1594_v52, %v7583_v44 }
 0x48b   : > { %v1613_v60 = vcombine.low %v1569_v55, %v1601_v57  ;;  %v1614_v61 = vcombine.high %v1569_v55, %v1601_v57  ;;  %v1615_v62 = vcombine.low %v1576_v56, %v1608_v58  ;;  %v1616_v63 = vcombine.high %v1576_v56, %v1608_v58 }
 0x48d   : > { %v1621_v4 = vpack.c.bf16 %v1613_v60, %v1613_v60  ;;  %v1622_v5 = vpack.c.bf16 %v1614_v61, %v1614_v61  ;;  %v1623_v7 = vpack.c.bf16 %v1615_v62, %v1615_v62  ;;  %v1624_v8 = vpack.c.bf16 %v1616_v63, %v1616_v63 }
 0x48f   : > { %v2288_v0 = vsel %vm2102_vm3, %v1621_v4, 0  ;;  %v2334_v6 = vsel %vm2102_vm3, %v1622_v5, 0  ;;  %v2380_v45 = vsel %vm2102_vm3, %v1623_v7, 0  ;;  %v2426_v16 = vsel %vm2102_vm3, %v1624_v8, 0 }
 0x490   : > { %6482 = vmatpush3.bf16.msra.mxu1 %v2288_v0  ;;  %6488 = vmatpush3.bf16.msra.mxu0 %v2334_v6 }
 0x491   : > { %6493 = vmatprep.subr.bf16.mxu1 %v7802_v11  ;;  %6499 = vmatprep.subr.bf16.mxu0 %v7802_v11 }
 0x493   : > { %6484 = vmatmul.mubr.msk.bf16.vlgmr.msra.gmra.mrb[28].mxu1 %vm2002_vm4, %v2095_v9  ;;  %6490 = vmatmul.mubr.msk.bf16.vlgmr.msra.gmra.mrb[32].mxu0 %vm2002_vm4, %v2096_v10 }
 0x494   : > { %6494 = vmatpush3.bf16.msra.mxu1 %v2380_v45  ;;  %6500 = vmatpush3.bf16.msra.mxu0 %v2426_v16 }
 0x495   : > { %6495 = vmatprep.mubr.msk.bf16.mxu1 %vm7126_vm0, %v7802_v11  ;;  %6501 = vmatprep.mubr.msk.bf16.mxu0 %vm7126_vm0, %v7802_v11 }
 0x496   : > { %6505 = vmatprep.subr.bf16.mxu1 %v7802_v11 }
 0x4aa   : > { %v2074_v25 = vpop.xlane.xlu0 %2073 }
 0x4ab   : > { %v2071_v26 = vpop.xlane.xlu1 %2070  ;;  %6693 = vrcp.f32 %v2074_v25 }
 0x4ac   : > { %6695 = vrcp.f32 %v2071_v26 }
 0x4b5   : > { %v6694_v12 = vpop.eup %6693 }
 0x4b6   : > { %v6696_v13 = vpop.eup %6695  ;;  %v2090_v18 = vmul.f32 %v6694_v12, %v7784_v53 }
 0x4b7   : > { %v2089_v19 = vmul.f32 %v6696_v13, %v7786_v54 }
 0x4b8   : > { %v2098_v20 = vpack.c.bf16 %v2090_v18, %v2090_v18 }
 0x4b9   : > { %v2097_v21 = vpack.c.bf16 %v2089_v19, %v2089_v19 }
 0x4ba   : > { %6502 = vmatmul.mubr.msk.bf16.vlgmr.msra.gmra.mrb[36].mxu0 %vm2002_vm4, %v2098_v20 }
 0x4bb   : > { %6496 = vmatmul.mubr.msk.bf16.vlgmr.msra.gmra.mrb[32].mxu1 %vm2002_vm4, %v2097_v21 }
 0x4bc   : > { %6509 = vmatprep.mubr.msk.bf16.mxu1 %vm7126_vm0, %v7802_v11 }
 0x548   : > { %v2140_v22 = vpop.f32.mrb[20].mxu1 }
 0x549   : > { %v2186_v24 = vpop.f32.mrb[24].mxu0  ;;  %v6461_v1 = vpop.f32.mrb[21].mxu1 }
 0x54a   : > { %v6467_v27 = vpop.f32.mrb[25].mxu0  ;;  %v2143_v29 = vpop.f32.mrb[22].mxu1 }
 0x54b   : > { %v2189_v30 = vpop.f32.mrb[26].mxu0  ;;  %v6462_v32 = vpop.f32.mrb[23].mxu1 }
 0x54c   : > { %v6468_v34 = vpop.f32.mrb[27].mxu0 }
 0x550   : > { %v2232_v53 = vpop.f32.mrb[24].mxu1 }
 0x551   : > { %v2468_v35 = vcombine.low %v2140_v22, %v2232_v53  ;;  %v2469_v54 = vcombine.high %v2140_v22, %v2232_v53  ;;  %v6473_v36 = vpop.f32.mrb[25].mxu1 }
 0x552   : > { %v2235_v28 = vpop.f32.mrb[26].mxu1 }
 0x553   : > { %v6474_v38 = vpop.f32.mrb[27].mxu1  ;;  %v2476_v43 = vrot.slane %v2468_v35, %v7580_v37  ;;  %v2483_v14 = vrot.slane %v2469_v54, %v7580_v37 }
 0x555   : > { %v2278_v31 = vpop.f32.mrb[28].mxu0 }
 0x556   : > { %v2484_v39 = vcombine.low %v2186_v24, %v2278_v31  ;;  %v2485_v40 = vcombine.high %v2186_v24, %v2278_v31  ;;  %v6479_v41 = vpop.f32.mrb[29].mxu0 }
 0x557   : > { %v2281_v42 = vpop.f32.mrb[30].mxu0 }
 0x558   : > { %v2492_v15 = vrot.slane %v2484_v39, %v7580_v37  ;;  %v2499_v17 = vrot.slane %v2485_v40, %v7580_v37  ;;  %v6480_v46 = vpop.f32.mrb[31].mxu0 }
 0x55a   : > { %v2532_v47 = vcombine.low %v2476_v43, %v2492_v15  ;;  %v2533_v48 = vcombine.high %v2476_v43, %v2492_v15  ;;  %v2548_v49 = vcombine.low %v2483_v14, %v2499_v17  ;;  %v2549_v50 = vcombine.high %v2483_v14, %v2499_v17  ;;  %v6663_v14 = vld [vmem:[#allocation9] sm:$0xff]  }
 0x55b   : > { %6506 = vmatpush3.bf16.msra.mxu1 %v6663_v14  ;;  %v2855_v14 = vld [vmem:[#allocation11 + $0x38] sm:$0xff] }
 0x55c   : > { %v2540_v51 = vrot.slane %v2532_v47, %v7583_v44  ;;  %v2547_v52 = vrot.slane %v2533_v48, %v7583_v44  ;;  %v2556_v55 = vrot.slane %v2548_v49, %v7583_v44  ;;  %v2563_v56 = vrot.slane %v2549_v50, %v7583_v44  ;;  %6507 = vmatprep.subr.bf16.mxu1 %v7802_v11 }
 0x55e   : > { %v5863_v23 = vcombine.low %v2540_v51, %v2547_v52  ;;  %v5865_v57 = vcombine.high %v2540_v51, %v2547_v52  ;;  %v5867_v58 = vcombine.low %v2556_v55, %v2563_v56  ;;  %v5869_v59 = vcombine.high %v2556_v55, %v2563_v56 }
 0x560   : > { %v2612_v60 = vrot.slane %v5863_v23, %v7580_v37  ;;  %v2628_v61 = vrot.slane %v5865_v57, %v7580_v37  ;;  %v2644_v62 = vrot.slane %v5867_v58, %v7580_v37  ;;  %v2660_v63 = vrot.slane %v5869_v59, %v7580_v37  ;;  %v6664_v57 = vld [vmem:[#allocation9 + $0x8] sm:$0xff]  }
 0x561   : > { %6508 = vmatpush3.bf16.msra.mxu1 %v6664_v57 }
 0x562   : > { %v2669_v2 = vcombine.high %v2612_v60, %v2628_v61  ;;  %v2701_v3 = vcombine.high %v2644_v62, %v2660_v63  ;;  %v2668_v4 = vcombine.low %v2612_v60, %v2628_v61  ;;  %v2700_v5 = vcombine.low %v2644_v62, %v2660_v63  ;;  %v2848_v62 = vld [vmem:[#allocation11] sm:$0xff] }
 0x563   : > { %v2852_v63 = vld [vmem:[#allocation11 + $0x20] sm:$0xff] }
 0x564   : > { %v2683_v0 = vrot.slane %v2669_v2, %v7583_v44  ;;  %v2715_v6 = vrot.slane %v2701_v3, %v7583_v44  ;;  %v7867_v7 = vrot.slane %v2668_v4, %v7583_v44  ;;  %v7870_v8 = vrot.slane %v2700_v5, %v7583_v44  ;;  %v2849_v2 = vld [vmem:[#allocation11 + $0x8] sm:$0xff] }
 0x566   : > { %v2734_v9 = vcombine.low %v2683_v0, %v2715_v6  ;;  %v2733_v10 = vcombine.high %v7867_v7, %v7870_v8  ;;  %v2735_v45 = vcombine.high %v2683_v0, %v2715_v6  ;;  %v2732_v16 = vcombine.low %v7867_v7, %v7870_v8  ;;  %v2324_v25 = vpop.f32.mrb[28].mxu1  ;;  %v2370_v26 = vpop.f32.mrb[32].mxu0  ;;  %v2853_v0 = vld [vmem:[#allocation11 + $0x28] sm:$0xff]  ;;  %v2856_v8 = vld [vmem:[#allocation11 + $0x40] sm:$0xff] }
 0x567   : > { %v6485_v12 = vpop.f32.mrb[29].mxu1  ;;  %v6491_v13 = vpop.f32.mrb[33].mxu0  ;;  %v5875_v6 = vcombine.low %v2848_v62, %v2852_v63 }
 0x568   : > { %2745 = vrot.lane.b32.xlu1 %v2734_v9, %s7136_s18  ;;  %2741 = vrot.lane.b32.xlu0 %v2733_v10, %s7137_s21  ;;  %v2327_v18 = vpop.f32.mrb[30].mxu1  ;;  %v2373_v19 = vpop.f32.mrb[34].mxu0  ;;  %v5877_v9 = vcombine.low %v2849_v2, %v2853_v0  ;;  %v5878_v10 = vcombine.high %v2849_v2, %v2853_v0  ;;  %v2864_v2 = vld [vmem:[#allocation14 + $0x4] sm:$0xff] }
 0x569   : > { %v6486_v20 = vpop.f32.mrb[31].mxu1  ;;  %v6492_v21 = vpop.f32.mrb[35].mxu0 }
 0x56a   : > { %3030 = vmatprep.subr.bf16.mxu1 %v5878_v10 }
 0x56c   : > { %2749 = vrot.lane.b32.xlu1 %v2735_v45, %s7138_s9 }
 0x58d   : > { %v2462_v22 = vpop.f32.mrb[36].mxu0 }
 0x58e   : > { %v2416_v24 = vpop.f32.mrb[32].mxu1  ;;  %v2516_v1 = vcombine.low %v2370_v26, %v2462_v22  ;;  %v2517_v27 = vcombine.high %v2370_v26, %v2462_v22  ;;  %v6503_v29 = vpop.f32.mrb[37].mxu0 }
 0x58f   : > { %v2500_v30 = vcombine.low %v2324_v25, %v2416_v24  ;;  %v2501_v32 = vcombine.high %v2324_v25, %v2416_v24  ;;  %v6497_v34 = vpop.f32.mrb[33].mxu1  ;;  %v2465_v53 = vpop.f32.mrb[38].mxu0 }
 0x590   : > { %v2524_v35 = vrot.slane %v2516_v1, %v7580_v37  ;;  %v2531_v54 = vrot.slane %v2517_v27, %v7580_v37  ;;  %v2419_v36 = vpop.f32.mrb[34].mxu1  ;;  %v6504_v28 = vpop.f32.mrb[39].mxu0  ;;  %v2857_v53 = vld [vmem:[#allocation11 + $0x48] sm:$0xff] }
 0x591   : > { %v2508_v38 = vrot.slane %v2500_v30, %v7580_v37  ;;  %v2515_v31 = vrot.slane %v2501_v32, %v7580_v37  ;;  %v6498_v39 = vpop.f32.mrb[35].mxu1  ;;  %v2861_v36 = vld [vmem:[#allocation11 + $0x68] sm:$0xff]  ;;  %v7143_v28 = vmov 0  }
 0x592   : > { %3021 = vmatprep.mubr.bf16.mxu0 %v7143_v28  ;;  %v2850_v39 = vld [vmem:[#allocation11 + $0x10] sm:$0xff] }
 0x593   : > { %v2564_v40 = vcombine.low %v2508_v38, %v2524_v35  ;;  %v2565_v41 = vcombine.high %v2508_v38, %v2524_v35  ;;  %v2580_v42 = vcombine.low %v2515_v31, %v2531_v54  ;;  %v2581_v43 = vcombine.high %v2515_v31, %v2531_v54 }
 0x594   : > { %v5885_v38 = vcombine.low %v2857_v53, %v2861_v36  ;;  %v5886_v31 = vcombine.high %v2857_v53, %v2861_v36 }
 0x595   : > { %v2572_v15 = vrot.slane %v2564_v40, %v7583_v44  ;;  %v2579_v17 = vrot.slane %v2565_v41, %v7583_v44  ;;  %v2588_v46 = vrot.slane %v2580_v42, %v7583_v44  ;;  %v2595_v47 = vrot.slane %v2581_v43, %v7583_v44  ;;  %v2854_v40 = vld [vmem:[#allocation11 + $0x30] sm:$0xff]  ;;  %v2851_v41 = vld [vmem:[#allocation11 + $0x18] sm:$0xff] }
 0x596   : > { %v5879_v42 = vcombine.low %v2850_v39, %v2854_v40  ;;  %v5880_v43 = vcombine.high %v2850_v39, %v2854_v40 }
 0x597   : > { %v5864_v48 = vcombine.low %v2572_v15, %v2579_v17  ;;  %v5866_v49 = vcombine.high %v2572_v15, %v2579_v17  ;;  %v5868_v50 = vcombine.low %v2588_v46, %v2595_v47  ;;  %v5870_v51 = vcombine.high %v2588_v46, %v2595_v47  ;;  %v5871_v46 = vld [vmem:[#allocation14 + $0x3] ss:$0 sm:$0xff]  ;;  %v2858_v47 = vld [vmem:[#allocation11 + $0x50] sm:$0xff] }
 0x598   : > { %v5881_v15 = vcombine.low %v2851_v41, %v2855_v14  ;;  %v5882_v17 = vcombine.high %v2851_v41, %v2855_v14 }
 0x599   : > { %v2619_v52 = vrot.slane %v5864_v48, %v7580_v37  ;;  %v2635_v55 = vrot.slane %v5866_v49, %v7580_v37  ;;  %v2651_v56 = vrot.slane %v5868_v50, %v7580_v37  ;;  %v2667_v23 = vrot.slane %v5870_v51, %v7580_v37  ;;  %v2862_v49 = vld [vmem:[#allocation11 + $0x70] sm:$0xff]  ;;  %v2859_v50 = vld [vmem:[#allocation11 + $0x58] sm:$0xff] }
 0x59a   : > { %v5876_v37 = vcombine.high %v2848_v62, %v2852_v63  ;;  %v2863_v51 = vld [vmem:[#allocation11 + $0x78] sm:$0xff]  ;;  %v2868_v62 = vsub.s32 0, %v7577_v33  ;;  %v2876_v63 = vsub.s32 2, %v7577_v33 }
 0x59b   : > { %v2684_v58 = vcombine.low %v2619_v52, %v2635_v55  ;;  %v2716_v59 = vcombine.low %v2651_v56, %v2667_v23  ;;  %v2685_v60 = vcombine.high %v2619_v52, %v2635_v55  ;;  %v2717_v61 = vcombine.high %v2651_v56, %v2667_v23 }
 0x59c   : > { %2989 = vmatprep.subr.bf16.mxu0 %v5876_v37 }
 0x59d   : > { %v2692_v3 = vrot.slane %v2684_v58, %v7583_v44  ;;  %v2724_v11 = vrot.slane %v2716_v59, %v7583_v44  ;;  %v2699_v4 = vrot.slane %v2685_v60, %v7583_v44  ;;  %v2731_v5 = vrot.slane %v2717_v61, %v7583_v44  ;;  %2990 = vmatpush1.bf16.msra.mxu0 %v5875_v6 }
 0x59e   : > { %v5888_v58 = vcombine.high %v2858_v47, %v2862_v49  ;;  %v5890_v59 = vcombine.high %v2859_v50, %v2863_v51  ;;  %v5887_v60 = vcombine.low %v2858_v47, %v2862_v49  ;;  %v5889_v61 = vcombine.low %v2859_v50, %v2863_v51 }
 0x59f   : > { %v2737_v45 = vcombine.high %v2692_v3, %v2724_v11  ;;  %v2736_v25 = vcombine.low %v2692_v3, %v2724_v11  ;;  %v2739_v26 = vcombine.high %v2699_v4, %v2731_v5  ;;  %v2738_v12 = vcombine.low %v2699_v4, %v2731_v5 }
 0x5a0   : > { %v2872_v3 = vsub.s32 1, %v7577_v33  ;;  %v2880_v11 = vsub.s32 3, %v7577_v33  ;;  %v2869_v4 = vrot.slane %v2864_v2, %v2868_v62  ;;  %v2877_v5 = vrot.slane %v2864_v2, %v2876_v63 }
 0x5a1   : > { %2757 = vrot.lane.b32.xlu1 %v2737_v45, %s7139_s26  ;;  %2753 = vrot.lane.b32.xlu0 %v2736_v25, %s7140_s20 }
 0x5a2   : > { %v2873_v0 = vrot.slane %v2864_v2, %v2872_v3  ;;  %v2881_v6 = vrot.slane %v2864_v2, %v2880_v11 }
 0x5a5   : > { %2765 = vrot.lane.b32.xlu1 %v2739_v26, %s7141_s8  ;;  %2761 = vrot.lane.b32.xlu0 %v2738_v12, %s7142_s19  ;;  %v2884_v12 = vsub.s32 4, %v7577_v33 }
 0x5da   : > { %v2746_v44 = vpop.permute.xlu1 %2745  ;;  %v2742_v13 = vpop.permute.xlu0 %2741 }
 0x5db   : > { %v2768_v18 = vsel %vm1625_vm2, %v2732_v16, %v2742_v13  ;;  %v2860_v16 = vld [vmem:[#allocation11 + $0x60] sm:$0xff] }
 0x5dc   : > { %v2769_v20 = vsel %vm2002_vm4, %v2768_v18, %v2746_v44  ;;  %v5883_v35 = vcombine.low %v2856_v8, %v2860_v16  ;;  %v5884_v54 = vcombine.high %v2856_v8, %v2860_v16  ;;  %v2892_v44 = vsub.s32 6, %v7577_v33 }
 0x5de   : > { %v2750_v19 = vpop.permute.xlu1 %2749  ;;  %2991 = vmatprep.subr.bf16.mxu0 %v5884_v54 }
 0x5df   : > { %v2771_v21 = vsel %vm2770_vm5, %v2769_v20, %v2750_v19  ;;  %2992 = vmatpush1.bf16.msra.mxu0 %v5883_v35 }
 0x5e0   : > { %3071 = vmatprep.subr.bf16.mxu0 %v5880_v43 }
 0x613   : > { %v2758_v22 = vpop.permute.xlu1 %2757  ;;  %v2754_v24 = vpop.permute.xlu0 %2753 }
 0x614   : > { %v2773_v1 = vsel %vm2772_vm6, %v2771_v21, %v2754_v24  ;;  %v2888_v21 = vsub.s32 5, %v7577_v33 }
 0x615   : > { %v2775_v29 = vsel %vm2774_vm7, %v2773_v1, %v2758_v22  ;;  %v2896_v22 = vsub.s32 7, %v7577_v33 }
 0x616   : > { %v2889_v8 = vrot.slane %v2864_v2, %v2888_v21 }
 0x617   : > { %v2766_v27 = vpop.permute.xlu1 %2765  ;;  %v2762_v30 = vpop.permute.xlu0 %2761  ;;  %v2897_v16 = vrot.slane %v2864_v2, %v2896_v22 }
 0x618   : > { %v2777_v32 = vsel %vm2776_vm8, %v2775_v29, %v2762_v30 }
 0x619   : > { %v2779_v34 = vsel %vm2778_vm9, %v2777_v32, %v2766_v27 }
 0x61a   : > { %v2780_v7 = vpack.c.bf16 %v2779_v34, %v2779_v34  ;;  %v2885_v34 = vrot.slane %v2864_v2, %v2884_v12 }
 0x61c   : > { %6510 = vmatmul.mubr.msk.bf16.vlgmr.msra.gmra.mrb[36].mxu1 %vm549_vm1, %v2780_v7  ;;  %v2893_v7 = vrot.slane %v2864_v2, %v2892_v44 }
 0x61d   : > { %3031 = vmatpush1.bf16.msra.mxu1 %v5877_v9  ;;  %3062 = vmatprep.mubr.bf16.mxu1 %v7143_v28 }
 0x61e   : > { %3032 = vmatprep.subr.bf16.mxu1 %v5886_v31 }
 0x621   : > { %3033 = vmatpush1.bf16.msra.mxu1 %v5885_v38 }
 0x622   : > { %3112 = vmatprep.subr.bf16.mxu1 %v5882_v17 }
 0x6ef   : > { %v2841_v48 = vpop.f32.mrb[36].mxu1 }
 0x6f0   : > { %v2842_v52 = vadd.f32 %v5871_v46, %v2841_v48  ;;  %v6511_v55 = vpop.f32.mrb[37].mxu1 }
 0x6f1   : > { %v2844_v56 = vpop.f32.mrb[38].mxu1 }
 0x6f2   : > { %v2847_v23 = vpack.c.bf16 %v2842_v52, %v2842_v52  ;;  %v6512_v57 = vpop.f32.mrb[39].mxu1 }
 0x6f4   : > { %5891 = vmatmul.mubr.msk.bf16.vlgmr.msra.gmra.mrb[40].mxu0 %vm549_vm1, %v2847_v23  ;;  %5892 = vmatmul.mubr.msk.bf16.vlgmr.msra.gmra.mrb[40].mxu1 %vm549_vm1, %v2847_v23 }
 0x6f5   : > { %3072 = vmatpush1.bf16.msra.mxu0 %v5879_v42  ;;  %3113 = vmatpush1.bf16.msra.mxu1 %v5881_v15 }
 0x6f6   : > { %3073 = vmatprep.subr.bf16.mxu0 %v5888_v58  ;;  %3114 = vmatprep.subr.bf16.mxu1 %v5890_v59 }
 0x6f7   : > { %3103 = vmatprep.mubr.bf16.mxu0 %v7143_v28  ;;  %3144 = vmatprep.mubr.bf16.mxu1 %v7143_v28 }
 0x6f9   : > { %3074 = vmatpush1.bf16.msra.mxu0 %v5887_v60  ;;  %3115 = vmatpush1.bf16.msra.mxu1 %v5889_v61 }
 0x6fc   : > { %5893 = vmatmul.mubr.msk.bf16.vlgmr.msra.gmra.mrb[44].mxu0 %vm549_vm1, %v2847_v23  ;;  %5894 = vmatmul.mubr.msk.bf16.vlgmr.msra.gmra.mrb[44].mxu1 %vm549_vm1, %v2847_v23 }
 0x7c7   : > { %v3023_v37 = vpop.f32.mrb[40].mxu0  ;;  %v3064_v9 = vpop.f32.mrb[40].mxu1 }
 0x7c8   : > { %v3024_v10 = vadd.f32 %v3023_v37, %v2869_v4  ;;  %v3065_v45 = vadd.f32 %v3064_v9, %v2877_v5  ;;  %v3025_v25 = vpop.f32.mrb[41].mxu0  ;;  %v3066_v26 = vpop.f32.mrb[41].mxu1 }
 0x7c9   : > { %v3026_v13 = vadd.f32 %v3025_v25, %v2873_v0  ;;  %v3067_v18 = vadd.f32 %v3066_v26, %v2881_v6  ;;  %v3027_v19 = vpop.f32.mrb[42].mxu0  ;;  %v3068_v20 = vpop.f32.mrb[42].mxu1 }
 0x7ca   : > { %v3153_v24 = vmax.f32 %v3024_v10, 0.0  ;;  %v3155_v1 = vmax.f32 %v3065_v45, 0.0  ;;  %v3028_v27 = vpop.f32.mrb[43].mxu0  ;;  %v3069_v29 = vpop.f32.mrb[43].mxu1 }
 0x7cb   : > { %v3154_v30 = vmax.f32 %v3026_v13, 0.0  ;;  %v3156_v32 = vmax.f32 %v3067_v18, 0.0 }
 0x7cc   : > { %3161 = vst [vmem:[#allocation2] sm:$0xff] %v3153_v24  ;;  %3163 = vst [vmem:[#allocation2 + $0x10] sm:$0xff] %v3155_v1 }
 0x7cd   : > { %3162 = vst [vmem:[#allocation2 + $0x8] sm:$0xff] %v3154_v30  ;;  %3164 = vst [vmem:[#allocation2 + $0x18] sm:$0xff] %v3156_v32 }
 0x7cf   : > { %v3105_v53 = vpop.f32.mrb[44].mxu0  ;;  %v3146_v35 = vpop.f32.mrb[44].mxu1 }
 0x7d0   : > { %v3106_v54 = vadd.f32 %v3105_v53, %v2885_v34  ;;  %v3147_v36 = vadd.f32 %v3146_v35, %v2893_v7  ;;  %v3107_v28 = vpop.f32.mrb[45].mxu0  ;;  %v3148_v33 = vpop.f32.mrb[45].mxu1 }
 0x7d1   : > { %v3108_v38 = vadd.f32 %v3107_v28, %v2889_v8  ;;  %v3149_v31 = vadd.f32 %v3148_v33, %v2897_v16  ;;  %v3109_v39 = vpop.f32.mrb[46].mxu0  ;;  %v3150_v40 = vpop.f32.mrb[46].mxu1 }
 0x7d2   : > { %v3157_v41 = vmax.f32 %v3106_v54, 0.0  ;;  %v3159_v42 = vmax.f32 %v3147_v36, 0.0  ;;  %v3110_v43 = vpop.f32.mrb[47].mxu0  ;;  %v3151_v14 = vpop.f32.mrb[47].mxu1 }
 0x7d3   : > { %v3158_v15 = vmax.f32 %v3108_v38, 0.0  ;;  %v3160_v17 = vmax.f32 %v3149_v31, 0.0 }
 0x7d4   : > { %3165 = vst [vmem:[#allocation2 + $0x20] sm:$0xff] %v3157_v41  ;;  %3167 = vst [vmem:[#allocation2 + $0x30] sm:$0xff] %v3159_v42 }
 0x7d5   : > { %3166 = vst [vmem:[#allocation2 + $0x28] sm:$0xff] %v3158_v15  ;;  %3168 = vst [vmem:[#allocation2 + $0x38] sm:$0xff] %v3160_v17 }
 0x7d6 PF: > { %v3194_v46 = vld [vmem:[%s7504_s12] sm:$0xff]  ;;  %v3195_v48 = vld [vmem:[%s7504_s12 + $0x8] sm:$0xff]  ;;  %s5895_s16 = sshll.u32 %s7235_s25, 8  ;;  %p6025_p5 = scmp.ne.s32.totalorder %s7235_s25, 3 }
 0x7d7   : > { %v3198_v47 = vld [vmem:[%s7504_s12 + $0x20] sm:$0xff]  ;;  %v3199_v50 = vld [vmem:[%s7504_s12 + $0x28] sm:$0xff]  ;;  %s7932_s17 = sshra.s32 %s5895_s16, 7  ;;  %s8563_s28 = sld [smem:[#allocation23_spill]] (!%p6025_p5)  ;;  %vm7145_vm10 = vmmov (!%p6025_p5), 0   ;;  %vm5613_vm12 = vcmask (!%p6025_p5), 130048  }
 0x7d8   : > { %v5898_v49 = vcombine.high %v3194_v46, %v3198_v47  ;;  %v5897_v51 = vcombine.low %v3194_v46, %v3198_v47  ;;  %v3202_v52 = vld [vmem:[%s7504_s12 + $0x40] sm:$0xff]  ;;  %v5900_v56 = vcombine.high %v3195_v48, %v3199_v50  ;;  %v5899_v23 = vcombine.low %v3195_v48, %v3199_v50  ;;  %v3203_v58 = vld [vmem:[%s7504_s12 + $0x48] sm:$0xff]  ;;  %s5896_s24 = sshll.u32 %s7932_s17, 3  ;;  %s8564_s8 = sld [smem:[#allocation24_spill]] (!%p6025_p5) }
 0x7d9   : > { %v3206_v55 = vld [vmem:[%s7504_s12 + $0x60] sm:$0xff]  ;;  %v3207_v59 = vld [vmem:[%s7504_s12 + $0x68] sm:$0xff]  ;;  %s7943_s13 = scalar_lea.vmem [#allocation2], %s5896_s24  ;;  %s8565_s19 = sld [smem:[#allocation25_spill]] (!%p6025_p5)  ;;  %vm5670_vm13 = vcmask (!%p6025_p5), 261120   ;;  %vm5672_vm14 = vcmask (!%p6025_p5), 392192  }
 0x7da   : > { %v5906_v57 = vcombine.high %v3202_v52, %v3206_v55  ;;  %v3210_v60 = vld [vmem:[%s7504_s12 + $0x80] sm:$0xff]  ;;  %3962 = vmatprep.subr.bf16.mxu0 %v5898_v49  ;;  %v5908_v61 = vcombine.high %v3203_v58, %v3207_v59  ;;  %v3211_v63 = vld [vmem:[%s7504_s12 + $0x88] sm:$0xff]  ;;  %4003 = vmatprep.subr.bf16.mxu1 %v5900_v56  ;;  %v5905_v3 = vcombine.low %v3202_v52, %v3206_v55  ;;  %s7146_s16 = smov (!%p6025_p5), 16   ;;  %s7147_s17 = smov (!%p6025_p5), 32   ;;  %vm5674_vm15 = vcmask (!%p6025_p5), 400384  }
 0x7db   : > { %v3214_v62 = vld [vmem:[%s7504_s12 + $0xa0] sm:$0xff]  ;;  %v3215_v2 = vld [vmem:[%s7504_s12 + $0xa8] sm:$0xff]  ;;  %3963 = vmatpush1.bf16.msra.mxu0 %v5897_v51  ;;  %4004 = vmatpush1.bf16.msra.mxu1 %v5899_v23  ;;  %v5907_v11 = vcombine.low %v3203_v58, %v3207_v59  ;;  %s7148_s24 = smov (!%p6025_p5), 48   ;;  %s8566_s29 = sld [smem:[#allocation26_spill]] (!%p6025_p5) }
 0x7dc   : > { %3964 = vmatprep.subr.bf16.mxu0 %v5906_v57  ;;  %v5914_v4 = vcombine.high %v3210_v60, %v3214_v62  ;;  %4005 = vmatprep.subr.bf16.mxu1 %v5908_v61  ;;  %v5916_v5 = vcombine.high %v3211_v63, %v3215_v2  ;;  %v3218_v0 = vld [vmem:[%s7504_s12 + $0xc0] sm:$0xff]  ;;  %v3219_v37 = vld [vmem:[%s7504_s12 + $0xc8] sm:$0xff]  ;;  %v5913_v10 = vcombine.low %v3210_v60, %v3214_v62 }
 0x7dd   : > { %v3222_v6 = vld [vmem:[%s7504_s12 + $0xe0] sm:$0xff]  ;;  %v3223_v9 = vld [vmem:[%s7504_s12 + $0xe8] sm:$0xff]  ;;  %v5915_v45 = vcombine.low %v3211_v63, %v3215_v2 }
 0x7de   : > { %v5922_v25 = vcombine.high %v3218_v0, %v3222_v6  ;;  %v5924_v26 = vcombine.high %v3219_v37, %v3223_v9  ;;  %v3226_v12 = vld [vmem:[%s7504_s12 + $0x100] sm:$0xff]  ;;  %v3227_v13 = vld [vmem:[%s7504_s12 + $0x108] sm:$0xff]  ;;  %v5921_v19 = vcombine.low %v3218_v0, %v3222_v6  ;;  %v5923_v20 = vcombine.low %v3219_v37, %v3223_v9 }
 0x7df   : > { %3965 = vmatpush1.bf16.msra.mxu0 %v5905_v3  ;;  %4006 = vmatpush1.bf16.msra.mxu1 %v5907_v11  ;;  %v3230_v44 = vld [vmem:[%s7504_s12 + $0x120] sm:$0xff]  ;;  %v3231_v18 = vld [vmem:[%s7504_s12 + $0x128] sm:$0xff] }
 0x7e0   : > { %3966 = vmatprep.subr.bf16.mxu0 %v5914_v4  ;;  %4007 = vmatprep.subr.bf16.mxu1 %v5916_v5  ;;  %v5930_v21 = vcombine.high %v3226_v12, %v3230_v44  ;;  %v5932_v22 = vcombine.high %v3227_v13, %v3231_v18  ;;  %v3234_v24 = vld [vmem:[%s7504_s12 + $0x140] sm:$0xff]  ;;  %v3235_v27 = vld [vmem:[%s7504_s12 + $0x148] sm:$0xff]  ;;  %v5929_v30 = vcombine.low %v3226_v12, %v3230_v44 }
 0x7e1   : > { %v3238_v1 = vld [vmem:[%s7504_s12 + $0x160] sm:$0xff]  ;;  %v3239_v29 = vld [vmem:[%s7504_s12 + $0x168] sm:$0xff]  ;;  %v5931_v32 = vcombine.low %v3227_v13, %v3231_v18 }
 0x7e2   : > { %v5938_v34 = vcombine.high %v3234_v24, %v3238_v1  ;;  %v5940_v7 = vcombine.high %v3235_v27, %v3239_v29  ;;  %v3242_v8 = vld [vmem:[%s7504_s12 + $0x180] sm:$0xff]  ;;  %v3243_v53 = vld [vmem:[%s7504_s12 + $0x188] sm:$0xff]  ;;  %v5937_v54 = vcombine.low %v3234_v24, %v3238_v1  ;;  %v5939_v36 = vcombine.low %v3235_v27, %v3239_v29 }
 0x7e3   : > { %3967 = vmatpush1.bf16.msra.mxu0 %v5913_v10  ;;  %4008 = vmatpush1.bf16.msra.mxu1 %v5915_v45  ;;  %v3246_v16 = vld [vmem:[%s7504_s12 + $0x1a0] sm:$0xff]  ;;  %v3247_v35 = vld [vmem:[%s7504_s12 + $0x1a8] sm:$0xff] }
 0x7e4   : > { %3968 = vmatprep.subr.bf16.mxu0 %v5922_v25  ;;  %4009 = vmatprep.subr.bf16.mxu1 %v5924_v26  ;;  %v5946_v28 = vcombine.high %v3242_v8, %v3246_v16  ;;  %v3183_v33 = vld [vmem:[%s7943_s13 + $0x8] sm:$0xff]  ;;  %v5948_v38 = vcombine.high %v3243_v53, %v3247_v35  ;;  %v3250_v31 = vld [vmem:[%s7504_s12 + $0x1c0] sm:$0xff]  ;;  %v5945_v43 = vcombine.low %v3242_v8, %v3246_v16 }
 0x7e5   : > { %v3254_v39 = vld [vmem:[%s7504_s12 + $0x1e0] sm:$0xff]  ;;  %v7948_v40 = vpack.c.bf16 %v3183_v33, %v3183_v33  ;;  %v3251_v41 = vld [vmem:[%s7504_s12 + $0x1c8] sm:$0xff]  ;;  %v5947_v14 = vcombine.low %v3243_v53, %v3247_v35 }
 0x7e6   : > { %v3255_v42 = vld [vmem:[%s7504_s12 + $0x1e8] sm:$0xff]  ;;  %v5954_v15 = vcombine.high %v3250_v31, %v3254_v39  ;;  %v3258_v46 = vld [vmem:[%s7504_s12 + $0x200] sm:$0xff]  ;;  %v5953_v50 = vcombine.low %v3250_v31, %v3254_v39 }
 0x7e7   : > { %3969 = vmatpush1.bf16.msra.mxu0 %v5921_v19  ;;  %4010 = vmatpush1.bf16.msra.mxu1 %v5923_v20  ;;  %v5956_v17 = vcombine.high %v3251_v41, %v3255_v42  ;;  %v3262_v47 = vld [vmem:[%s7504_s12 + $0x220] sm:$0xff]  ;;  %v3259_v48 = vld [vmem:[%s7504_s12 + $0x208] sm:$0xff]  ;;  %v5955_v51 = vcombine.low %v3251_v41, %v3255_v42 }
 0x7e8   : > { %3970 = vmatprep.subr.bf16.mxu0 %v5930_v21  ;;  %4011 = vmatprep.subr.bf16.mxu1 %v5932_v22  ;;  %v3263_v49 = vld [vmem:[%s7504_s12 + $0x228] sm:$0xff]  ;;  %v5962_v52 = vcombine.high %v3258_v46, %v3262_v47  ;;  %v3266_v56 = vld [vmem:[%s7504_s12 + $0x240] sm:$0xff]  ;;  %v5961_v59 = vcombine.low %v3258_v46, %v3262_v47  ;;  %v3196_v47 = vld [vmem:[%s7504_s12 + $0x10] sm:$0xff] }
 0x7e9   : > { %3994 = vmatprep.mubr.bf16.mxu0 %v7948_v40  ;;  %4035 = vmatprep.mubr.bf16.mxu1 %v7948_v40  ;;  %v5964_v55 = vcombine.high %v3259_v48, %v3263_v49  ;;  %v3270_v23 = vld [vmem:[%s7504_s12 + $0x260] sm:$0xff]  ;;  %v3267_v57 = vld [vmem:[%s7504_s12 + $0x248] sm:$0xff]  ;;  %v5963_v60 = vcombine.low %v3259_v48, %v3263_v49  ;;  %v3200_v48 = vld [vmem:[%s7504_s12 + $0x30] sm:$0xff] }
 0x7ea   : > { %v3271_v58 = vld [vmem:[%s7504_s12 + $0x268] sm:$0xff]  ;;  %v5970_v61 = vcombine.high %v3266_v56, %v3270_v23  ;;  %v3274_v63 = vld [vmem:[%s7504_s12 + $0x280] sm:$0xff]  ;;  %v5969_v4 = vcombine.low %v3266_v56, %v3270_v23  ;;  %v3197_v49 = vld [vmem:[%s7504_s12 + $0x18] sm:$0xff]  ;;  %v5902_v56 = vcombine.high %v3196_v47, %v3200_v48 }
 0x7eb   : > { %3971 = vmatpush1.bf16.msra.mxu0 %v5929_v30  ;;  %4012 = vmatpush1.bf16.msra.mxu1 %v5931_v32  ;;  %v5972_v62 = vcombine.high %v3267_v57, %v3271_v58  ;;  %v3278_v2 = vld [vmem:[%s7504_s12 + $0x2a0] sm:$0xff]  ;;  %v3275_v3 = vld [vmem:[%s7504_s12 + $0x288] sm:$0xff]  ;;  %v5971_v5 = vcombine.low %v3267_v57, %v3271_v58  ;;  %v3204_v57 = vld [vmem:[%s7504_s12 + $0x50] sm:$0xff] }
 0x7ec   : > { %3972 = vmatprep.subr.bf16.mxu0 %v5938_v34  ;;  %4013 = vmatprep.subr.bf16.mxu1 %v5940_v7  ;;  %v3279_v11 = vld [vmem:[%s7504_s12 + $0x2a8] sm:$0xff]  ;;  %v5978_v0 = vcombine.high %v3274_v63, %v3278_v2  ;;  %v3282_v37 = vld [vmem:[%s7504_s12 + $0x2c0] sm:$0xff]  ;;  %v5977_v25 = vcombine.low %v3274_v63, %v3278_v2  ;;  %v3208_v58 = vld [vmem:[%s7504_s12 + $0x70] sm:$0xff] }
 0x7ed   : > { %v5980_v6 = vcombine.high %v3275_v3, %v3279_v11  ;;  %v3286_v9 = vld [vmem:[%s7504_s12 + $0x2e0] sm:$0xff]  ;;  %v3283_v10 = vld [vmem:[%s7504_s12 + $0x2c8] sm:$0xff]  ;;  %v5979_v26 = vcombine.low %v3275_v3, %v3279_v11  ;;  %v5910_v2 = vcombine.high %v3204_v57, %v3208_v58  ;;  %v3212_v11 = vld [vmem:[%s7504_s12 + $0x90] sm:$0xff] }
 0x7ee   : > { %v3287_v45 = vld [vmem:[%s7504_s12 + $0x2e8] sm:$0xff]  ;;  %v5986_v12 = vcombine.high %v3282_v37, %v3286_v9  ;;  %v3290_v13 = vld [vmem:[%s7504_s12 + $0x300] sm:$0xff]  ;;  %v5985_v21 = vcombine.low %v3282_v37, %v3286_v9 }
 0x7ef   : > { %3973 = vmatpush1.bf16.msra.mxu0 %v5937_v54  ;;  %4014 = vmatpush1.bf16.msra.mxu1 %v5939_v36  ;;  %v5988_v44 = vcombine.high %v3283_v10, %v3287_v45  ;;  %v3294_v18 = vld [vmem:[%s7504_s12 + $0x320] sm:$0xff]  ;;  %v3291_v19 = vld [vmem:[%s7504_s12 + $0x308] sm:$0xff]  ;;  %v5987_v22 = vcombine.low %v3283_v10, %v3287_v45  ;;  %v3220_v45 = vld [vmem:[%s7504_s12 + $0xd0] sm:$0xff] }
 0x7f0   : > { %3974 = vmatprep.subr.bf16.mxu0 %v5946_v28  ;;  %4015 = vmatprep.subr.bf16.mxu1 %v5948_v38  ;;  %v3295_v20 = vld [vmem:[%s7504_s12 + $0x328] sm:$0xff]  ;;  %v5994_v24 = vcombine.high %v3290_v13, %v3294_v18  ;;  %v3298_v27 = vld [vmem:[%s7504_s12 + $0x340] sm:$0xff]  ;;  %v5993_v34 = vcombine.low %v3290_v13, %v3294_v18 }
 0x7f1   : > { %v5996_v1 = vcombine.high %v3291_v19, %v3295_v20  ;;  %v3302_v29 = vld [vmem:[%s7504_s12 + $0x360] sm:$0xff]  ;;  %v3299_v30 = vld [vmem:[%s7504_s12 + $0x348] sm:$0xff]  ;;  %v5995_v7 = vcombine.low %v3291_v19, %v3295_v20  ;;  %v3228_v20 = vld [vmem:[%s7504_s12 + $0x110] sm:$0xff] }
 0x7f2   : > { %v3303_v32 = vld [vmem:[%s7504_s12 + $0x368] sm:$0xff]  ;;  %v6002_v8 = vcombine.high %v3298_v27, %v3302_v29  ;;  %v3306_v53 = vld [vmem:[%s7504_s12 + $0x380] sm:$0xff]  ;;  %v6001_v28 = vcombine.low %v3298_v27, %v3302_v29 }
 0x7f3   : > { %3975 = vmatpush1.bf16.msra.mxu0 %v5945_v43  ;;  %4016 = vmatpush1.bf16.msra.mxu1 %v5947_v14  ;;  %v6004_v16 = vcombine.high %v3299_v30, %v3303_v32  ;;  %v3310_v35 = vld [vmem:[%s7504_s12 + $0x3a0] sm:$0xff]  ;;  %v3307_v54 = vld [vmem:[%s7504_s12 + $0x388] sm:$0xff]  ;;  %v6003_v33 = vcombine.low %v3299_v30, %v3303_v32  ;;  %v3236_v30 = vld [vmem:[%s7504_s12 + $0x150] sm:$0xff] }
 0x7f4   : > { %3976 = vmatprep.subr.bf16.mxu0 %v5954_v15  ;;  %4017 = vmatprep.subr.bf16.mxu1 %v5956_v17  ;;  %v3311_v36 = vld [vmem:[%s7504_s12 + $0x3a8] sm:$0xff]  ;;  %v6010_v38 = vcombine.high %v3306_v53, %v3310_v35  ;;  %v3314_v39 = vld [vmem:[%s7504_s12 + $0x3c0] sm:$0xff]  ;;  %v6009_v14 = vcombine.low %v3306_v53, %v3310_v35  ;;  %v3240_v32 = vld [vmem:[%s7504_s12 + $0x170] sm:$0xff] }
 0x7f5   : > { %v6012_v31 = vcombine.high %v3307_v54, %v3311_v36  ;;  %v3318_v41 = vld [vmem:[%s7504_s12 + $0x3e0] sm:$0xff]  ;;  %v3315_v42 = vld [vmem:[%s7504_s12 + $0x3c8] sm:$0xff]  ;;  %v6011_v15 = vcombine.low %v3307_v54, %v3311_v36  ;;  %v5942_v53 = vcombine.high %v3236_v30, %v3240_v32  ;;  %v3244_v54 = vld [vmem:[%s7504_s12 + $0x190] sm:$0xff] }
 0x7f6   : > { %v3319_v43 = vld [vmem:[%s7504_s12 + $0x3e8] sm:$0xff]  ;;  %v6018_v17 = vcombine.high %v3314_v39, %v3318_v41  ;;  %v3248_v36 = vld [vmem:[%s7504_s12 + $0x1b0] sm:$0xff] }
 0x7f7   : > { %3977 = vmatpush1.bf16.msra.mxu0 %v5953_v50  ;;  %4018 = vmatpush1.bf16.msra.mxu1 %v5955_v51  ;;  %v6020_v46 = vcombine.high %v3315_v42, %v3319_v43  ;;  %v3201_v50 = vld [vmem:[%s7504_s12 + $0x38] sm:$0xff]  ;;  %v6017_v51 = vcombine.low %v3314_v39, %v3318_v41  ;;  %v5950_v39 = vcombine.high %v3244_v54, %v3248_v36 }
 0x7f8   : > { %3978 = vmatprep.subr.bf16.mxu0 %v5962_v52  ;;  %4019 = vmatprep.subr.bf16.mxu1 %v5964_v55  ;;  %v3182_v52 = vld [vmem:[%s7943_s13] sm:$0xff]  ;;  %v6019_v55 = vcombine.low %v3315_v42, %v3319_v43  ;;  %v5904_v23 = vcombine.high %v3197_v49, %v3201_v50  ;;  %v5903_v63 = vcombine.low %v3197_v49, %v3201_v50  ;;  %v3252_v42 = vld [vmem:[%s7504_s12 + $0x1d0] sm:$0xff] }
 0x7f9   : > { %v3256_v43 = vld [vmem:[%s7504_s12 + $0x1f0] sm:$0xff] }
 0x7fa   : > { %v3260_v49 = vld [vmem:[%s7504_s12 + $0x210] sm:$0xff] }
 0x7fb   : > { %3979 = vmatpush1.bf16.msra.mxu0 %v5961_v59  ;;  %4020 = vmatpush1.bf16.msra.mxu1 %v5963_v60  ;;  %v7993_v59 = vpack.c.bf16 %v3182_v52, %v3182_v52  ;;  %v3205_v60 = vld [vmem:[%s7504_s12 + $0x58] sm:$0xff]  ;;  %v3264_v50 = vld [vmem:[%s7504_s12 + $0x230] sm:$0xff] }
 0x7fc   : > { %3980 = vmatprep.subr.bf16.mxu0 %v5970_v61  ;;  %4021 = vmatprep.subr.bf16.mxu1 %v5972_v62  ;;  %v3209_v61 = vld [vmem:[%s7504_s12 + $0x78] sm:$0xff]  ;;  %v5901_v62 = vcombine.low %v3196_v47, %v3200_v48  ;;  %v5958_v47 = vcombine.high %v3252_v42, %v3256_v43 }
 0x7fd   : > { %v5912_v3 = vcombine.high %v3205_v60, %v3209_v61  ;;  %v5911_v37 = vcombine.low %v3205_v60, %v3209_v61  ;;  %v3265_v52 = vld [vmem:[%s7504_s12 + $0x238] sm:$0xff]  ;;  %v3272_v60 = vld [vmem:[%s7504_s12 + $0x270] sm:$0xff] }
 0x7fe   : > { %v3269_v61 = vld [vmem:[%s7504_s12 + $0x258] sm:$0xff] }
 0x7ff   : > { %3981 = vmatpush1.bf16.msra.mxu0 %v5969_v4  ;;  %4022 = vmatpush1.bf16.msra.mxu1 %v5971_v5  ;;  %v3216_v4 = vld [vmem:[%s7504_s12 + $0xb0] sm:$0xff]  ;;  %v3213_v5 = vld [vmem:[%s7504_s12 + $0x98] sm:$0xff] }
 0x800   : > { %3982 = vmatprep.subr.bf16.mxu0 %v5978_v0  ;;  %4023 = vmatprep.subr.bf16.mxu1 %v5980_v6  ;;  %v3217_v0 = vld [vmem:[%s7504_s12 + $0xb8] sm:$0xff]  ;;  %v5909_v6 = vcombine.low %v3204_v57, %v3208_v58  ;;  %v5918_v9 = vcombine.high %v3212_v11, %v3216_v4  ;;  %v3268_v58 = vld [vmem:[%s7504_s12 + $0x250] sm:$0xff] }
 0x801   : > { %v5920_v10 = vcombine.high %v3213_v5, %v3217_v0  ;;  %v5919_v13 = vcombine.low %v3213_v5, %v3217_v0  ;;  %v3280_v5 = vld [vmem:[%s7504_s12 + $0x2b0] sm:$0xff]  ;;  %v3277_v0 = vld [vmem:[%s7504_s12 + $0x298] sm:$0xff] }
 0x803   : > { %3983 = vmatpush1.bf16.msra.mxu0 %v5977_v25  ;;  %4024 = vmatpush1.bf16.msra.mxu1 %v5979_v26  ;;  %v3224_v25 = vld [vmem:[%s7504_s12 + $0xf0] sm:$0xff]  ;;  %v3221_v26 = vld [vmem:[%s7504_s12 + $0xd8] sm:$0xff] }
 0x804   : > { %3984 = vmatprep.subr.bf16.mxu0 %v5986_v12  ;;  %4025 = vmatprep.subr.bf16.mxu1 %v5988_v44  ;;  %v3225_v12 = vld [vmem:[%s7504_s12 + $0xf8] sm:$0xff]  ;;  %v5917_v44 = vcombine.low %v3212_v11, %v3216_v4  ;;  %v5926_v18 = vcombine.high %v3220_v45, %v3224_v25  ;;  %v3276_v4 = vld [vmem:[%s7504_s12 + $0x290] sm:$0xff] }
 0x805   : > { %v5928_v19 = vcombine.high %v3221_v26, %v3225_v12 }
 0x807   : > { %3985 = vmatpush1.bf16.msra.mxu0 %v5985_v21  ;;  %4026 = vmatpush1.bf16.msra.mxu1 %v5987_v22  ;;  %v3232_v21 = vld [vmem:[%s7504_s12 + $0x130] sm:$0xff]  ;;  %v3229_v22 = vld [vmem:[%s7504_s12 + $0x118] sm:$0xff] }
 0x808   : > { %3986 = vmatprep.subr.bf16.mxu0 %v5994_v24  ;;  %4027 = vmatprep.subr.bf16.mxu1 %v5996_v1  ;;  %v3233_v24 = vld [vmem:[%s7504_s12 + $0x138] sm:$0xff]  ;;  %v5925_v1 = vcombine.low %v3220_v45, %v3224_v25  ;;  %v5934_v27 = vcombine.high %v3228_v20, %v3232_v21  ;;  %v3284_v25 = vld [vmem:[%s7504_s12 + $0x2d0] sm:$0xff] }
 0x809   : > { %v5936_v29 = vcombine.high %v3229_v22, %v3233_v24 }
 0x80b   : > { %3987 = vmatpush1.bf16.msra.mxu0 %v5993_v34  ;;  %4028 = vmatpush1.bf16.msra.mxu1 %v5995_v7  ;;  %v3237_v34 = vld [vmem:[%s7504_s12 + $0x158] sm:$0xff] }
 0x80c   : > { %3988 = vmatprep.subr.bf16.mxu0 %v6002_v8  ;;  %4029 = vmatprep.subr.bf16.mxu1 %v6004_v16  ;;  %v3241_v7 = vld [vmem:[%s7504_s12 + $0x178] sm:$0xff]  ;;  %v5933_v8 = vcombine.low %v3228_v20, %v3232_v21  ;;  %v5935_v16 = vcombine.low %v3229_v22, %v3233_v24  ;;  %v3292_v21 = vld [vmem:[%s7504_s12 + $0x310] sm:$0xff] }
 0x80d   : > { %v5944_v35 = vcombine.high %v3237_v34, %v3241_v7  ;;  %v3296_v22 = vld [vmem:[%s7504_s12 + $0x330] sm:$0xff]  ;;  %v3293_v24 = vld [vmem:[%s7504_s12 + $0x318] sm:$0xff] }
 0x80f   : > { %3989 = vmatpush1.bf16.msra.mxu0 %v6001_v28  ;;  %4030 = vmatpush1.bf16.msra.mxu1 %v6003_v33  ;;  %v3245_v28 = vld [vmem:[%s7504_s12 + $0x198] sm:$0xff] }
 0x810   : > { %3990 = vmatprep.subr.bf16.mxu0 %v6010_v38  ;;  %4031 = vmatprep.subr.bf16.mxu1 %v6012_v31  ;;  %v3249_v33 = vld [vmem:[%s7504_s12 + $0x1b8] sm:$0xff]  ;;  %v5941_v38 = vcombine.low %v3236_v30, %v3240_v32  ;;  %v5943_v31 = vcombine.low %v3237_v34, %v3241_v7  ;;  %v3300_v32 = vld [vmem:[%s7504_s12 + $0x350] sm:$0xff] }
 0x811   : > { %v5952_v41 = vcombine.high %v3245_v28, %v3249_v33  ;;  %v3304_v34 = vld [vmem:[%s7504_s12 + $0x370] sm:$0xff]  ;;  %v3301_v7 = vld [vmem:[%s7504_s12 + $0x358] sm:$0xff] }
 0x813   : > { %3991 = vmatpush1.bf16.msra.mxu0 %v6009_v14  ;;  %4032 = vmatpush1.bf16.msra.mxu1 %v6011_v15  ;;  %v3253_v14 = vld [vmem:[%s7504_s12 + $0x1d8] sm:$0xff] }
 0x814   : > { %3992 = vmatprep.subr.bf16.mxu0 %v6018_v17  ;;  %4033 = vmatprep.subr.bf16.mxu1 %v6020_v46  ;;  %v3257_v15 = vld [vmem:[%s7504_s12 + $0x1f8] sm:$0xff]  ;;  %v5949_v17 = vcombine.low %v3244_v54, %v3248_v36  ;;  %v5951_v46 = vcombine.low %v3245_v28, %v3249_v33  ;;  %v3308_v36 = vld [vmem:[%s7504_s12 + $0x390] sm:$0xff] }
 0x815   : > { %v5960_v48 = vcombine.high %v3253_v14, %v3257_v15  ;;  %v3312_v28 = vld [vmem:[%s7504_s12 + $0x3b0] sm:$0xff]  ;;  %v3309_v33 = vld [vmem:[%s7504_s12 + $0x398] sm:$0xff] }
 0x817   : > { %3993 = vmatpush1.bf16.msra.mxu0 %v6017_v51  ;;  %4034 = vmatpush1.bf16.msra.mxu1 %v6019_v55  ;;  %v3261_v51 = vld [vmem:[%s7504_s12 + $0x218] sm:$0xff]  ;;  %v5957_v55 = vcombine.low %v3252_v42, %v3256_v43  ;;  %v3316_v43 = vld [vmem:[%s7504_s12 + $0x3d0] sm:$0xff] }
 0x818   : > { %4044 = vmatprep.subr.bf16.mxu0 %v5902_v56  ;;  %4085 = vmatprep.subr.bf16.mxu1 %v5904_v23  ;;  %v5959_v56 = vcombine.low %v3253_v14, %v3257_v15  ;;  %v5966_v23 = vcombine.high %v3260_v49, %v3264_v50  ;;  %v5968_v57 = vcombine.high %v3261_v51, %v3265_v52  ;;  %v3320_v14 = vld [vmem:[%s7504_s12 + $0x3f0] sm:$0xff]  ;;  %v3317_v15 = vld [vmem:[%s7504_s12 + $0x3d8] sm:$0xff] }
 0x81a   : > { %3995 = vmatmul.mubr.bf16.vlgmr.msra.gmra.mrb[0].mxu0 %v7993_v59  ;;  %4036 = vmatmul.mubr.bf16.vlgmr.msra.gmra.mrb[0].mxu1 %v7993_v59 }
 0x81b   : > { %4045 = vmatpush1.bf16.msra.mxu0 %v5901_v62  ;;  %4086 = vmatpush1.bf16.msra.mxu1 %v5903_v63  ;;  %v3273_v62 = vld [vmem:[%s7504_s12 + $0x278] sm:$0xff]  ;;  %v5965_v63 = vcombine.low %v3260_v49, %v3264_v50  ;;  %v6021_v50 = vcombine.low %v3316_v43, %v3320_v14 }
 0x81c   : > { %4046 = vmatprep.subr.bf16.mxu0 %v5910_v2  ;;  %4087 = vmatprep.subr.bf16.mxu1 %v5912_v3  ;;  %v5967_v2 = vcombine.low %v3261_v51, %v3265_v52  ;;  %v5974_v3 = vcombine.high %v3268_v58, %v3272_v60  ;;  %v5976_v11 = vcombine.high %v3269_v61, %v3273_v62  ;;  %v3186_v52 = vld [vmem:[#allocation3] sm:$0xff] }
 0x81d   : > { %4076 = vmatprep.mubr.bf16.mxu0 %v7948_v40  ;;  %4117 = vmatprep.mubr.bf16.mxu1 %v7948_v40  ;;  %v5927_v40 = vcombine.low %v3221_v26, %v3225_v12  ;;  %v3288_v26 = vld [vmem:[%s7504_s12 + $0x2f0] sm:$0xff]  ;;  %v3285_v12 = vld [vmem:[%s7504_s12 + $0x2d8] sm:$0xff] }
 0x81f   : > { %4047 = vmatpush1.bf16.msra.mxu0 %v5909_v6  ;;  %4088 = vmatpush1.bf16.msra.mxu1 %v5911_v37  ;;  %v3281_v6 = vld [vmem:[%s7504_s12 + $0x2b8] sm:$0xff]  ;;  %v5973_v37 = vcombine.low %v3268_v58, %v3272_v60 }
 0x820   : > { %4048 = vmatprep.subr.bf16.mxu0 %v5918_v9  ;;  %4089 = vmatprep.subr.bf16.mxu1 %v5920_v10  ;;  %v5975_v9 = vcombine.low %v3269_v61, %v3273_v62  ;;  %v5982_v10 = vcombine.high %v3276_v4, %v3280_v5  ;;  %v5984_v45 = vcombine.high %v3277_v0, %v3281_v6 }
 0x823   : > { %4049 = vmatpush1.bf16.msra.mxu0 %v5917_v44  ;;  %4090 = vmatpush1.bf16.msra.mxu1 %v5919_v13  ;;  %v3289_v44 = vld [vmem:[%s7504_s12 + $0x2f8] sm:$0xff]  ;;  %v5981_v13 = vcombine.low %v3276_v4, %v3280_v5 }
 0x824   : > { %4050 = vmatprep.subr.bf16.mxu0 %v5926_v18  ;;  %4091 = vmatprep.subr.bf16.mxu1 %v5928_v19  ;;  %v5983_v18 = vcombine.low %v3277_v0, %v3281_v6  ;;  %v5990_v19 = vcombine.high %v3284_v25, %v3288_v26  ;;  %v5992_v20 = vcombine.high %v3285_v12, %v3289_v44  ;;  %v3192_v6 = vld [vmem:[#allocation3 + $0x30] sm:$0xff] }
 0x827   : > { %4051 = vmatpush1.bf16.msra.mxu0 %v5925_v1  ;;  %4092 = vmatpush1.bf16.msra.mxu1 %v5927_v40  ;;  %v3297_v1 = vld [vmem:[%s7504_s12 + $0x338] sm:$0xff]  ;;  %v5989_v40 = vcombine.low %v3284_v25, %v3288_v26 }
 0x828   : > { %4052 = vmatprep.subr.bf16.mxu0 %v5934_v27  ;;  %4093 = vmatprep.subr.bf16.mxu1 %v5936_v29  ;;  %v5991_v27 = vcombine.low %v3285_v12, %v3289_v44  ;;  %v5998_v29 = vcombine.high %v3292_v21, %v3296_v22  ;;  %v6000_v30 = vcombine.high %v3293_v24, %v3297_v1 }
 0x82b   : > { %4053 = vmatpush1.bf16.msra.mxu0 %v5933_v8  ;;  %4094 = vmatpush1.bf16.msra.mxu1 %v5935_v16  ;;  %v3305_v8 = vld [vmem:[%s7504_s12 + $0x378] sm:$0xff]  ;;  %v5997_v16 = vcombine.low %v3292_v21, %v3296_v22 }
 0x82c   : > { %4054 = vmatprep.subr.bf16.mxu0 %v5942_v53  ;;  %4095 = vmatprep.subr.bf16.mxu1 %v5944_v35  ;;  %v5999_v53 = vcombine.low %v3293_v24, %v3297_v1  ;;  %v6006_v35 = vcombine.high %v3300_v32, %v3304_v34  ;;  %v6008_v54 = vcombine.high %v3301_v7, %v3305_v8  ;;  %v6698_v24 = vld [vmem:[%s8563_s28 + $0x40] sm:$0xff] (!%p6025_p5)  }
 0x82d   : > { %v6699_v1 = vld [vmem:[%s8563_s28 + $0xc0] sm:$0xff] (!%p6025_p5)  }
 0x82f   : > { %4055 = vmatpush1.bf16.msra.mxu0 %v5941_v38  ;;  %4096 = vmatpush1.bf16.msra.mxu1 %v5943_v31  ;;  %v3313_v38 = vld [vmem:[%s7504_s12 + $0x3b8] sm:$0xff]  ;;  %v6005_v31 = vcombine.low %v3300_v32, %v3304_v34  ;;  %v6704_v32 = vld [vmem:[%s8563_s28 + $0x8] sm:$0xff] (!%p6025_p5)  }
 0x830   : > { %4056 = vmatprep.subr.bf16.mxu0 %v5950_v39  ;;  %4097 = vmatprep.subr.bf16.mxu1 %v5952_v41  ;;  %v6007_v39 = vcombine.low %v3301_v7, %v3305_v8  ;;  %v6014_v41 = vcombine.high %v3308_v36, %v3312_v28  ;;  %v6016_v42 = vcombine.high %v3309_v33, %v3313_v38  ;;  %v6705_v34 = vld [vmem:[%s8563_s28 + $0x88] sm:$0xff] (!%p6025_p5)   ;;  %v6706_v7 = vld [vmem:[%s8563_s28 + $0x50] sm:$0xff] (!%p6025_p5)  }
 0x831   : > { %v6707_v8 = vld [vmem:[%s8563_s28 + $0xd0] sm:$0xff] (!%p6025_p5)  }
 0x833   : > { %4057 = vmatpush1.bf16.msra.mxu0 %v5949_v17  ;;  %4098 = vmatpush1.bf16.msra.mxu1 %v5951_v46  ;;  %v3321_v17 = vld [vmem:[%s7504_s12 + $0x3f8] sm:$0xff]  ;;  %v6013_v46 = vcombine.low %v3308_v36, %v3312_v28 }
 0x834   : > { %4058 = vmatprep.subr.bf16.mxu0 %v5958_v47  ;;  %4099 = vmatprep.subr.bf16.mxu1 %v5960_v48  ;;  %v6015_v47 = vcombine.low %v3309_v33, %v3313_v38  ;;  %v6022_v48 = vcombine.high %v3316_v43, %v3320_v14  ;;  %v6024_v49 = vcombine.high %v3317_v15, %v3321_v17  ;;  %v6712_v36 = vld [vmem:[%s8563_s28 + $0x18] sm:$0xff] (!%p6025_p5)   ;;  %v6714_v33 = vld [vmem:[%s8563_s28 + $0x60] sm:$0xff] (!%p6025_p5)   ;;  %v6719_v43 = vld [vmem:[%s8563_s28 + $0xe8] sm:$0xff] (!%p6025_p5)  }
 0x835   : > { %v6023_v51 = vcombine.low %v3317_v15, %v3321_v17  ;;  %v6713_v28 = vld [vmem:[%s8563_s28 + $0x98] sm:$0xff] (!%p6025_p5)   ;;  %v6715_v38 = vld [vmem:[%s8563_s28 + $0xe0] sm:$0xff] (!%p6025_p5)   ;;  %v6720_v14 = vld [vmem:[%s8563_s28 + $0x28] sm:$0xff] (!%p6025_p5)  }
 0x836   : > { %v6721_v17 = vld [vmem:[%s8563_s28 + $0xa8] sm:$0xff] (!%p6025_p5)  }
 0x837   : > { %4059 = vmatpush1.bf16.msra.mxu0 %v5957_v55  ;;  %4100 = vmatpush1.bf16.msra.mxu1 %v5959_v56  ;;  %v3188_v55 = vld [vmem:[#allocation3 + $0x10] sm:$0xff]  ;;  %v3187_v56 = vld [vmem:[#allocation3 + $0x8] sm:$0xff] }
 0x838   : > { %4060 = vmatprep.subr.bf16.mxu0 %v5966_v23  ;;  %4101 = vmatprep.subr.bf16.mxu1 %v5968_v57  ;;  %v3189_v57 = vld [vmem:[#allocation3 + $0x18] sm:$0xff] }
 0x83b   : > { %4061 = vmatpush1.bf16.msra.mxu0 %v5965_v63  ;;  %4102 = vmatpush1.bf16.msra.mxu1 %v5967_v2 }
 0x83c   : > { %4062 = vmatprep.subr.bf16.mxu0 %v5974_v3  ;;  %4103 = vmatprep.subr.bf16.mxu1 %v5976_v11 }
 0x83f   : > { %4063 = vmatpush1.bf16.msra.mxu0 %v5973_v37  ;;  %4104 = vmatpush1.bf16.msra.mxu1 %v5975_v9  ;;  %v3191_v37 = vld [vmem:[#allocation3 + $0x28] sm:$0xff] }
 0x840   : > { %4064 = vmatprep.subr.bf16.mxu0 %v5982_v10  ;;  %4105 = vmatprep.subr.bf16.mxu1 %v5984_v45  ;;  %v3193_v10 = vld [vmem:[#allocation3 + $0x38] sm:$0xff] }
 0x843   : > { %4065 = vmatpush1.bf16.msra.mxu0 %v5981_v13  ;;  %4106 = vmatpush1.bf16.msra.mxu1 %v5983_v18 }
 0x844   : > { %4066 = vmatprep.subr.bf16.mxu0 %v5990_v19  ;;  %4107 = vmatprep.subr.bf16.mxu1 %v5992_v20 }
 0x847   : > { %4067 = vmatpush1.bf16.msra.mxu0 %v5989_v40  ;;  %4108 = vmatpush1.bf16.msra.mxu1 %v5991_v27  ;;  %v6700_v40 = vld [vmem:[%s8563_s28] sm:$0xff] (!%p6025_p5)  }
 0x848   : > { %4068 = vmatprep.subr.bf16.mxu0 %v5998_v29  ;;  %4109 = vmatprep.subr.bf16.mxu1 %v6000_v30  ;;  %v6701_v27 = vld [vmem:[%s8563_s28 + $0x80] sm:$0xff] (!%p6025_p5)   ;;  %v6702_v29 = vld [vmem:[%s8563_s28 + $0x48] sm:$0xff] (!%p6025_p5)  }
 0x849   : > { %v6703_v30 = vld [vmem:[%s8563_s28 + $0xc8] sm:$0xff] (!%p6025_p5)  }
 0x84b   : > { %4069 = vmatpush1.bf16.msra.mxu0 %v5997_v16  ;;  %4110 = vmatpush1.bf16.msra.mxu1 %v5999_v53  ;;  %v6708_v16 = vld [vmem:[%s8563_s28 + $0x10] sm:$0xff] (!%p6025_p5)  }
 0x84c   : > { %4070 = vmatprep.subr.bf16.mxu0 %v6006_v35  ;;  %4111 = vmatprep.subr.bf16.mxu1 %v6008_v54  ;;  %v6709_v53 = vld [vmem:[%s8563_s28 + $0x90] sm:$0xff] (!%p6025_p5)   ;;  %v6710_v35 = vld [vmem:[%s8563_s28 + $0x58] sm:$0xff] (!%p6025_p5)  }
 0x84d   : > { %v6711_v54 = vld [vmem:[%s8563_s28 + $0xd8] sm:$0xff] (!%p6025_p5)  }
 0x84f   : > { %4071 = vmatpush1.bf16.msra.mxu0 %v6005_v31  ;;  %4112 = vmatpush1.bf16.msra.mxu1 %v6007_v39  ;;  %v6716_v31 = vld [vmem:[%s8563_s28 + $0x20] sm:$0xff] (!%p6025_p5)   ;;  %v4156_v39 = vlaneseq (!%p6025_p5) }
 0x850   : > { %4072 = vmatprep.subr.bf16.mxu0 %v6014_v41  ;;  %4113 = vmatprep.subr.bf16.mxu1 %v6016_v42  ;;  %v6717_v41 = vld [vmem:[%s8563_s28 + $0xa0] sm:$0xff] (!%p6025_p5)   ;;  %v6718_v42 = vld [vmem:[%s8563_s28 + $0x68] sm:$0xff] (!%p6025_p5)  }
 0x851   : > { %v8129_v15 = vshrl.u32 (!%p6025_p5), %v4156_v39, 7  ;;  %v6753_v39 = vld [vmem:[%s8563_s28 + $0x1a8] sm:$0xff] (!%p6025_p5)  }
 0x853   : > { %4073 = vmatpush1.bf16.msra.mxu0 %v6013_v46  ;;  %4114 = vmatpush1.bf16.msra.mxu1 %v6015_v47  ;;  %v6722_v46 = vld [vmem:[%s8563_s28 + $0x70] sm:$0xff] (!%p6025_p5)  }
 0x854   : > { %4074 = vmatprep.subr.bf16.mxu0 %v6022_v48  ;;  %4115 = vmatprep.subr.bf16.mxu1 %v6024_v49  ;;  %v6723_v47 = vld [vmem:[%s8563_s28 + $0xf0] sm:$0xff] (!%p6025_p5)   ;;  %v4162_v49 = vsub.s32 (!%p6025_p5), 1, %v8129_v15 }
 0x855   : > { %v6724_v48 = vld [vmem:[%s8563_s28 + $0x30] sm:$0xff] (!%p6025_p5)  }
 0x857   : > { %4075 = vmatpush1.bf16.msra.mxu0 %v6021_v50  ;;  %4116 = vmatpush1.bf16.msra.mxu1 %v6023_v51  ;;  %v6725_v50 = vld [vmem:[%s8563_s28 + $0xb0] sm:$0xff] (!%p6025_p5)   ;;  %v4170_v51 = vsub.s32 (!%p6025_p5), 3, %v8129_v15 }
 0x858   : > { %6207 = vmatprep.subr.bf16.mxu0 (!%p6025_p5), %v6698_v24  ;;  %6229 = vmatprep.subr.bf16.mxu1 (!%p6025_p5), %v6699_v1  ;;  %v6735_v24 = vld [vmem:[%s8563_s28 + $0x1c8] sm:$0xff] (!%p6025_p5)  }
 0x859   : > { %v6736_v1 = vld [vmem:[%s8563_s28 + $0x108] sm:$0xff] (!%p6025_p5)  }
 0x85a   : > { %4077 = vmatmul.mubr.bf16.vlgmr.msra.gmra.mrb[4].mxu0 %v7993_v59  ;;  %4118 = vmatmul.mubr.bf16.vlgmr.msra.gmra.mrb[4].mxu1 %v7993_v59  ;;  %v3190_v59 = vld [vmem:[#allocation3 + $0x20] sm:$0xff] }
 0x85b   : > { %6208 = vmatpush3.bf16.msra.mxu0 (!%p6025_p5), %v6700_v40  ;;  %6230 = vmatpush3.bf16.msra.mxu1 (!%p6025_p5), %v6701_v27  ;;  %v6737_v40 = vld [vmem:[%s8563_s28 + $0x188] sm:$0xff] (!%p6025_p5)   ;;  %v6738_v27 = vld [vmem:[%s8563_s28 + $0x150] sm:$0xff] (!%p6025_p5)  }
 0x85c   : > { %6209 = vmatprep.subr.bf16.mxu0 (!%p6025_p5), %v6702_v29  ;;  %6231 = vmatprep.subr.bf16.mxu1 (!%p6025_p5), %v6703_v30  ;;  %v6739_v29 = vld [vmem:[%s8563_s28 + $0x1d0] sm:$0xff] (!%p6025_p5)  }
 0x85d   : > { %v6740_v30 = vld [vmem:[%s8563_s28 + $0x110] sm:$0xff] (!%p6025_p5)  }
 0x85f   : > { %6210 = vmatpush3.bf16.msra.mxu0 (!%p6025_p5), %v6704_v32  ;;  %6232 = vmatpush3.bf16.msra.mxu1 (!%p6025_p5), %v6705_v34  ;;  %v6741_v32 = vld [vmem:[%s8563_s28 + $0x190] sm:$0xff] (!%p6025_p5)   ;;  %v6742_v34 = vld [vmem:[%s8563_s28 + $0x158] sm:$0xff] (!%p6025_p5)  }
 0x860   : > { %6211 = vmatprep.subr.bf16.mxu0 (!%p6025_p5), %v6706_v7  ;;  %6233 = vmatprep.subr.bf16.mxu1 (!%p6025_p5), %v6707_v8  ;;  %v6743_v7 = vld [vmem:[%s8563_s28 + $0x1d8] sm:$0xff] (!%p6025_p5)  }
 0x861   : > { %v6744_v8 = vld [vmem:[%s8563_s28 + $0x118] sm:$0xff] (!%p6025_p5)  }
 0x863   : > { %6212 = vmatpush3.bf16.msra.mxu0 (!%p6025_p5), %v6708_v16  ;;  %6234 = vmatpush3.bf16.msra.mxu1 (!%p6025_p5), %v6709_v53  ;;  %v6745_v16 = vld [vmem:[%s8563_s28 + $0x198] sm:$0xff] (!%p6025_p5)   ;;  %v6746_v53 = vld [vmem:[%s8563_s28 + $0x160] sm:$0xff] (!%p6025_p5)  }
 0x864   : > { %6213 = vmatprep.subr.bf16.mxu0 (!%p6025_p5), %v6710_v35  ;;  %6235 = vmatprep.subr.bf16.mxu1 (!%p6025_p5), %v6711_v54  ;;  %v6747_v35 = vld [vmem:[%s8563_s28 + $0x1e0] sm:$0xff] (!%p6025_p5)  }
 0x865   : > { %v6748_v54 = vld [vmem:[%s8563_s28 + $0x120] sm:$0xff] (!%p6025_p5)  }
 0x867   : > { %6214 = vmatpush3.bf16.msra.mxu0 (!%p6025_p5), %v6712_v36  ;;  %6236 = vmatpush3.bf16.msra.mxu1 (!%p6025_p5), %v6713_v28  ;;  %v6749_v36 = vld [vmem:[%s8563_s28 + $0x1a0] sm:$0xff] (!%p6025_p5)   ;;  %v6750_v28 = vld [vmem:[%s8563_s28 + $0x168] sm:$0xff] (!%p6025_p5)  }
 0x868   : > { %6215 = vmatprep.subr.bf16.mxu0 (!%p6025_p5), %v6714_v33  ;;  %6237 = vmatprep.subr.bf16.mxu1 (!%p6025_p5), %v6715_v38  ;;  %v6751_v33 = vld [vmem:[%s8563_s28 + $0x1e8] sm:$0xff] (!%p6025_p5)  }
 0x869   : > { %v6752_v38 = vld [vmem:[%s8563_s28 + $0x128] sm:$0xff] (!%p6025_p5)  }
 0x86b   : > { %6216 = vmatpush3.bf16.msra.mxu0 (!%p6025_p5), %v6716_v31  ;;  %6238 = vmatpush3.bf16.msra.mxu1 (!%p6025_p5), %v6717_v41  ;;  %v4178_v31 = vsub.s32 (!%p6025_p5), 5, %v8129_v15  ;;  %v4186_v41 = vsub.s32 (!%p6025_p5), 7, %v8129_v15 }
 0x86c   : > { %6217 = vmatprep.subr.bf16.mxu0 (!%p6025_p5), %v6718_v42  ;;  %6239 = vmatprep.subr.bf16.mxu1 (!%p6025_p5), %v6719_v43  ;;  %v6754_v42 = vld [vmem:[%s8563_s28 + $0x170] sm:$0xff] (!%p6025_p5)   ;;  %v4174_v43 = vsub.s32 (!%p6025_p5), 4, %v8129_v15 }
 0x86f   : > { %6218 = vmatpush3.bf16.msra.mxu0 (!%p6025_p5), %v6720_v14  ;;  %6240 = vmatpush3.bf16.msra.mxu1 (!%p6025_p5), %v6721_v17  ;;  %v6755_v14 = vld [vmem:[%s8563_s28 + $0x1f0] sm:$0xff] (!%p6025_p5)   ;;  %v4182_v17 = vsub.s32 (!%p6025_p5), 6, %v8129_v15 }
 0x870   : > { %6219 = vmatprep.subr.bf16.mxu0 (!%p6025_p5), %v6722_v46  ;;  %6241 = vmatprep.subr.bf16.mxu1 (!%p6025_p5), %v6723_v47  ;;  %v6756_v46 = vld [vmem:[%s8563_s28 + $0x130] sm:$0xff] (!%p6025_p5)  }
 0x871   : > { %v6757_v47 = vld [vmem:[%s8563_s28 + $0x1b0] sm:$0xff] (!%p6025_p5)  }
 0x873   : > { %6220 = vmatpush3.bf16.msra.mxu0 (!%p6025_p5), %v6724_v48  ;;  %6242 = vmatpush3.bf16.msra.mxu1 (!%p6025_p5), %v6725_v50  ;;  %v6758_v48 = vld [vmem:[%s8563_s28 + $0x178] sm:$0xff] (!%p6025_p5)  }
 0x8ed   : > { %v3996_v23 = vpop.f32.mrb[0].mxu0  ;;  %v4037_v60 = vpop.f32.mrb[0].mxu1 }
 0x8ee   : > { %v4126_v58 = vadd.f32 %v3996_v23, %v3186_v52  ;;  %v3998_v61 = vpop.f32.mrb[1].mxu0  ;;  %v4128_v62 = vadd.f32 %v4037_v60, %v3188_v55  ;;  %v4039_v2 = vpop.f32.mrb[1].mxu1  ;;  %v6726_v52 = vld [vmem:[%s8563_s28 + $0x78] sm:$0xff] (!%p6025_p5)   ;;  %v4158_v55 = vsub.s32 (!%p6025_p5), 0, %v8129_v15  ;;  %v4166_v23 = vsub.s32 (!%p6025_p5), 2, %v8129_v15 }
 0x8ef   : > { %v4127_v63 = vadd.f32 %v3998_v61, %v3187_v56  ;;  %v4000_v3 = vpop.f32.mrb[2].mxu0  ;;  %v4129_v11 = vadd.f32 %v4039_v2, %v3189_v57  ;;  %v4041_v4 = vpop.f32.mrb[2].mxu1  ;;  %v6727_v56 = vld [vmem:[%s8563_s28 + $0xf8] sm:$0xff] (!%p6025_p5)   ;;  %6221 = vmatprep.subr.bf16.mxu0 (!%p6025_p5), %v6726_v52  ;;  %v8162_v61 = vld [vmem:[#allocation14 + $0xc] sm:$0xff] (!%p6025_p5) }
 0x8f0   : > { %4134 = vst [vmem:[#allocation3] sm:$0xff] %v4126_v58  ;;  %v4001_v5 = vpop.f32.mrb[3].mxu0  ;;  %4136 = vst [vmem:[#allocation3 + $0x10] sm:$0xff] %v4128_v62  ;;  %v4042_v0 = vpop.f32.mrb[3].mxu1  ;;  %v6728_v57 = vld [vmem:[%s8563_s28 + $0x38] sm:$0xff] (!%p6025_p5)   ;;  %6243 = vmatprep.subr.bf16.mxu1 (!%p6025_p5), %v6727_v56  ;;  %v4171_v2 = vrot.slane (!%p6025_p5), %v8162_v61, %v4170_v51  ;;  %v4187_v50 = vrot.slane (!%p6025_p5), %v8162_v61, %v4186_v41  ;;  %v4175_v51 = vrot.slane (!%p6025_p5), %v8162_v61, %v4174_v43  ;;  %v6795_v43 = vld [vmem:[%s8564_s8 + $0x1c0] sm:$0xff] (!%p6025_p5)  }
 0x8f1   : > { %4135 = vst [vmem:[#allocation3 + $0x8] sm:$0xff] %v4127_v63  ;;  %4137 = vst [vmem:[#allocation3 + $0x18] sm:$0xff] %v4129_v11  ;;  %v6729_v58 = vld [vmem:[%s8563_s28 + $0xb8] sm:$0xff] (!%p6025_p5)   ;;  %6222 = vmatpush3.bf16.msra.mxu0 (!%p6025_p5), %v6728_v57  ;;  %v4163_v63 = vrot.slane (!%p6025_p5), %v8162_v61, %v4162_v49  ;;  %v4159_v11 = vrot.slane (!%p6025_p5), %v8162_v61, %v4158_v55  ;;  %v4167_v5 = vrot.slane (!%p6025_p5), %v8162_v61, %v4166_v23  ;;  %v6730_v0 = vld [vmem:[%s8563_s28 + $0x140] sm:$0xff] (!%p6025_p5)  }
 0x8f2   : > { %6244 = vmatpush3.bf16.msra.mxu1 (!%p6025_p5), %v6729_v58  ;;  %6251 = vmatprep.subr.bf16.mxu0 (!%p6025_p5), %v6730_v0  ;;  %v4179_v49 = vrot.slane (!%p6025_p5), %v8162_v61, %v4178_v31  ;;  %v6759_v15 = vld [vmem:[%s8563_s28 + $0x1f8] sm:$0xff] (!%p6025_p5)   ;;  %v4183_v52 = vrot.slane (!%p6025_p5), %v8162_v61, %v4182_v17  ;;  %v6764_v0 = vld [vmem:[%s8564_s8] sm:$0xff] (!%p6025_p5)  }
 0x8f3   : > { %v6760_v55 = vld [vmem:[%s8563_s28 + $0x138] sm:$0xff] (!%p6025_p5)   ;;  %v6797_v17 = vld [vmem:[%s8564_s8 + $0x180] sm:$0xff] (!%p6025_p5)  }
 0x8f4   : > { %v6761_v56 = vld [vmem:[%s8563_s28 + $0x1b8] sm:$0xff] (!%p6025_p5)  }
 0x8f5   : > { %v6791_v31 = vld [vmem:[%s8564_s8 + $0xf8] sm:$0xff] (!%p6025_p5)  }
 0x8f6   : > { %v6793_v41 = vld [vmem:[%s8564_s8 + $0xb8] sm:$0xff] (!%p6025_p5)  }
 0x8f7   : > { %v4146_v3 = vld [vmem:[#allocation3] sm:$0xff] (!%p6025_p5)  ;;  %v4148_v4 = vld [vmem:[#allocation3 + $0x10] sm:$0xff] (!%p6025_p5) }
 0x8f8   : > { %v4147_v60 = vld [vmem:[#allocation3 + $0x8] sm:$0xff] (!%p6025_p5)  ;;  %v4149_v62 = vld [vmem:[#allocation3 + $0x18] sm:$0xff] (!%p6025_p5) }
 0x92b   : > { %4145 = sbr.rel (%p6025_p5) target bundleno = 3047 (0xbe7), region = 108 }
 0x92d   : > { %v4078_v9 = vpop.f32.mrb[4].mxu0  ;;  %v4119_v25 = vpop.f32.mrb[4].mxu1 }
 0x92e   : > { %v4130_v45 = vadd.f32 %v4078_v9, %v3190_v59  ;;  %v4080_v26 = vpop.f32.mrb[5].mxu0  ;;  %v4132_v12 = vadd.f32 %v4119_v25, %v3192_v6  ;;  %v4121_v13 = vpop.f32.mrb[5].mxu1  ;;  %v4197_v59 = vadd.f32 (!%p6025_p5), %v4163_v63, %v4147_v60  ;;  %v4199_v6 = vadd.f32 (!%p6025_p5), %v4171_v2, %v4149_v62 }
 0x92f   : > { %v4131_v44 = vadd.f32 %v4080_v26, %v3191_v37  ;;  %v4082_v18 = vpop.f32.mrb[6].mxu0  ;;  %v4133_v19 = vadd.f32 %v4121_v13, %v3193_v10  ;;  %v4123_v20 = vpop.f32.mrb[6].mxu1  ;;  %v4196_v37 = vadd.f32 (!%p6025_p5), %v4159_v11, %v4146_v3  ;;  %v4198_v9 = vadd.f32 (!%p6025_p5), %v4167_v5, %v4148_v4  ;;  %v6731_v10 = vld [vmem:[%s8563_s28 + $0x1c0] sm:$0xff] (!%p6025_p5)  }
 0x930   : > { %4138 = vst [vmem:[#allocation3 + $0x20] sm:$0xff] %v4130_v45  ;;  %v4083_v21 = vpop.f32.mrb[7].mxu0  ;;  %4140 = vst [vmem:[#allocation3 + $0x30] sm:$0xff] %v4132_v12  ;;  %v4124_v22 = vpop.f32.mrb[7].mxu1  ;;  %v4205_v45 = vmax.f32 (!%p6025_p5), %v4197_v59, 0.0  ;;  %v4207_v25 = vmax.f32 (!%p6025_p5), %v4199_v6, 0.0  ;;  %6273 = vmatprep.subr.bf16.mxu1 (!%p6025_p5), %v6731_v10 }
 0x931   : > { %4139 = vst [vmem:[#allocation3 + $0x28] sm:$0xff] %v4131_v44  ;;  %4141 = vst [vmem:[#allocation3 + $0x38] sm:$0xff] %v4133_v19  ;;  %v4204_v26 = vmax.f32 (!%p6025_p5), %v4196_v37, 0.0  ;;  %v4206_v12 = vmax.f32 (!%p6025_p5), %v4198_v9, 0.0  ;;  %v6732_v44 = vld [vmem:[%s8563_s28 + $0x100] sm:$0xff] (!%p6025_p5)   ;;  %v6734_v22 = vld [vmem:[%s8563_s28 + $0x148] sm:$0xff] (!%p6025_p5)  }
 0x932   : > { %v6733_v13 = vld [vmem:[%s8563_s28 + $0x180] sm:$0xff]   ;;  %v8180_v18 = vpack.c.bf16 %v4205_v45, %v4205_v45  ;;  %v8182_v19 = vpack.c.bf16 %v4207_v25, %v4207_v25 }
 0x933   : > { %v8184_v20 = vpack.c.bf16 %v4204_v26, %v4204_v26  ;;  %v8186_v21 = vpack.c.bf16 %v4206_v12, %v4206_v12  ;;  %v6762_v3 = vld [vmem:[%s8564_s8 + $0x40] sm:$0xff]   ;;  %v6766_v26 = vld [vmem:[%s8564_s8 + $0x48] sm:$0xff]  }
 0x934   : > { %4771 = vmatprep.mubr.bf16.mxu0 %v8180_v18  ;;  %4811 = vmatprep.mubr.bf16.mxu1 %v8182_v19  ;;  %v6763_v5 = vld [vmem:[%s8564_s8 + $0xc0] sm:$0xff]   ;;  %v6767_v12 = vld [vmem:[%s8564_s8 + $0xc8] sm:$0xff]  }
 0x935   : > { %4772 = vmatmul.mubr.bf16.vlgmr.msra.gmra.mrb[0].mxu0 %v8184_v20  ;;  %4812 = vmatmul.mubr.bf16.vlgmr.msra.gmra.mrb[0].mxu1 %v8186_v21  ;;  %v6765_v10 = vld [vmem:[%s8564_s8 + $0x80] sm:$0xff]  }
 0x936   : > { %6252 = vmatpush3.bf16.msra.mxu0 %v6732_v44  ;;  %6274 = vmatpush3.bf16.msra.mxu1 %v6733_v13  ;;  %v6768_v44 = vld [vmem:[%s8564_s8 + $0x8] sm:$0xff]  }
 0x937   : > { %6253 = vmatprep.subr.bf16.mxu0 %v6734_v22  ;;  %6275 = vmatprep.subr.bf16.mxu1 %v6735_v24  ;;  %v4150_v62 = vld [vmem:[#allocation3 + $0x20] sm:$0xff]  ;;  %v4152_v63 = vld [vmem:[#allocation3 + $0x30] sm:$0xff]  ;;  %v6769_v13 = vld [vmem:[%s8564_s8 + $0x88] sm:$0xff]  }
 0x938   : > { %v4151_v23 = vld [vmem:[#allocation3 + $0x28] sm:$0xff]  ;;  %v4153_v57 = vld [vmem:[#allocation3 + $0x38] sm:$0xff]  ;;  %v4200_v2 = vadd.f32 %v4175_v51, %v4150_v62  ;;  %v4202_v61 = vadd.f32 %v4183_v52, %v4152_v63  ;;  %v6770_v22 = vld [vmem:[%s8564_s8 + $0x50] sm:$0xff]  }
 0x939   : > { %v4201_v58 = vadd.f32 %v4179_v49, %v4151_v23  ;;  %v4203_v60 = vadd.f32 %v4187_v50, %v4153_v57  ;;  %v6771_v24 = vld [vmem:[%s8564_s8 + $0xd0] sm:$0xff]   ;;  %v6801_v49 = vld [vmem:[%s8564_s8 + $0x188] sm:$0xff]   ;;  %v6806_v51 = vld [vmem:[%s8564_s8 + $0x158] sm:$0xff]  }
 0x93a   : > { %6254 = vmatpush3.bf16.msra.mxu0 %v6736_v1  ;;  %6276 = vmatpush3.bf16.msra.mxu1 %v6737_v40  ;;  %v4208_v59 = vmax.f32 %v4200_v2, 0.0  ;;  %v4210_v6 = vmax.f32 %v4202_v61, 0.0  ;;  %v6772_v1 = vld [vmem:[%s8564_s8 + $0x10] sm:$0xff]   ;;  %v6807_v52 = vld [vmem:[%s8564_s8 + $0x1d8] sm:$0xff]   ;;  %v6810_v23 = vld [vmem:[%s8564_s8 + $0x160] sm:$0xff]  }
 0x93b   : > { %6255 = vmatprep.subr.bf16.mxu0 %v6738_v27  ;;  %6277 = vmatprep.subr.bf16.mxu1 %v6739_v29  ;;  %v4209_v11 = vmax.f32 %v4201_v58, 0.0  ;;  %v4211_v4 = vmax.f32 %v4203_v60, 0.0  ;;  %v6773_v40 = vld [vmem:[%s8564_s8 + $0x90] sm:$0xff]   ;;  %v6774_v27 = vld [vmem:[%s8564_s8 + $0x58] sm:$0xff]   ;;  %v6811_v57 = vld [vmem:[%s8564_s8 + $0x1e0] sm:$0xff]  }
 0x93c   : > { %v8300_v45 = vpack.c.bf16 %v4208_v59, %v4208_v59  ;;  %v8302_v25 = vpack.c.bf16 %v4210_v6, %v4210_v6  ;;  %v6777_v29 = vld [vmem:[%s8564_s8 + $0x98] sm:$0xff]   ;;  %v6802_v50 = vld [vmem:[%s8564_s8 + $0x150] sm:$0xff]   ;;  %v6812_v58 = vld [vmem:[%s8564_s8 + $0x120] sm:$0xff]  }
 0x93d   : > { %v8293_v37 = vpack.c.bf16 %v4209_v11, %v4209_v11  ;;  %v8295_v9 = vpack.c.bf16 %v4211_v4, %v4211_v4  ;;  %v6813_v60 = vld [vmem:[%s8564_s8 + $0x1a0] sm:$0xff]   ;;  %v6814_v62 = vld [vmem:[%s8564_s8 + $0x168] sm:$0xff]   ;;  %v6819_v11 = vld [vmem:[%s8564_s8 + $0x1f0] sm:$0xff]  }
 0x93e   : > { %6256 = vmatpush3.bf16.msra.mxu0 %v6740_v30  ;;  %6278 = vmatpush3.bf16.msra.mxu1 %v6741_v32  ;;  %v6778_v30 = vld [vmem:[%s8564_s8 + $0x60] sm:$0xff]   ;;  %v6815_v63 = vld [vmem:[%s8564_s8 + $0x1e8] sm:$0xff]   ;;  %v6820_v4 = vld [vmem:[%s8564_s8 + $0x130] sm:$0xff]  }
 0x93f   : > { %6257 = vmatprep.subr.bf16.mxu0 %v6742_v34  ;;  %6279 = vmatprep.subr.bf16.mxu1 %v6743_v7  ;;  %v6779_v32 = vld [vmem:[%s8564_s8 + $0xe0] sm:$0xff]   ;;  %v6816_v2 = vld [vmem:[%s8564_s8 + $0x128] sm:$0xff]   ;;  %v6823_v59 = vld [vmem:[%s8564_s8 + $0x1f8] sm:$0xff]  }
 0x940   : > { %4851 = vmatprep.mubr.bf16.mxu0 %v8293_v37  ;;  %4891 = vmatprep.mubr.bf16.mxu1 %v8295_v9  ;;  %v6780_v34 = vld [vmem:[%s8564_s8 + $0x20] sm:$0xff]   ;;  %v6817_v61 = vld [vmem:[%s8564_s8 + $0x1a8] sm:$0xff]   ;;  %v6824_v6 = vld [vmem:[%s8564_s8 + $0x138] sm:$0xff]  }
 0x941   : > { %v6781_v7 = vld [vmem:[%s8564_s8 + $0xa0] sm:$0xff]  }
 0x942   : > { %6258 = vmatpush3.bf16.msra.mxu0 %v6744_v8  ;;  %6280 = vmatpush3.bf16.msra.mxu1 %v6745_v16  ;;  %v6782_v8 = vld [vmem:[%s8564_s8 + $0x68] sm:$0xff]  }
 0x943   : > { %6259 = vmatprep.subr.bf16.mxu0 %v6746_v53  ;;  %6281 = vmatprep.subr.bf16.mxu1 %v6747_v35  ;;  %v6783_v16 = vld [vmem:[%s8564_s8 + $0xe8] sm:$0xff]  }
 0x944   : > { %v6784_v53 = vld [vmem:[%s8564_s8 + $0x28] sm:$0xff]  }
 0x945   : > { %v6785_v35 = vld [vmem:[%s8564_s8 + $0xa8] sm:$0xff]  }
 0x946   : > { %6260 = vmatpush3.bf16.msra.mxu0 %v6748_v54  ;;  %6282 = vmatpush3.bf16.msra.mxu1 %v6749_v36  ;;  %v6786_v54 = vld [vmem:[%s8564_s8 + $0x70] sm:$0xff]  }
 0x947   : > { %6261 = vmatprep.subr.bf16.mxu0 %v6750_v28  ;;  %6283 = vmatprep.subr.bf16.mxu1 %v6751_v33  ;;  %v6787_v36 = vld [vmem:[%s8564_s8 + $0xf0] sm:$0xff]  }
 0x948   : > { %v6788_v28 = vld [vmem:[%s8564_s8 + $0x30] sm:$0xff]  }
 0x949   : > { %v6789_v33 = vld [vmem:[%s8564_s8 + $0xb0] sm:$0xff]  }
 0x94a   : > { %6262 = vmatpush3.bf16.msra.mxu0 %v6752_v38  ;;  %6284 = vmatpush3.bf16.msra.mxu1 %v6753_v39  ;;  %v6790_v38 = vld [vmem:[%s8564_s8 + $0x78] sm:$0xff]  }
 0x94b   : > { %6263 = vmatprep.subr.bf16.mxu0 %v6754_v42  ;;  %6285 = vmatprep.subr.bf16.mxu1 %v6755_v14  ;;  %v6792_v39 = vld [vmem:[%s8564_s8 + $0x38] sm:$0xff]   ;;  %v6794_v42 = vld [vmem:[%s8564_s8 + $0x140] sm:$0xff]  }
 0x94c   : > { %v6796_v14 = vld [vmem:[%s8564_s8 + $0x100] sm:$0xff]  }
 0x94e   : > { %6264 = vmatpush3.bf16.msra.mxu0 %v6756_v46  ;;  %6286 = vmatpush3.bf16.msra.mxu1 %v6757_v47  ;;  %v6798_v46 = vld [vmem:[%s8564_s8 + $0x148] sm:$0xff]  }
 0x94f   : > { %6265 = vmatprep.subr.bf16.mxu0 %v6758_v48  ;;  %6287 = vmatprep.subr.bf16.mxu1 %v6759_v15  ;;  %v6799_v47 = vld [vmem:[%s8564_s8 + $0x1c8] sm:$0xff]   ;;  %v6805_v15 = vld [vmem:[%s8564_s8 + $0x190] sm:$0xff]  }
 0x950   : > { %v6800_v48 = vld [vmem:[%s8564_s8 + $0x108] sm:$0xff]  }
 0x952   : > { %6266 = vmatpush3.bf16.msra.mxu0 %v6760_v55  ;;  %6288 = vmatpush3.bf16.msra.mxu1 %v6761_v56  ;;  %v6808_v55 = vld [vmem:[%s8564_s8 + $0x118] sm:$0xff]  }
 0x953   : > { %6295 = vmatprep.subr.bf16.mxu0 %v6762_v3  ;;  %6317 = vmatprep.subr.bf16.mxu1 %v6763_v5  ;;  %v6809_v56 = vld [vmem:[%s8564_s8 + $0x198] sm:$0xff]   ;;  %v6818_v3 = vld [vmem:[%s8564_s8 + $0x170] sm:$0xff]  }
 0x954   : > { %v6821_v5 = vld [vmem:[%s8564_s8 + $0x1b0] sm:$0xff]  }
 0x955   : > { %4852 = vmatmul.mubr.bf16.vlgmr.msra.gmra.mrb[4].mxu0 %v8300_v45  ;;  %4892 = vmatmul.mubr.bf16.vlgmr.msra.gmra.mrb[4].mxu1 %v8302_v25 }
 0x956   : > { %6296 = vmatpush3.bf16.msra.mxu0 %v6764_v0  ;;  %6318 = vmatpush3.bf16.msra.mxu1 %v6765_v10  ;;  %v6822_v0 = vld [vmem:[%s8564_s8 + $0x178] sm:$0xff]   ;;  %v7144_v10 = vmov 0.0  }
 0x957   : > { %6297 = vmatprep.subr.bf16.mxu0 %v6766_v26  ;;  %6319 = vmatprep.subr.bf16.mxu1 %v6767_v12 }
 0x958   : > { %5450 = vmatprep.mubr.bf16.mxu0 %v8180_v18  ;;  %5490 = vmatprep.mubr.bf16.mxu1 %v8182_v19  ;;  %v6775_v18 = vld [vmem:[%s8564_s8 + $0xd8] sm:$0xff]  }
 0x959   : > { %v6776_v19 = vld [vmem:[%s8564_s8 + $0x18] sm:$0xff]  }
 0x95a   : > { %6298 = vmatpush3.bf16.msra.mxu0 %v6768_v44  ;;  %6320 = vmatpush3.bf16.msra.mxu1 %v6769_v13  ;;  %v6026_v44 = vld [vmem:[#allocation14 + $0x14] ss:$0 sm:$0xff] }
 0x95b   : > { %6299 = vmatprep.subr.bf16.mxu0 %v6770_v22  ;;  %6321 = vmatprep.subr.bf16.mxu1 %v6771_v24 }
 0x95e   : > { %6300 = vmatpush3.bf16.msra.mxu0 %v6772_v1  ;;  %6322 = vmatpush3.bf16.msra.mxu1 %v6773_v40 }
 0x95f   : > { %6301 = vmatprep.subr.bf16.mxu0 %v6774_v27  ;;  %6323 = vmatprep.subr.bf16.mxu1 %v6775_v18 }
 0x962   : > { %6302 = vmatpush3.bf16.msra.mxu0 %v6776_v19  ;;  %6324 = vmatpush3.bf16.msra.mxu1 %v6777_v29 }
 0x963   : > { %6303 = vmatprep.subr.bf16.mxu0 %v6778_v30  ;;  %6325 = vmatprep.subr.bf16.mxu1 %v6779_v32 }
 0x966   : > { %6304 = vmatpush3.bf16.msra.mxu0 %v6780_v34  ;;  %6326 = vmatpush3.bf16.msra.mxu1 %v6781_v7 }
 0x967   : > { %6305 = vmatprep.subr.bf16.mxu0 %v6782_v8  ;;  %6327 = vmatprep.subr.bf16.mxu1 %v6783_v16 }
 0x96a   : > { %6306 = vmatpush3.bf16.msra.mxu0 %v6784_v53  ;;  %6328 = vmatpush3.bf16.msra.mxu1 %v6785_v35 }
 0x96b   : > { %6307 = vmatprep.subr.bf16.mxu0 %v6786_v54  ;;  %6329 = vmatprep.subr.bf16.mxu1 %v6787_v36 }
 0x96e   : > { %6308 = vmatpush3.bf16.msra.mxu0 %v6788_v28  ;;  %6330 = vmatpush3.bf16.msra.mxu1 %v6789_v33 }
 0x96f   : > { %6309 = vmatprep.subr.bf16.mxu0 %v6790_v38  ;;  %6331 = vmatprep.subr.bf16.mxu1 %v6791_v31  ;;  %v6091_v31 = vld [vmem:[#allocation14 + $0x15] ss:$0 sm:$0xff] }
 0x972   : > { %6310 = vmatpush3.bf16.msra.mxu0 %v6792_v39  ;;  %6332 = vmatpush3.bf16.msra.mxu1 %v6793_v41 }
 0x973   : > { %6339 = vmatprep.subr.bf16.mxu0 %v6794_v42  ;;  %6361 = vmatprep.subr.bf16.mxu1 %v6795_v43 }
 0x975   : > { %5451 = vmatmul.mubr.bf16.vlgmr.msra.gmra.mrb[8].mxu0 %v8184_v20  ;;  %5491 = vmatmul.mubr.bf16.vlgmr.msra.gmra.mrb[8].mxu1 %v8186_v21  ;;  %v6803_v20 = vld [vmem:[%s8564_s8 + $0x1d0] sm:$0xff]  }
 0x976   : > { %6340 = vmatpush3.bf16.msra.mxu0 %v6796_v14  ;;  %6362 = vmatpush3.bf16.msra.mxu1 %v6797_v17  ;;  %v6804_v21 = vld [vmem:[%s8564_s8 + $0x110] sm:$0xff]  }
 0x977   : > { %6341 = vmatprep.subr.bf16.mxu0 %v6798_v46  ;;  %6363 = vmatprep.subr.bf16.mxu1 %v6799_v47 }
 0x978   : > { %5530 = vmatprep.mubr.bf16.mxu0 %v8293_v37  ;;  %5570 = vmatprep.mubr.bf16.mxu1 %v8295_v9  ;;  %v6825_v37 = vld [vmem:[%s8564_s8 + $0x1b8] sm:$0xff]   ;;  %v6826_v9 = vld [vmem:[%s8565_s19] sm:$0xff]  }
 0x97a   : > { %6342 = vmatpush3.bf16.msra.mxu0 %v6800_v48  ;;  %6364 = vmatpush3.bf16.msra.mxu1 %v6801_v49 }
 0x97b   : > { %6343 = vmatprep.subr.bf16.mxu0 %v6802_v50  ;;  %6365 = vmatprep.subr.bf16.mxu1 %v6803_v20 }
 0x97e   : > { %6344 = vmatpush3.bf16.msra.mxu0 %v6804_v21  ;;  %6366 = vmatpush3.bf16.msra.mxu1 %v6805_v15 }
 0x97f   : > { %6345 = vmatprep.subr.bf16.mxu0 %v6806_v51  ;;  %6367 = vmatprep.subr.bf16.mxu1 %v6807_v52 }
 0x982   : > { %6346 = vmatpush3.bf16.msra.mxu0 %v6808_v55  ;;  %6368 = vmatpush3.bf16.msra.mxu1 %v6809_v56 }
 0x983   : > { %6347 = vmatprep.subr.bf16.mxu0 %v6810_v23  ;;  %6369 = vmatprep.subr.bf16.mxu1 %v6811_v57 }
 0x986   : > { %6348 = vmatpush3.bf16.msra.mxu0 %v6812_v58  ;;  %6370 = vmatpush3.bf16.msra.mxu1 %v6813_v60 }
 0x987   : > { %6349 = vmatprep.subr.bf16.mxu0 %v6814_v62  ;;  %6371 = vmatprep.subr.bf16.mxu1 %v6815_v63 }
 0x98a   : > { %6350 = vmatpush3.bf16.msra.mxu0 %v6816_v2  ;;  %6372 = vmatpush3.bf16.msra.mxu1 %v6817_v61 }
 0x98b   : > { %6351 = vmatprep.subr.bf16.mxu0 %v6818_v3  ;;  %6373 = vmatprep.subr.bf16.mxu1 %v6819_v11 }
 0x98e   : > { %6352 = vmatpush3.bf16.msra.mxu0 %v6820_v4  ;;  %6374 = vmatpush3.bf16.msra.mxu1 %v6821_v5 }
 0x98f   : > { %6353 = vmatprep.subr.bf16.mxu0 %v6822_v0  ;;  %6375 = vmatprep.subr.bf16.mxu1 %v6823_v59 }
 0x992   : > { %6354 = vmatpush3.bf16.msra.mxu0 %v6824_v6  ;;  %6376 = vmatpush3.bf16.msra.mxu1 %v6825_v37 }
 0x993   : > { %6513 = vmatprep.subr.bf16.mxu0 %v7144_v10 }
 0x995   : > { %5531 = vmatmul.mubr.bf16.vlgmr.msra.gmra.mrb[12].mxu0 %v8300_v45  ;;  %5571 = vmatmul.mubr.bf16.vlgmr.msra.gmra.mrb[12].mxu1 %v8302_v25 }
 0x996   : > { %6514 = vmatpush3.bf16.msra.mxu0 %v6826_v9  ;;  %6515 = vmatprep.mubr.msk.bf16.mxu0 %vm7145_vm10, %v7144_v10 }
 0xa08   : > { %v6223_v26 = vpop.f32.mrb[0].mxu0  ;;  %v6245_v12 = vpop.f32.mrb[0].mxu1 }
 0xa09   : > { %v6224_v13 = vpop.f32.mrb[1].mxu0  ;;  %v6246_v22 = vpop.f32.mrb[1].mxu1 }
 0xa0a   : > { %v6225_v24 = vadd.f32 %v6224_v13, %v6223_v26  ;;  %v6247_v1 = vadd.f32 %v6246_v22, %v6245_v12  ;;  %v6226_v40 = vpop.f32.mrb[2].mxu0  ;;  %v6248_v27 = vpop.f32.mrb[2].mxu1  ;;  %v5594_v26 = vld [vmem:[#allocation15] sm:$0xff] }
 0xa0b   : > { %v6227_v18 = vpop.f32.mrb[3].mxu0  ;;  %v6249_v45 = vpop.f32.mrb[3].mxu1 }
 0xa0c   : > { %v4774_v19 = vadd.f32 %v6225_v24, %v6026_v44  ;;  %v6156_v24 = vld [vmem:[#allocation14 + $0x16] ss:$0 sm:$0xff] }
 0xa0e   : > { %v4814_v25 = vadd.f32 %v6247_v1, %v4774_v19 }
 0xa28   : > { %v6267_v29 = vpop.f32.mrb[4].mxu0  ;;  %v6289_v30 = vpop.f32.mrb[4].mxu1 }
 0xa29   : > { %v6268_v32 = vpop.f32.mrb[5].mxu0  ;;  %v6290_v34 = vpop.f32.mrb[5].mxu1 }
 0xa2a   : > { %v6269_v7 = vadd.f32 %v6268_v32, %v6267_v29  ;;  %v6291_v8 = vadd.f32 %v6290_v34, %v6289_v30  ;;  %v6270_v16 = vpop.f32.mrb[6].mxu0  ;;  %v6292_v53 = vpop.f32.mrb[6].mxu1 }
 0xa2b   : > { %v6271_v35 = vpop.f32.mrb[7].mxu0  ;;  %v6293_v54 = vpop.f32.mrb[7].mxu1 }
 0xa2c   : > { %v4854_v36 = vadd.f32 %v6269_v7, %v4814_v25 }
 0xa2e   : > { %v8499_v28 = vadd.f32 %v6291_v8, %v4854_v36 }
 0xa48   : > { %v6311_v33 = vpop.f32.mrb[8].mxu0  ;;  %v6333_v38 = vpop.f32.mrb[8].mxu1 }
 0xa49   : > { %v6312_v39 = vpop.f32.mrb[9].mxu0  ;;  %v6334_v41 = vpop.f32.mrb[9].mxu1 }
 0xa4a   : > { %v6313_v42 = vadd.f32 %v6312_v39, %v6311_v33  ;;  %v6335_v43 = vadd.f32 %v6334_v41, %v6333_v38  ;;  %v6314_v14 = vpop.f32.mrb[10].mxu0  ;;  %v6336_v17 = vpop.f32.mrb[10].mxu1 }
 0xa4b   : > { %v6315_v46 = vpop.f32.mrb[11].mxu0  ;;  %v6337_v47 = vpop.f32.mrb[11].mxu1 }
 0xa4c   : > { %v5453_v48 = vadd.f32 %v6313_v42, %v6091_v31 }
 0xa4e   : > { %v5493_v49 = vadd.f32 %v6335_v43, %v5453_v48 }
 0xa68   : > { %v6355_v50 = vpop.f32.mrb[12].mxu0  ;;  %v6377_v20 = vpop.f32.mrb[12].mxu1 }
 0xa69   : > { %v6356_v21 = vpop.f32.mrb[13].mxu0  ;;  %v6378_v15 = vpop.f32.mrb[13].mxu1 }
 0xa6a   : > { %v6357_v51 = vadd.f32 %v6356_v21, %v6355_v50  ;;  %v6379_v52 = vadd.f32 %v6378_v15, %v6377_v20  ;;  %v6358_v55 = vpop.f32.mrb[14].mxu0  ;;  %v6380_v56 = vpop.f32.mrb[14].mxu1 }
 0xa6b   : > { %v6359_v23 = vpop.f32.mrb[15].mxu0  ;;  %v6381_v57 = vpop.f32.mrb[15].mxu1 }
 0xa6c   : > { %v5533_v58 = vadd.f32 %v6357_v51, %v5493_v49 }
 0xa6e   : > { %v5573_v60 = vadd.f32 %v6379_v52, %v5533_v58 }
 0xa70   : > { %v5579_v62 = vand.u32 2147483647, %v5573_v60  ;;  %v5578_v37 = vmax.f32 %v5573_v60, 0.0 }
 0xa72   : > { %v5580_v63 = vsub.f32 0.0, %v5579_v62 }
 0xa74   : > { %v5581_v2 = vmul.f32 1.442695, %v5580_v63 }
 0xa76   : > { %6827 = vpow2.f32 %v5581_v2 }
 0xa80   : > { %v6828_v61 = vpop.eup %6827 }
 0xa81   : > { %v5583_v3 = vadd.f32 1.0, %v6828_v61  ;;  %v5586_v11 = vmul.f32 -0.5, %v6828_v61  ;;  %v5589_v5 = vand.u32 2147483647, %v6828_v61 }
 0xa83   : > { %6829 = vlog2.f32 %v5583_v3  ;;  %v5587_v4 = vadd.f32 1.0, %v5586_v11  ;;  %vm5590_vm11 = vcmp.lt.f32.partialorder %v5589_v5, 0.0004427343 }
 0xa85   : > { %v5588_v6 = vmul.f32 %v6828_v61, %v5587_v4 }
 0xa8d   : > { %v6830_v0 = vpop.eup %6829 }
 0xa8e   : > { %v5585_v59 = vmul.f32 0.6931472, %v6830_v0 }
 0xa90   : > { %v5591_v9 = vsel %vm5590_vm11, %v5588_v6, %v5585_v59 }
 0xa91   : > { %v5592_v10 = vadd.f32 %v5591_v9, %v5578_v37 }
 0xa93   : > { %v5593_v12 = vadd.f32 1e-07, %v5592_v10 }
 0xa95   : > { %5658 = vrot.lane.b32.xlu0 %v5593_v12, %s7146_s16  ;;  %v5595_v44 = vmul.f32 %v5594_v26, %v5593_v12 }
 0xa97   : > { %v5596_v13 = vadd.f32 %v5595_v44, %v8499_v28 }
 0xa99   : > { %5662 = vrot.lane.b32.xlu0 %v5596_v13, %s7147_s17  ;;  %v5597_v22 = vpack.c.bf16 %v5596_v13, %v5596_v13 }
 0xa9b   : > { %6516 = vmatmul.mubr.msk.bf16.vlgmr.msra.gmra.mrb[16].mxu0 %vm5613_vm12, %v5597_v22 }
 0xb07   : > { %v5659_v19 = vpop.permute.xlu0 %5658 }
 0xb08   : > { %v5669_v29 = vsel %vm5613_vm12, %v8499_v28, %v5659_v19 }
 0xb0b   : > { %v5663_v25 = vpop.permute.xlu0 %5662 }
 0xb0c   : > { %v5671_v30 = vsel %vm5670_vm13, %v5669_v29, %v5663_v25 }
 0xb6e   : > { %v5651_v1 = vpop.f32.mrb[16].mxu0 }
 0xb6f   : > { %v5652_v40 = vadd.f32 %v6156_v24, %v5651_v1  ;;  %v6517_v27 = vpop.f32.mrb[17].mxu0 }
 0xb70   : > { %v5654_v18 = vpop.f32.mrb[18].mxu0 }
 0xb71   : > { %5666 = vrot.lane.b32.xlu1 %v5652_v40, %s7148_s24  ;;  %v6518_v45 = vpop.f32.mrb[19].mxu0 }
 0xbe3   : > { %v5667_v32 = vpop.permute.xlu1 %5666 }
 0xbe4   : > { %v5673_v34 = vsel %vm5672_vm14, %v5671_v30, %v5667_v32 }
 0xbe5   : > { %v5675_v7 = vsel %vm5674_vm15, %v5673_v34, 0.0 }
 0xbe6   : > { %5676 = vst [vmem:[%s8566_s29] sm:$0xff] %v5675_v7 }
 0xbe7 PF: > { %p26_p1 = scmp.ge.s32.totalorder %s7423_s27, 6   ;;  %s8567_s21 = smov %s7103_s22 }
 0xbe8   : > { %s8568_s22 = smov %s7107_s23  ;;  %s8569_s23 = smov %s7434_s14 }
 0xbe9   : > { %s8570_s24 = smov %s7423_s27  ;;  %28 = sbr.rel (!%p26_p1) target bundleno = 12 (0xc), region = 142 }
 0xbf0   :  { %5688 = vsyncpa [#allocation5], 1 }
 0xbf1   :  { %5690 = vsyncpa [#allocation5 + $0x1], 1 }
 0xbf2   :  { %5691 = vsyncpa [#allocation7], 1 }
 0xbf3   :  { %5692 = vsyncpa [#allocation10], 1 }
 0xbf4   :  { %5693 = vsyncpa [#allocation13], 1 }
 0xbf5   :  { %5695 = vsyncpa [#allocation13 + $0x1], 1 }
 0xbf6   :  { %5696 = vsyncpa [#allocation16], 1 }

</bundles_post_ra>
